<compile_context>
chip_gen: v7x
topology: tpu7x:2x2x1
jax: 0.10.0
libtpu: 0.0.40
codegen_flags: <defaults>
</compile_context>

<pallas_src>
import functools

import jax
import jax.numpy as jnp
from jax.experimental import pallas as pl
from jax.experimental.pallas import tpu as pltpu

HIDDEN = 768          # matches Linear(768, 6) in the module
HEADS = 12
HEAD_DIM = HIDDEN // HEADS
INTERMEDIATE = 3072
LAYERS = 2            # small synthetic stack (real model has 12)
WINDOW = 4            # local attention window (WINDOW//2 tokens each side)
VOCAB = 1000
MAX_POS = 64
NUM_CLASSES = 6
EPS = 1e-5

MXU_TILE = 256        # v6e/v7x MXU is 256-wide (also a multiple of v5e's 128)


def _tile(dim, pref=MXU_TILE):
    """Tile size: `pref` when it evenly divides `dim`, else the full (small) dim."""
    return pref if dim % pref == 0 else dim


# ----------------------- tiled linear (accumulator grid) ----------------------- #

def _linear_kernel(x_ref, w_ref, b_ref, o_ref, acc_ref, *, activation):
    @pl.when(pl.program_id(2) == 0)
    def _():
        acc_ref[...] = jnp.zeros_like(acc_ref)

    # bf16 operands, f32 accumulation on the MXU.
    acc_ref[...] += jnp.dot(x_ref[...], w_ref[...],
                            preferred_element_type=jnp.float32)

    @pl.when(pl.program_id(2) == pl.num_programs(2) - 1)
    def _():
        y = acc_ref[...] + b_ref[...]
        if activation == "gelu":
            # TODO(synk): HF Longformer uses exact erf GELU; tanh approximation here.
            c = jnp.float32(0.7978845608028654)  # sqrt(2/pi)
            y = 0.5 * y * (1.0 + jnp.tanh(c * (y + 0.044715 * y * y * y)))
        elif activation == "tanh":
            y = jnp.tanh(y)
        o_ref[...] = y.astype(o_ref.dtype)


def linear(x, w, b, activation="none", out_dtype=jnp.bfloat16):
    M, K = x.shape
    N = w.shape[1]
    tm, tn, tk = _tile(M), _tile(N), _tile(K)
    grid = (M // tm, N // tn, K // tk)          # K last = reduction axis
    return pl.pallas_call(
        functools.partial(_linear_kernel, activation=activation),
        out_shape=jax.ShapeDtypeStruct((M, N), out_dtype),
        grid=grid,
        in_specs=[pl.BlockSpec((tm, tk), lambda i, j, k: (i, k)),
                  pl.BlockSpec((tk, tn), lambda i, j, k: (k, j)),
                  pl.BlockSpec((1, tn), lambda i, j, k: (0, j))],
        out_specs=pl.BlockSpec((tm, tn), lambda i, j, k: (i, j)),
        scratch_shapes=[pltpu.VMEM((tm, tn), jnp.float32)],
        compiler_params=pltpu.CompilerParams(
            dimension_semantics=("parallel", "parallel", "arbitrary")),
    )(x.astype(jnp.bfloat16), w.astype(jnp.bfloat16),
      b.reshape(1, N).astype(jnp.float32))


# --------------------------- layer norm (row-tiled) ---------------------------- #

def _ln_core(x, g, b, out_dtype):
    mean = jnp.mean(x, axis=-1, keepdims=True)
    var = jnp.mean(jnp.square(x - mean), axis=-1, keepdims=True)
    y = (x - mean) * jax.lax.rsqrt(var + EPS)
    return (y * g + b).astype(out_dtype)


def _ln_kernel(x_ref, g_ref, b_ref, o_ref):
    o_ref[...] = _ln_core(x_ref[...].astype(jnp.float32),
                          g_ref[...], b_ref[...], o_ref.dtype)


def _add_ln_kernel(x_ref, r_ref, g_ref, b_ref, o_ref):
    x = x_ref[...].astype(jnp.float32) + r_ref[...].astype(jnp.float32)
    o_ref[...] = _ln_core(x, g_ref[...], b_ref[...], o_ref.dtype)


def layernorm(x, gamma, beta, residual=None, out_dtype=jnp.bfloat16):
    M, H = x.shape
    tm = _tile(M)
    grid = (M // tm,)
    row_spec = pl.BlockSpec((tm, H), lambda i: (i, 0))
    vec_spec = pl.BlockSpec((1, H), lambda i: (0, 0))
    g = gamma.reshape(1, H).astype(jnp.float32)
    b = beta.reshape(1, H).astype(jnp.float32)
    cp = pltpu.CompilerParams(dimension_semantics=("parallel",))
    if residual is None:
        return pl.pallas_call(
            _ln_kernel,
            out_shape=jax.ShapeDtypeStruct((M, H), out_dtype),
            grid=grid,
            in_specs=[row_spec, vec_spec, vec_spec],
            out_specs=row_spec,
            compiler_params=cp,
        )(x, g, b)
    return pl.pallas_call(
        _add_ln_kernel,
        out_shape=jax.ShapeDtypeStruct((M, H), out_dtype),
        grid=grid,
        in_specs=[row_spec, row_spec, vec_spec, vec_spec],
        out_specs=row_spec,
        compiler_params=cp,
    )(x, residual, g, b)


# ------------------- local attention (all heads per grid step) ------------------ #

def _attn_kernel(q_ref, k_ref, v_ref, km_ref, o_ref, *, scale, window):
    q = q_ref[0]                                  # (H, S, D) bf16
    k = k_ref[0]
    v = v_ref[0]
    num_heads, S, _ = q.shape

    # bf16 MXU matmul, f32 scores.
    s = jnp.einsum("hqd,hkd->hqk", q, k,
                   preferred_element_type=jnp.float32) * scale      # (H, S, S)

    # Sliding-window band + key-padding mask built in-kernel (no O(S^2) HBM bias).
    qi = jax.lax.broadcasted_iota(jnp.int32, (S, S), 0)
    ki = jax.lax.broadcasted_iota(jnp.int32, (S, S), 1)
    band = jnp.abs(qi - ki) <= (window // 2)                         # (S, S)
    keymask = km_ref[0] > 0.5                                        # (1, S)
    allowed = jnp.logical_and(band, keymask)                         # (S, S)
    s = jnp.where(allowed[None], s, jnp.float32(-1e9))

    m = jnp.max(s, axis=-1, keepdims=True)
    p = jnp.exp(s - m)
    l = jnp.sum(p, axis=-1, keepdims=True)
    p = p * pl.reciprocal(l, approx=True)                            # EUP divide

    ctx = jnp.einsum("hqk,hkd->hqd", p.astype(v.dtype), v,
                     preferred_element_type=jnp.float32)             # (H, S, D)
    # Merge heads in-kernel: lane-dense (S, HIDDEN) store instead of 64-wide stores.
    merged = jnp.concatenate([ctx[h] for h in range(num_heads)], axis=-1)
    o_ref[0] = merged.astype(o_ref.dtype)


def local_attention(q, k, v, keymask):
    # q, k, v: (B, H, S, D) bf16; keymask: (B, 1, S) f32 (1 = keep, 0 = pad).
    B, H, S, D = q.shape
    qkv_spec = pl.BlockSpec((1, H, S, D), lambda b: (b, 0, 0, 0))
    return pl.pallas_call(
        functools.partial(_attn_kernel, scale=1.0 / float(D) ** 0.5, window=WINDOW),
        out_shape=jax.ShapeDtypeStruct((B, S, H * D), jnp.bfloat16),
        grid=(B,),
        in_specs=[qkv_spec, qkv_spec, qkv_spec,
                  pl.BlockSpec((1, 1, S), lambda b: (b, 0, 0))],
        out_specs=pl.BlockSpec((1, S, H * D), lambda b: (b, 0, 0)),
        compiler_params=pltpu.CompilerParams(dimension_semantics=("parallel",)),
    )(q, k, v, keymask)


# ------------------------------- Model glue -------------------------------- #

def init_params(key):
    keys = jax.random.split(key, 5 + LAYERS)

    def dense(k, fin, fout):
        w = (jax.random.normal(k, (fin, fout), jnp.float32) * 0.02).astype(jnp.bfloat16)
        return w, jnp.zeros((fout,), jnp.float32)

    params = {
        "word_emb": jax.random.normal(keys[0], (VOCAB, HIDDEN), jnp.float32) * 0.02,
        "pos_emb": jax.random.normal(keys[1], (MAX_POS, HIDDEN), jnp.float32) * 0.02,
        "type_emb": jax.random.normal(keys[2], (1, HIDDEN), jnp.float32) * 0.02,
        "emb_ln_g": jnp.ones((HIDDEN,), jnp.float32),
        "emb_ln_b": jnp.zeros((HIDDEN,), jnp.float32),
        "layers": [],
    }
    params["pool_w"], params["pool_b"] = dense(keys[3], HIDDEN, HIDDEN)
    params["cls_w"], params["cls_b"] = dense(keys[4], HIDDEN, NUM_CLASSES)
    for l in range(LAYERS):
        lk = jax.random.split(keys[5 + l], 6)
        wq, bq = dense(lk[0], HIDDEN, HIDDEN)
        wk, bk = dense(lk[1], HIDDEN, HIDDEN)
        wv, bv = dense(lk[2], HIDDEN, HIDDEN)
        wo, bo = dense(lk[3], HIDDEN, HIDDEN)
        wi, bi = dense(lk[4], HIDDEN, INTERMEDIATE)
        wo2, bo2 = dense(lk[5], INTERMEDIATE, HIDDEN)
        params["layers"].append(dict(
            # Fused QKV projection: one (768, 2304) matmul per layer.
            wqkv=jnp.concatenate([wq, wk, wv], axis=1),
            bqkv=jnp.concatenate([bq, bk, bv], axis=0),
            wo=wo, bo=bo,
            ln1_g=jnp.ones((HIDDEN,), jnp.float32),
            ln1_b=jnp.zeros((HIDDEN,), jnp.float32),
            wi=wi, bi=bi, wo2=wo2, bo2=bo2,
            ln2_g=jnp.ones((HIDDEN,), jnp.float32),
            ln2_b=jnp.zeros((HIDDEN,), jnp.float32),
        ))
    return params


def longformer_forward(params, ids, mask):
    B, S = ids.shape

    # --- embeddings (gather = glue, layer-norm in Pallas, no dummy residual) ---
    emb = (jnp.take(params["word_emb"], ids, axis=0)
           + params["pos_emb"][None, :S, :]
           + params["type_emb"][0][None, None, :])
    x = layernorm(emb.reshape(B * S, HIDDEN),
                  params["emb_ln_g"], params["emb_ln_b"])            # bf16 (B*S, H)

    # Per-batch key-padding mask; the sliding-window band is generated in-kernel.
    keymask = mask.astype(jnp.float32).reshape(B, 1, S)

    # --- encoder layers ---
    for lp in params["layers"]:
        resid = x
        qkv = linear(x, lp["wqkv"], lp["bqkv"])                      # (B*S, 3*H)
        qkv = qkv.reshape(B, S, 3, HEADS, HEAD_DIM).transpose(2, 0, 3, 1, 4)
        ctx = local_attention(qkv[0], qkv[1], qkv[2], keymask)       # (B, S, H)
        attn_out = linear(ctx.reshape(B * S, HIDDEN), lp["wo"], lp["bo"])
        x = layernorm(attn_out, lp["ln1_g"], lp["ln1_b"], residual=resid)

        resid = x
        h = linear(x, lp["wi"], lp["bi"], activation="gelu")
        h = linear(h, lp["wo2"], lp["bo2"])
        x = layernorm(h, lp["ln2_g"], lp["ln2_b"], residual=resid)

    # --- pooler: first-token hidden state -> dense -> tanh ---
    hidden = x.reshape(B, S, HIDDEN)
    pooled = linear(hidden[:, 0, :], params["pool_w"], params["pool_b"],
                    activation="tanh")

    # Dropout(p=0.3) is identity in eval mode (inference forward).
    logits = linear(pooled, params["cls_w"], params["cls_b"], out_dtype=jnp.float32)
    return logits


if __name__ == "__main__":
    key = jax.random.PRNGKey(0)
    pkey, ikey = jax.random.split(key)
    params = init_params(pkey)

    B, S = 2, 8
    ids = jax.random.randint(ikey, (B, S), 0, VOCAB, dtype=jnp.int32)
    mask = jnp.ones((B, S), jnp.int32).at[1, 6:].set(0)   # pad last 2 tokens of batch 1

    out = jax.jit(longformer_forward)(params, ids, mask)
    out = jax.block_until_ready(out)
    assert out.shape == (B, NUM_CLASSES) and out.dtype == jnp.float32
    assert bool(jnp.all(jnp.isfinite(out)))
    print("KERNEL_OK")
</pallas_src>

<mosaic_0001>
module attributes {stable_mosaic.version = 11 : i64} {
  func.func @_linear_kernel(%arg0: i32, %arg1: i32, %arg2: i32, %arg3: memref<16x256xbf16, #tpu.memory_space<vmem>>, %arg4: memref<256x256xbf16, #tpu.memory_space<vmem>>, %arg5: memref<1x256xf32, #tpu.memory_space<vmem>>, %arg6: memref<16x256xbf16, #tpu.memory_space<vmem>>, %arg7: memref<16x256xf32, #tpu.memory_space<vmem>>) attributes {dimension_semantics = [#tpu.dimension_semantics<parallel>, #tpu.dimension_semantics<parallel>, #tpu.dimension_semantics<arbitrary>], iteration_bounds = array<i64: 1, 9, 3>, scalar_prefetch = 0 : i64, scratch_operands = 1 : i64, tpu.core_type = #tpu.core_type<tc>, window_params = [{transform_indices = @transform_0, window_bounds = array<i64: 16, 256>}, {transform_indices = @transform_1, window_bounds = array<i64: 256, 256>}, {transform_indices = @transform_2, window_bounds = array<i64: 1, 256>}, {transform_indices = @transform_3, window_bounds = array<i64: 16, 256>}]} {
    %c0_i32 = arith.constant 0 : i32
    %0 = arith.cmpi eq, %arg2, %c0_i32 : i32
    %1 = arith.extui %0 : i1 to i32
    %c0_i32_0 = arith.constant 0 : i32
    %2 = arith.cmpi ne, %1, %c0_i32_0 : i32
    scf.if %2 {
      %cst_9 = arith.constant 0.000000e+00 : f32
      %12 = vector.broadcast %cst_9 : f32 to vector<16x256xf32>
      %c0_10 = arith.constant 0 : index
      %c0_11 = arith.constant 0 : index
      %13 = vector.load %arg7[%c0_10, %c0_11] : memref<16x256xf32, #tpu.memory_space<vmem>>, vector<16x256xf32>
      tpu.vector_store %arg7[%c0_10, %c0_11], %12 {strides = array<i32>} : memref<16x256xf32, #tpu.memory_space<vmem>>, vector<16x256xf32>,
    } else {
    }
    %c0 = arith.constant 0 : index
    %c0_1 = arith.constant 0 : index
    %3 = vector.load %arg7[%c0, %c0_1] : memref<16x256xf32, #tpu.memory_space<vmem>>, vector<16x256xf32>
    %c0_2 = arith.constant 0 : index
    %c0_3 = arith.constant 0 : index
    %4 = vector.load %arg3[%c0_2, %c0_3] : memref<16x256xbf16, #tpu.memory_space<vmem>>, vector<16x256xbf16>
    %c0_4 = arith.constant 0 : index
    %c0_5 = arith.constant 0 : index
    %5 = vector.load %arg4[%c0_4, %c0_5] : memref<256x256xbf16, #tpu.memory_space<vmem>>, vector<256x256xbf16>
    %cst = arith.constant dense<0.000000e+00> : vector<16x256xf32>
    %6 = tpu.matmul %4, %5, %cst {dimension_numbers = #tpu.dot_dimension_numbers<[1], [0], [0], [1], [0, 0, 1, 1], [], []>} : vector<16x256xbf16>, vector<256x256xbf16>, vector<16x256xf32> -> vector<16x256xf32>
    %7 = arith.addf %3, %6 : vector<16x256xf32>
    %c0_6 = arith.constant 0 : index
    %c0_7 = arith.constant 0 : index
    %8 = vector.load %arg7[%c0_6, %c0_7] : memref<16x256xf32, #tpu.memory_space<vmem>>, vector<16x256xf32>
    tpu.vector_store %arg7[%c0_6, %c0_7], %7 {strides = array<i32>} : memref<16x256xf32, #tpu.memory_space<vmem>>, vector<16x256xf32>,
    %c2_i32 = arith.constant 2 : i32
    %9 = arith.cmpi eq, %arg2, %c2_i32 : i32
    %10 = arith.extui %9 : i1 to i32
    %c0_i32_8 = arith.constant 0 : i32
    %11 = arith.cmpi ne, %10, %c0_i32_8 : i32
    scf.if %11 {
      %c0_9 = arith.constant 0 : index
      %c0_10 = arith.constant 0 : index
      %12 = vector.load %arg7[%c0_9, %c0_10] : memref<16x256xf32, #tpu.memory_space<vmem>>, vector<16x256xf32>
      %c0_11 = arith.constant 0 : index
      %c0_12 = arith.constant 0 : index
      %13 = vector.load %arg5[%c0_11, %c0_12] : memref<1x256xf32, #tpu.memory_space<vmem>>, vector<1x256xf32>
      %14 = vector.broadcast %13 : vector<1x256xf32> to vector<16x256xf32>
      %15 = arith.addf %12, %14 : vector<16x256xf32>
      %16 = arith.truncf %15 : vector<16x256xf32> to vector<16x256xbf16>
      %c0_13 = arith.constant 0 : index
      %c0_14 = arith.constant 0 : index
      %17 = vector.load %arg6[%c0_13, %c0_14] : memref<16x256xbf16, #tpu.memory_space<vmem>>, vector<16x256xbf16>
      tpu.vector_store %arg6[%c0_13, %c0_14], %16 {strides = array<i32>} : memref<16x256xbf16, #tpu.memory_space<vmem>>, vector<16x256xbf16>,
    } else {
    }
    return
  }
  func.func @transform_0(%arg0: i32, %arg1: i32, %arg2: i32) -> (i32, i32) {
    %c0_i32 = arith.constant 0 : i32
    return %arg0, %arg2 : i32, i32
  }
  func.func @transform_1(%arg0: i32, %arg1: i32, %arg2: i32) -> (i32, i32) {
    %c0_i32 = arith.constant 0 : i32
    return %arg2, %arg1 : i32, i32
  }
  func.func @transform_2(%arg0: i32, %arg1: i32, %arg2: i32) -> (i32, i32) {
    %c0_i32 = arith.constant 0 : i32
    %c0_i32_0 = arith.constant 0 : i32
    return %c0_i32, %arg1 : i32, i32
  }
  func.func @transform_3(%arg0: i32, %arg1: i32, %arg2: i32) -> (i32, i32) {
    %c0_i32 = arith.constant 0 : i32
    return %arg0, %arg1 : i32, i32
  }
}

module attributes {stable_mosaic.version = 11 : i64} {
  func.func @_ln_kernel(%arg0: i32, %arg1: memref<16x768xf32, #tpu.memory_space<vmem>>, %arg2: memref<1x768xf32, #tpu.memory_space<vmem>>, %arg3: memref<1x768xf32, #tpu.memory_space<vmem>>, %arg4: memref<16x768xbf16, #tpu.memory_space<vmem>>) attributes {dimension_semantics = [#tpu.dimension_semantics<parallel>], iteration_bounds = array<i64: 1>, scalar_prefetch = 0 : i64, scratch_operands = 0 : i64, tpu.core_type = #tpu.core_type<tc>, window_params = [{transform_indices = @transform_0, window_bounds = array<i64: 16, 768>}, {pipeline_mode = #tpu.pipeline_mode<synchronous>, transform_indices = @transform_1, window_bounds = array<i64: 1, 768>}, {pipeline_mode = #tpu.pipeline_mode<synchronous>, transform_indices = @transform_2, window_bounds = array<i64: 1, 768>}, {transform_indices = @transform_3, window_bounds = array<i64: 16, 768>}]} {
    %c0 = arith.constant 0 : index
    %c0_0 = arith.constant 0 : index
    %0 = vector.load %arg1[%c0, %c0_0] : memref<16x768xf32, #tpu.memory_space<vmem>>, vector<16x768xf32>
    %c0_1 = arith.constant 0 : index
    %c0_2 = arith.constant 0 : index
    %1 = vector.load %arg2[%c0_1, %c0_2] : memref<1x768xf32, #tpu.memory_space<vmem>>, vector<1x768xf32>
    %c0_3 = arith.constant 0 : index
    %c0_4 = arith.constant 0 : index
    %2 = vector.load %arg3[%c0_3, %c0_4] : memref<1x768xf32, #tpu.memory_space<vmem>>, vector<1x768xf32>
    %cst = arith.constant dense<0.000000e+00> : vector<16xf32>
    %3 = vector.multi_reduction <add>, %0, %cst [1] : vector<16x768xf32> to vector<16xf32>
    %4 = vector.shape_cast %3 : vector<16xf32> to vector<16x1xf32>
    %cst_5 = arith.constant 7.680000e+02 : f32
    %5 = vector.broadcast %cst_5 : f32 to vector<16x1xf32>
    %6 = arith.divf %4, %5 : vector<16x1xf32>
    %7 = vector.broadcast %6 : vector<16x1xf32> to vector<16x768xf32>
    %8 = arith.subf %0, %7 : vector<16x768xf32>
    %9 = arith.mulf %8, %8 : vector<16x768xf32>
    %cst_6 = arith.constant dense<0.000000e+00> : vector<16xf32>
    %10 = vector.multi_reduction <add>, %9, %cst_6 [1] : vector<16x768xf32> to vector<16xf32>
    %11 = vector.shape_cast %10 : vector<16xf32> to vector<16x1xf32>
    %cst_7 = arith.constant 7.680000e+02 : f32
    %12 = vector.broadcast %cst_7 : f32 to vector<16x1xf32>
    %13 = arith.divf %11, %12 : vector<16x1xf32>
    %14 = vector.broadcast %6 : vector<16x1xf32> to vector<16x768xf32>
    %15 = arith.subf %0, %14 : vector<16x768xf32>
    %cst_8 = arith.constant 9.99999974E-6 : f32
    %16 = vector.broadcast %cst_8 : f32 to vector<16x1xf32>
    %17 = arith.addf %13, %16 : vector<16x1xf32>
    %18 = math.rsqrt %17 : vector<16x1xf32>
    %19 = vector.broadcast %18 : vector<16x1xf32> to vector<16x768xf32>
    %20 = arith.mulf %15, %19 : vector<16x768xf32>
    %21 = vector.broadcast %1 : vector<1x768xf32> to vector<16x768xf32>
    %22 = arith.mulf %20, %21 : vector<16x768xf32>
    %23 = vector.broadcast %2 : vector<1x768xf32> to vector<16x768xf32>
    %24 = arith.addf %22, %23 : vector<16x768xf32>
    %25 = arith.truncf %24 : vector<16x768xf32> to vector<16x768xbf16>
    %c0_9 = arith.constant 0 : index
    %c0_10 = arith.constant 0 : index
    %26 = vector.load %arg4[%c0_9, %c0_10] : memref<16x768xbf16, #tpu.memory_space<vmem>>, vector<16x768xbf16>
    tpu.vector_store %arg4[%c0_9, %c0_10], %25 {strides = array<i32>} : memref<16x768xbf16, #tpu.memory_space<vmem>>, vector<16x768xbf16>,
    return
  }
  func.func @transform_0(%arg0: i32) -> (i32, i32) {
    %c0_i32 = arith.constant 0 : i32
    %c0_i32_0 = arith.constant 0 : i32
    return %arg0, %c0_i32 : i32, i32
  }
  func.func @transform_1(%arg0: i32) -> (i32, i32) {
    %c0_i32 = arith.constant 0 : i32
    %c0_i32_0 = arith.constant 0 : i32
    %c0_i32_1 = arith.constant 0 : i32
    return %c0_i32, %c0_i32_0 : i32, i32
  }
  func.func @transform_2(%arg0: i32) -> (i32, i32) {
    %c0_i32 = arith.constant 0 : i32
    %c0_i32_0 = arith.constant 0 : i32
    %c0_i32_1 = arith.constant 0 : i32
    return %c0_i32, %c0_i32_0 : i32, i32
  }
  func.func @transform_3(%arg0: i32) -> (i32, i32) {
    %c0_i32 = arith.constant 0 : i32
    %c0_i32_0 = arith.constant 0 : i32
    return %arg0, %c0_i32 : i32, i32
  }
}

module attributes {stable_mosaic.version = 11 : i64} {
  func.func @_attn_kernel(%arg0: i32, %arg1: memref<1x12x8x64xbf16, #tpu.memory_space<vmem>>, %arg2: memref<1x12x8x64xbf16, #tpu.memory_space<vmem>>, %arg3: memref<1x12x8x64xbf16, #tpu.memory_space<vmem>>, %arg4: memref<1x1x8xf32, #tpu.memory_space<vmem>>, %arg5: memref<1x8x768xbf16, #tpu.memory_space<vmem>>) attributes {dimension_semantics = [#tpu.dimension_semantics<parallel>], iteration_bounds = array<i64: 2>, scalar_prefetch = 0 : i64, scratch_operands = 0 : i64, tpu.core_type = #tpu.core_type<tc>, window_params = [{transform_indices = @transform_0, window_bounds = array<i64: 1, 12, 8, 64>}, {transform_indices = @transform_1, window_bounds = array<i64: 1, 12, 8, 64>}, {transform_indices = @transform_2, window_bounds = array<i64: 1, 12, 8, 64>}, {transform_indices = @transform_3, window_bounds = array<i64: 1, 1, 8>}, {transform_indices = @transform_4, window_bounds = array<i64: 1, 8, 768>}]} {
    %c0 = arith.constant 0 : index
    %c0_0 = arith.constant 0 : index
    %c0_1 = arith.constant 0 : index
    %c0_2 = arith.constant 0 : index
    %0 = vector.load %arg1[%c0, %c0_0, %c0_1, %c0_2] : memref<1x12x8x64xbf16, #tpu.memory_space<vmem>>, vector<1x12x8x64xbf16>
    %1 = vector.shape_cast %0 : vector<1x12x8x64xbf16> to vector<12x8x64xbf16>
    %c0_3 = arith.constant 0 : index
    %c0_4 = arith.constant 0 : index
    %c0_5 = arith.constant 0 : index
    %c0_6 = arith.constant 0 : index
    %2 = vector.load %arg2[%c0_3, %c0_4, %c0_5, %c0_6] : memref<1x12x8x64xbf16, #tpu.memory_space<vmem>>, vector<1x12x8x64xbf16>
    %3 = vector.shape_cast %2 : vector<1x12x8x64xbf16> to vector<12x8x64xbf16>
    %c0_7 = arith.constant 0 : index
    %c0_8 = arith.constant 0 : index
    %c0_9 = arith.constant 0 : index
    %c0_10 = arith.constant 0 : index
    %4 = vector.load %arg3[%c0_7, %c0_8, %c0_9, %c0_10] : memref<1x12x8x64xbf16, #tpu.memory_space<vmem>>, vector<1x12x8x64xbf16>
    %5 = vector.shape_cast %4 : vector<1x12x8x64xbf16> to vector<12x8x64xbf16>
    "tpu.trace_start"() <{level = 10 : i32, message = "hqd,hkd->hqk"}> : () -> ()
    %cst = arith.constant dense<0.000000e+00> : vector<12x8x8xf32>
    %6 = tpu.matmul %1, %3, %cst {dimension_numbers = #tpu.dot_dimension_numbers<[2], [2], [1], [1], [0, 0, 0, 1, 1, 1], [0], [0]>} : vector<12x8x64xbf16>, vector<12x8x64xbf16>, vector<12x8x8xf32> -> vector<12x8x8xf32>
    "tpu.trace_stop"() : () -> ()
    %cst_11 = arith.constant 1.250000e-01 : f32
    %7 = vector.broadcast %cst_11 : f32 to vector<12x8x8xf32>
    %8 = arith.mulf %6, %7 : vector<12x8x8xf32>
    %9 = tpu.iota {dimensions = array<i32: 0>} : vector<8x8xi32>
    %10 = tpu.iota {dimensions = array<i32: 1>} : vector<8x8xi32>
    %11 = arith.subi %9, %10 : vector<8x8xi32>
    %12 = math.absi %11 : vector<8x8xi32>
    %c2_i32 = arith.constant 2 : i32
    %13 = vector.broadcast %c2_i32 : i32 to vector<8x8xi32>
    %14 = arith.cmpi sle, %12, %13 : vector<8x8xi32>
    %c0_12 = arith.constant 0 : index
    %c0_13 = arith.constant 0 : index
    %c0_14 = arith.constant 0 : index
    %15 = vector.load %arg4[%c0_12, %c0_13, %c0_14] : memref<1x1x8xf32, #tpu.memory_space<vmem>>, vector<1x1x8xf32>
    %16 = vector.shape_cast %15 : vector<1x1x8xf32> to vector<1x8xf32>
    %cst_15 = arith.constant 5.000000e-01 : f32
    %17 = vector.broadcast %cst_15 : f32 to vector<1x8xf32>
    %18 = arith.cmpf ogt, %16, %17 : vector<1x8xf32>
    %19 = vector.broadcast %18 : vector<1x8xi1> to vector<8x8xi1>
    %20 = arith.andi %14, %19 : vector<8x8xi1>
    %21 = vector.shape_cast %20 : vector<8x8xi1> to vector<1x8x8xi1>
    %cst_16 = arith.constant -1.000000e+09 : f32
    %22 = vector.shape_cast %21 : vector<1x8x8xi1> to vector<1x8x8xi1>
    %23 = vector.broadcast %22 : vector<1x8x8xi1> to vector<12x8x8xi1>
    %24 = vector.broadcast %cst_16 : f32 to vector<12x8x8xf32>
    %25 = arith.select %23, %8, %24 : vector<12x8x8xi1>, vector<12x8x8xf32>
    %cst_17 = arith.constant dense<0xFF800000> : vector<12x8xf32>
    %26 = vector.multi_reduction <maximumf>, %25, %cst_17 [2] : vector<12x8x8xf32> to vector<12x8xf32>
    %27 = vector.shape_cast %26 : vector<12x8xf32> to vector<12x8x1xf32>
    %28 = vector.broadcast %27 : vector<12x8x1xf32> to vector<12x8x8xf32>
    %29 = arith.subf %25, %28 : vector<12x8x8xf32>
    %30 = math.exp %29 : vector<12x8x8xf32>
    %cst_18 = arith.constant dense<0.000000e+00> : vector<12x8xf32>
    %31 = vector.multi_reduction <add>, %30, %cst_18 [2] : vector<12x8x8xf32> to vector<12x8xf32>
    %32 = vector.shape_cast %31 : vector<12x8xf32> to vector<12x8x1xf32>
    %33 = tpu.reciprocal %32 {approx = true} : vector<12x8x1xf32> -> vector<12x8x1xf32>
    %34 = vector.broadcast %33 : vector<12x8x1xf32> to vector<12x8x8xf32>
    %35 = arith.mulf %30, %34 : vector<12x8x8xf32>
    %36 = arith.truncf %35 : vector<12x8x8xf32> to vector<12x8x8xbf16>
    "tpu.trace_start"() <{level = 10 : i32, message = "hqk,hkd->hqd"}> : () -> ()
    %cst_19 = arith.constant dense<0.000000e+00> : vector<12x8x64xf32>
    %37 = tpu.matmul %36, %5, %cst_19 {dimension_numbers = #tpu.dot_dimension_numbers<[2], [1], [1], [2], [0, 0, 0, 1, 1, 2], [0], [0]>} : vector<12x8x8xbf16>, vector<12x8x64xbf16>, vector<12x8x64xf32> -> vector<12x8x64xf32>
    "tpu.trace_stop"() : () -> ()
    %38 = vector.extract_strided_slice %37 {offsets = [0, 0, 0], sizes = [1, 8, 64], strides = [1, 1, 1]} : vector<12x8x64xf32> to vector<1x8x64xf32>
    %39 = vector.shape_cast %38 : vector<1x8x64xf32> to vector<8x64xf32>
    %40 = vector.extract_strided_slice %37 {offsets = [1, 0, 0], sizes = [1, 8, 64], strides = [1, 1, 1]} : vector<12x8x64xf32> to vector<1x8x64xf32>
    %41 = vector.shape_cast %40 : vector<1x8x64xf32> to vector<8x64xf32>
    %42 = vector.extract_strided_slice %37 {offsets = [2, 0, 0], sizes = [1, 8, 64], strides = [1, 1, 1]} : vector<12x8x64xf32> to vector<1x8x64xf32>
    %43 = vector.shape_cast %42 : vector<1x8x64xf32> to vector<8x64xf32>
    %44 = vector.extract_strided_slice %37 {offsets = [3, 0, 0], sizes = [1, 8, 64], strides = [1, 1, 1]} : vector<12x8x64xf32> to vector<1x8x64xf32>
    %45 = vector.shape_cast %44 : vector<1x8x64xf32> to vector<8x64xf32>
    %46 = vector.extract_strided_slice %37 {offsets = [4, 0, 0], sizes = [1, 8, 64], strides = [1, 1, 1]} : vector<12x8x64xf32> to vector<1x8x64xf32>
    %47 = vector.shape_cast %46 : vector<1x8x64xf32> to vector<8x64xf32>
    %48 = vector.extract_strided_slice %37 {offsets = [5, 0, 0], sizes = [1, 8, 64], strides = [1, 1, 1]} : vector<12x8x64xf32> to vector<1x8x64xf32>
    %49 = vector.shape_cast %48 : vector<1x8x64xf32> to vector<8x64xf32>
    %50 = vector.extract_strided_slice %37 {offsets = [6, 0, 0], sizes = [1, 8, 64], strides = [1, 1, 1]} : vector<12x8x64xf32> to vector<1x8x64xf32>
    %51 = vector.shape_cast %50 : vector<1x8x64xf32> to vector<8x64xf32>
    %52 = vector.extract_strided_slice %37 {offsets = [7, 0, 0], sizes = [1, 8, 64], strides = [1, 1, 1]} : vector<12x8x64xf32> to vector<1x8x64xf32>
    %53 = vector.shape_cast %52 : vector<1x8x64xf32> to vector<8x64xf32>
    %54 = vector.extract_strided_slice %37 {offsets = [8, 0, 0], sizes = [1, 8, 64], strides = [1, 1, 1]} : vector<12x8x64xf32> to vector<1x8x64xf32>
    %55 = vector.shape_cast %54 : vector<1x8x64xf32> to vector<8x64xf32>
    %56 = vector.extract_strided_slice %37 {offsets = [9, 0, 0], sizes = [1, 8, 64], strides = [1, 1, 1]} : vector<12x8x64xf32> to vector<1x8x64xf32>
    %57 = vector.shape_cast %56 : vector<1x8x64xf32> to vector<8x64xf32>
    %58 = vector.extract_strided_slice %37 {offsets = [10, 0, 0], sizes = [1, 8, 64], strides = [1, 1, 1]} : vector<12x8x64xf32> to vector<1x8x64xf32>
    %59 = vector.shape_cast %58 : vector<1x8x64xf32> to vector<8x64xf32>
    %60 = vector.extract_strided_slice %37 {offsets = [11, 0, 0], sizes = [1, 8, 64], strides = [1, 1, 1]} : vector<12x8x64xf32> to vector<1x8x64xf32>
    %61 = vector.shape_cast %60 : vector<1x8x64xf32> to vector<8x64xf32>
    %62 = tpu.concatenate %39, %41, %43, %45, %47, %49, %51, %53, %55, %57, %59, %61 in 1 : vector<8x64xf32>, vector<8x64xf32>, vector<8x64xf32>, vector<8x64xf32>, vector<8x64xf32>, vector<8x64xf32>, vector<8x64xf32>, vector<8x64xf32>, vector<8x64xf32>, vector<8x64xf32>, vector<8x64xf32>, vector<8x64xf32> -> vector<8x768xf32>
    %63 = arith.truncf %62 : vector<8x768xf32> to vector<8x768xbf16>
    %c0_20 = arith.constant 0 : index
    %c0_21 = arith.constant 0 : index
    %c0_22 = arith.constant 0 : index
    %64 = vector.load %arg5[%c0_20, %c0_21, %c0_22] : memref<1x8x768xbf16, #tpu.memory_space<vmem>>, vector<1x8x768xbf16>
    %65 = vector.shape_cast %64 : vector<1x8x768xbf16> to vector<8x768xbf16>
    %66 = vector.shape_cast %63 : vector<8x768xbf16> to vector<1x8x768xbf16>
    tpu.vector_store %arg5[%c0_20, %c0_21, %c0_22], %66 {strides = array<i32>} : memref<1x8x768xbf16, #tpu.memory_space<vmem>>, vector<1x8x768xbf16>,
    return
  }
  func.func @transform_0(%arg0: i32) -> (i32, i32, i32, i32) {
    %c0_i32 = arith.constant 0 : i32
    %c0_i32_0 = arith.constant 0 : i32
    %c0_i32_1 = arith.constant 0 : i32
    %c0_i32_2 = arith.constant 0 : i32
    return %arg0, %c0_i32, %c0_i32_0, %c0_i32_1 : i32, i32, i32, i32
  }
  func.func @transform_1(%arg0: i32) -> (i32, i32, i32, i32) {
    %c0_i32 = arith.constant 0 : i32
    %c0_i32_0 = arith.constant 0 : i32
    %c0_i32_1 = arith.constant 0 : i32
    %c0_i32_2 = arith.constant 0 : i32
    return %arg0, %c0_i32, %c0_i32_0, %c0_i32_1 : i32, i32, i32, i32
  }
  func.func @transform_2(%arg0: i32) -> (i32, i32, i32, i32) {
    %c0_i32 = arith.constant 0 : i32
    %c0_i32_0 = arith.constant 0 : i32
    %c0_i32_1 = arith.constant 0 : i32
    %c0_i32_2 = arith.constant 0 : i32
    return %arg0, %c0_i32, %c0_i32_0, %c0_i32_1 : i32, i32, i32, i32
  }
  func.func @transform_3(%arg0: i32) -> (i32, i32, i32) {
    %c0_i32 = arith.constant 0 : i32
    %c0_i32_0 = arith.constant 0 : i32
    %c0_i32_1 = arith.constant 0 : i32
    return %arg0, %c0_i32, %c0_i32_0 : i32, i32, i32
  }
  func.func @transform_4(%arg0: i32) -> (i32, i32, i32) {
    %c0_i32 = arith.constant 0 : i32
    %c0_i32_0 = arith.constant 0 : i32
    %c0_i32_1 = arith.constant 0 : i32
    return %arg0, %c0_i32, %c0_i32_0 : i32, i32, i32
  }
}

module attributes {stable_mosaic.version = 11 : i64} {
  func.func @_linear_kernel(%arg0: i32, %arg1: i32, %arg2: i32, %arg3: memref<16x256xbf16, #tpu.memory_space<vmem>>, %arg4: memref<256x256xbf16, #tpu.memory_space<vmem>>, %arg5: memref<1x256xf32, #tpu.memory_space<vmem>>, %arg6: memref<16x256xbf16, #tpu.memory_space<vmem>>, %arg7: memref<16x256xf32, #tpu.memory_space<vmem>>) attributes {dimension_semantics = [#tpu.dimension_semantics<parallel>, #tpu.dimension_semantics<parallel>, #tpu.dimension_semantics<arbitrary>], iteration_bounds = array<i64: 1, 3, 3>, scalar_prefetch = 0 : i64, scratch_operands = 1 : i64, tpu.core_type = #tpu.core_type<tc>, window_params = [{transform_indices = @transform_0, window_bounds = array<i64: 16, 256>}, {transform_indices = @transform_1, window_bounds = array<i64: 256, 256>}, {transform_indices = @transform_2, window_bounds = array<i64: 1, 256>}, {transform_indices = @transform_3, window_bounds = array<i64: 16, 256>}]} {
    %c0_i32 = arith.constant 0 : i32
    %0 = arith.cmpi eq, %arg2, %c0_i32 : i32
    %1 = arith.extui %0 : i1 to i32
    %c0_i32_0 = arith.constant 0 : i32
    %2 = arith.cmpi ne, %1, %c0_i32_0 : i32
    scf.if %2 {
      %cst_9 = arith.constant 0.000000e+00 : f32
      %12 = vector.broadcast %cst_9 : f32 to vector<16x256xf32>
      %c0_10 = arith.constant 0 : index
      %c0_11 = arith.constant 0 : index
      %13 = vector.load %arg7[%c0_10, %c0_11] : memref<16x256xf32, #tpu.memory_space<vmem>>, vector<16x256xf32>
      tpu.vector_store %arg7[%c0_10, %c0_11], %12 {strides = array<i32>} : memref<16x256xf32, #tpu.memory_space<vmem>>, vector<16x256xf32>,
    } else {
    }
    %c0 = arith.constant 0 : index
    %c0_1 = arith.constant 0 : index
    %3 = vector.load %arg7[%c0, %c0_1] : memref<16x256xf32, #tpu.memory_space<vmem>>, vector<16x256xf32>
    %c0_2 = arith.constant 0 : index
    %c0_3 = arith.constant 0 : index
    %4 = vector.load %arg3[%c0_2, %c0_3] : memref<16x256xbf16, #tpu.memory_space<vmem>>, vector<16x256xbf16>
    %c0_4 = arith.constant 0 : index
    %c0_5 = arith.constant 0 : index
    %5 = vector.load %arg4[%c0_4, %c0_5] : memref<256x256xbf16, #tpu.memory_space<vmem>>, vector<256x256xbf16>
    %cst = arith.constant dense<0.000000e+00> : vector<16x256xf32>
    %6 = tpu.matmul %4, %5, %cst {dimension_numbers = #tpu.dot_dimension_numbers<[1], [0], [0], [1], [0, 0, 1, 1], [], []>} : vector<16x256xbf16>, vector<256x256xbf16>, vector<16x256xf32> -> vector<16x256xf32>
    %7 = arith.addf %3, %6 : vector<16x256xf32>
    %c0_6 = arith.constant 0 : index
    %c0_7 = arith.constant 0 : index
    %8 = vector.load %arg7[%c0_6, %c0_7] : memref<16x256xf32, #tpu.memory_space<vmem>>, vector<16x256xf32>
    tpu.vector_store %arg7[%c0_6, %c0_7], %7 {strides = array<i32>} : memref<16x256xf32, #tpu.memory_space<vmem>>, vector<16x256xf32>,
    %c2_i32 = arith.constant 2 : i32
    %9 = arith.cmpi eq, %arg2, %c2_i32 : i32
    %10 = arith.extui %9 : i1 to i32
    %c0_i32_8 = arith.constant 0 : i32
    %11 = arith.cmpi ne, %10, %c0_i32_8 : i32
    scf.if %11 {
      %c0_9 = arith.constant 0 : index
      %c0_10 = arith.constant 0 : index
      %12 = vector.load %arg7[%c0_9, %c0_10] : memref<16x256xf32, #tpu.memory_space<vmem>>, vector<16x256xf32>
      %c0_11 = arith.constant 0 : index
      %c0_12 = arith.constant 0 : index
      %13 = vector.load %arg5[%c0_11, %c0_12] : memref<1x256xf32, #tpu.memory_space<vmem>>, vector<1x256xf32>
      %14 = vector.broadcast %13 : vector<1x256xf32> to vector<16x256xf32>
      %15 = arith.addf %12, %14 : vector<16x256xf32>
      %16 = arith.truncf %15 : vector<16x256xf32> to vector<16x256xbf16>
      %c0_13 = arith.constant 0 : index
      %c0_14 = arith.constant 0 : index
      %17 = vector.load %arg6[%c0_13, %c0_14] : memref<16x256xbf16, #tpu.memory_space<vmem>>, vector<16x256xbf16>
      tpu.vector_store %arg6[%c0_13, %c0_14], %16 {strides = array<i32>} : memref<16x256xbf16, #tpu.memory_space<vmem>>, vector<16x256xbf16>,
    } else {
    }
    return
  }
  func.func @transform_0(%arg0: i32, %arg1: i32, %arg2: i32) -> (i32, i32) {
    %c0_i32 = arith.constant 0 : i32
    return %arg0, %arg2 : i32, i32
  }
  func.func @transform_1(%arg0: i32, %arg1: i32, %arg2: i32) -> (i32, i32) {
    %c0_i32 = arith.constant 0 : i32
    return %arg2, %arg1 : i32, i32
  }
  func.func @transform_2(%arg0: i32, %arg1: i32, %arg2: i32) -> (i32, i32) {
    %c0_i32 = arith.constant 0 : i32
    %c0_i32_0 = arith.constant 0 : i32
    return %c0_i32, %arg1 : i32, i32
  }
  func.func @transform_3(%arg0: i32, %arg1: i32, %arg2: i32) -> (i32, i32) {
    %c0_i32 = arith.constant 0 : i32
    return %arg0, %arg1 : i32, i32
  }
}

module attributes {stable_mosaic.version = 11 : i64} {
  func.func @_add_ln_kernel(%arg0: i32, %arg1: memref<16x768xbf16, #tpu.memory_space<vmem>>, %arg2: memref<16x768xbf16, #tpu.memory_space<vmem>>, %arg3: memref<1x768xf32, #tpu.memory_space<vmem>>, %arg4: memref<1x768xf32, #tpu.memory_space<vmem>>, %arg5: memref<16x768xbf16, #tpu.memory_space<vmem>>) attributes {dimension_semantics = [#tpu.dimension_semantics<parallel>], iteration_bounds = array<i64: 1>, scalar_prefetch = 0 : i64, scratch_operands = 0 : i64, tpu.core_type = #tpu.core_type<tc>, window_params = [{transform_indices = @transform_0, window_bounds = array<i64: 16, 768>}, {transform_indices = @transform_1, window_bounds = array<i64: 16, 768>}, {pipeline_mode = #tpu.pipeline_mode<synchronous>, transform_indices = @transform_2, window_bounds = array<i64: 1, 768>}, {pipeline_mode = #tpu.pipeline_mode<synchronous>, transform_indices = @transform_3, window_bounds = array<i64: 1, 768>}, {transform_indices = @transform_4, window_bounds = array<i64: 16, 768>}]} {
    %c0 = arith.constant 0 : index
    %c0_0 = arith.constant 0 : index
    %0 = vector.load %arg1[%c0, %c0_0] : memref<16x768xbf16, #tpu.memory_space<vmem>>, vector<16x768xbf16>
    %1 = arith.extf %0 : vector<16x768xbf16> to vector<16x768xf32>
    %c0_1 = arith.constant 0 : index
    %c0_2 = arith.constant 0 : index
    %2 = vector.load %arg2[%c0_1, %c0_2] : memref<16x768xbf16, #tpu.memory_space<vmem>>, vector<16x768xbf16>
    %3 = arith.extf %2 : vector<16x768xbf16> to vector<16x768xf32>
    %4 = arith.addf %1, %3 : vector<16x768xf32>
    %c0_3 = arith.constant 0 : index
    %c0_4 = arith.constant 0 : index
    %5 = vector.load %arg3[%c0_3, %c0_4] : memref<1x768xf32, #tpu.memory_space<vmem>>, vector<1x768xf32>
    %c0_5 = arith.constant 0 : index
    %c0_6 = arith.constant 0 : index
    %6 = vector.load %arg4[%c0_5, %c0_6] : memref<1x768xf32, #tpu.memory_space<vmem>>, vector<1x768xf32>
    %cst = arith.constant dense<0.000000e+00> : vector<16xf32>
    %7 = vector.multi_reduction <add>, %4, %cst [1] : vector<16x768xf32> to vector<16xf32>
    %8 = vector.shape_cast %7 : vector<16xf32> to vector<16x1xf32>
    %cst_7 = arith.constant 7.680000e+02 : f32
    %9 = vector.broadcast %cst_7 : f32 to vector<16x1xf32>
    %10 = arith.divf %8, %9 : vector<16x1xf32>
    %11 = vector.broadcast %10 : vector<16x1xf32> to vector<16x768xf32>
    %12 = arith.subf %4, %11 : vector<16x768xf32>
    %13 = arith.mulf %12, %12 : vector<16x768xf32>
    %cst_8 = arith.constant dense<0.000000e+00> : vector<16xf32>
    %14 = vector.multi_reduction <add>, %13, %cst_8 [1] : vector<16x768xf32> to vector<16xf32>
    %15 = vector.shape_cast %14 : vector<16xf32> to vector<16x1xf32>
    %cst_9 = arith.constant 7.680000e+02 : f32
    %16 = vector.broadcast %cst_9 : f32 to vector<16x1xf32>
    %17 = arith.divf %15, %16 : vector<16x1xf32>
    %18 = vector.broadcast %10 : vector<16x1xf32> to vector<16x768xf32>
    %19 = arith.subf %4, %18 : vector<16x768xf32>
    %cst_10 = arith.constant 9.99999974E-6 : f32
    %20 = vector.broadcast %cst_10 : f32 to vector<16x1xf32>
    %21 = arith.addf %17, %20 : vector<16x1xf32>
    %22 = math.rsqrt %21 : vector<16x1xf32>
    %23 = vector.broadcast %22 : vector<16x1xf32> to vector<16x768xf32>
    %24 = arith.mulf %19, %23 : vector<16x768xf32>
    %25 = vector.broadcast %5 : vector<1x768xf32> to vector<16x768xf32>
    %26 = arith.mulf %24, %25 : vector<16x768xf32>
    %27 = vector.broadcast %6 : vector<1x768xf32> to vector<16x768xf32>
    %28 = arith.addf %26, %27 : vector<16x768xf32>
    %29 = arith.truncf %28 : vector<16x768xf32> to vector<16x768xbf16>
    %c0_11 = arith.constant 0 : index
    %c0_12 = arith.constant 0 : index
    %30 = vector.load %arg5[%c0_11, %c0_12] : memref<16x768xbf16, #tpu.memory_space<vmem>>, vector<16x768xbf16>
    tpu.vector_store %arg5[%c0_11, %c0_12], %29 {strides = array<i32>} : memref<16x768xbf16, #tpu.memory_space<vmem>>, vector<16x768xbf16>,
    return
  }
  func.func @transform_0(%arg0: i32) -> (i32, i32) {
    %c0_i32 = arith.constant 0 : i32
    %c0_i32_0 = arith.constant 0 : i32
    return %arg0, %c0_i32 : i32, i32
  }
  func.func @transform_1(%arg0: i32) -> (i32, i32) {
    %c0_i32 = arith.constant 0 : i32
    %c0_i32_0 = arith.constant 0 : i32
    return %arg0, %c0_i32 : i32, i32
  }
  func.func @transform_2(%arg0: i32) -> (i32, i32) {
    %c0_i32 = arith.constant 0 : i32
    %c0_i32_0 = arith.constant 0 : i32
    %c0_i32_1 = arith.constant 0 : i32
    return %c0_i32, %c0_i32_0 : i32, i32
  }
  func.func @transform_3(%arg0: i32) -> (i32, i32) {
    %c0_i32 = arith.constant 0 : i32
    %c0_i32_0 = arith.constant 0 : i32
    %c0_i32_1 = arith.constant 0 : i32
    return %c0_i32, %c0_i32_0 : i32, i32
  }
  func.func @transform_4(%arg0: i32) -> (i32, i32) {
    %c0_i32 = arith.constant 0 : i32
    %c0_i32_0 = arith.constant 0 : i32
    return %arg0, %c0_i32 : i32, i32
  }
}

module attributes {stable_mosaic.version = 11 : i64} {
  func.func @_linear_kernel(%arg0: i32, %arg1: i32, %arg2: i32, %arg3: memref<16x256xbf16, #tpu.memory_space<vmem>>, %arg4: memref<256x256xbf16, #tpu.memory_space<vmem>>, %arg5: memref<1x256xf32, #tpu.memory_space<vmem>>, %arg6: memref<16x256xbf16, #tpu.memory_space<vmem>>, %arg7: memref<16x256xf32, #tpu.memory_space<vmem>>) attributes {dimension_semantics = [#tpu.dimension_semantics<parallel>, #tpu.dimension_semantics<parallel>, #tpu.dimension_semantics<arbitrary>], iteration_bounds = array<i64: 1, 12, 3>, scalar_prefetch = 0 : i64, scratch_operands = 1 : i64, tpu.core_type = #tpu.core_type<tc>, window_params = [{transform_indices = @transform_0, window_bounds = array<i64: 16, 256>}, {transform_indices = @transform_1, window_bounds = array<i64: 256, 256>}, {transform_indices = @transform_2, window_bounds = array<i64: 1, 256>}, {transform_indices = @transform_3, window_bounds = array<i64: 16, 256>}]} {
    %c0_i32 = arith.constant 0 : i32
    %0 = arith.cmpi eq, %arg2, %c0_i32 : i32
    %1 = arith.extui %0 : i1 to i32
    %c0_i32_0 = arith.constant 0 : i32
    %2 = arith.cmpi ne, %1, %c0_i32_0 : i32
    scf.if %2 {
      %cst_9 = arith.constant 0.000000e+00 : f32
      %12 = vector.broadcast %cst_9 : f32 to vector<16x256xf32>
      %c0_10 = arith.constant 0 : index
      %c0_11 = arith.constant 0 : index
      %13 = vector.load %arg7[%c0_10, %c0_11] : memref<16x256xf32, #tpu.memory_space<vmem>>, vector<16x256xf32>
      tpu.vector_store %arg7[%c0_10, %c0_11], %12 {strides = array<i32>} : memref<16x256xf32, #tpu.memory_space<vmem>>, vector<16x256xf32>,
    } else {
    }
    %c0 = arith.constant 0 : index
    %c0_1 = arith.constant 0 : index
    %3 = vector.load %arg7[%c0, %c0_1] : memref<16x256xf32, #tpu.memory_space<vmem>>, vector<16x256xf32>
    %c0_2 = arith.constant 0 : index
    %c0_3 = arith.constant 0 : index
    %4 = vector.load %arg3[%c0_2, %c0_3] : memref<16x256xbf16, #tpu.memory_space<vmem>>, vector<16x256xbf16>
    %c0_4 = arith.constant 0 : index
    %c0_5 = arith.constant 0 : index
    %5 = vector.load %arg4[%c0_4, %c0_5] : memref<256x256xbf16, #tpu.memory_space<vmem>>, vector<256x256xbf16>
    %cst = arith.constant dense<0.000000e+00> : vector<16x256xf32>
    %6 = tpu.matmul %4, %5, %cst {dimension_numbers = #tpu.dot_dimension_numbers<[1], [0], [0], [1], [0, 0, 1, 1], [], []>} : vector<16x256xbf16>, vector<256x256xbf16>, vector<16x256xf32> -> vector<16x256xf32>
    %7 = arith.addf %3, %6 : vector<16x256xf32>
    %c0_6 = arith.constant 0 : index
    %c0_7 = arith.constant 0 : index
    %8 = vector.load %arg7[%c0_6, %c0_7] : memref<16x256xf32, #tpu.memory_space<vmem>>, vector<16x256xf32>
    tpu.vector_store %arg7[%c0_6, %c0_7], %7 {strides = array<i32>} : memref<16x256xf32, #tpu.memory_space<vmem>>, vector<16x256xf32>,
    %c2_i32 = arith.constant 2 : i32
    %9 = arith.cmpi eq, %arg2, %c2_i32 : i32
    %10 = arith.extui %9 : i1 to i32
    %c0_i32_8 = arith.constant 0 : i32
    %11 = arith.cmpi ne, %10, %c0_i32_8 : i32
    scf.if %11 {
      %c0_9 = arith.constant 0 : index
      %c0_10 = arith.constant 0 : index
      %12 = vector.load %arg7[%c0_9, %c0_10] : memref<16x256xf32, #tpu.memory_space<vmem>>, vector<16x256xf32>
      %c0_11 = arith.constant 0 : index
      %c0_12 = arith.constant 0 : index
      %13 = vector.load %arg5[%c0_11, %c0_12] : memref<1x256xf32, #tpu.memory_space<vmem>>, vector<1x256xf32>
      %14 = vector.broadcast %13 : vector<1x256xf32> to vector<16x256xf32>
      %15 = arith.addf %12, %14 : vector<16x256xf32>
      %cst_13 = arith.constant 5.000000e-01 : f32
      %16 = vector.broadcast %cst_13 : f32 to vector<16x256xf32>
      %17 = arith.mulf %16, %15 : vector<16x256xf32>
      %cst_14 = arith.constant 4.471500e-02 : f32
      %18 = vector.broadcast %cst_14 : f32 to vector<16x256xf32>
      %19 = arith.mulf %18, %15 : vector<16x256xf32>
      %20 = arith.mulf %19, %15 : vector<16x256xf32>
      %21 = arith.mulf %20, %15 : vector<16x256xf32>
      %22 = arith.addf %15, %21 : vector<16x256xf32>
      %cst_15 = arith.constant 0.797884583 : f32
      %23 = vector.broadcast %cst_15 : f32 to vector<16x256xf32>
      %24 = arith.mulf %23, %22 : vector<16x256xf32>
      %25 = math.tanh %24 : vector<16x256xf32>
      %cst_16 = arith.constant 1.000000e+00 : f32
      %26 = vector.broadcast %cst_16 : f32 to vector<16x256xf32>
      %27 = arith.addf %26, %25 : vector<16x256xf32>
      %28 = arith.mulf %17, %27 : vector<16x256xf32>
      %29 = arith.truncf %28 : vector<16x256xf32> to vector<16x256xbf16>
      %c0_17 = arith.constant 0 : index
      %c0_18 = arith.constant 0 : index
      %30 = vector.load %arg6[%c0_17, %c0_18] : memref<16x256xbf16, #tpu.memory_space<vmem>>, vector<16x256xbf16>
      tpu.vector_store %arg6[%c0_17, %c0_18], %29 {strides = array<i32>} : memref<16x256xbf16, #tpu.memory_space<vmem>>, vector<16x256xbf16>,
    } else {
    }
    return
  }
  func.func @transform_0(%arg0: i32, %arg1: i32, %arg2: i32) -> (i32, i32) {
    %c0_i32 = arith.constant 0 : i32
    return %arg0, %arg2 : i32, i32
  }
  func.func @transform_1(%arg0: i32, %arg1: i32, %arg2: i32) -> (i32, i32) {
    %c0_i32 = arith.constant 0 : i32
    return %arg2, %arg1 : i32, i32
  }
  func.func @transform_2(%arg0: i32, %arg1: i32, %arg2: i32) -> (i32, i32) {
    %c0_i32 = arith.constant 0 : i32
    %c0_i32_0 = arith.constant 0 : i32
    return %c0_i32, %arg1 : i32, i32
  }
  func.func @transform_3(%arg0: i32, %arg1: i32, %arg2: i32) -> (i32, i32) {
    %c0_i32 = arith.constant 0 : i32
    return %arg0, %arg1 : i32, i32
  }
}

module attributes {stable_mosaic.version = 11 : i64} {
  func.func @_linear_kernel(%arg0: i32, %arg1: i32, %arg2: i32, %arg3: memref<16x256xbf16, #tpu.memory_space<vmem>>, %arg4: memref<256x256xbf16, #tpu.memory_space<vmem>>, %arg5: memref<1x256xf32, #tpu.memory_space<vmem>>, %arg6: memref<16x256xbf16, #tpu.memory_space<vmem>>, %arg7: memref<16x256xf32, #tpu.memory_space<vmem>>) attributes {dimension_semantics = [#tpu.dimension_semantics<parallel>, #tpu.dimension_semantics<parallel>, #tpu.dimension_semantics<arbitrary>], iteration_bounds = array<i64: 1, 9, 3>, scalar_prefetch = 0 : i64, scratch_operands = 1 : i64, tpu.core_type = #tpu.core_type<tc>, window_params = [{transform_indices = @transform_0, window_bounds = array<i64: 16, 256>}, {transform_indices = @transform_1, window_bounds = array<i64: 256, 256>}, {transform_indices = @transform_2, window_bounds = array<i64: 1, 256>}, {transform_indices = @transform_3, window_bounds = array<i64: 16, 256>}]} {
    %c0_i32 = arith.constant 0 : i32
    %0 = arith.cmpi eq, %arg2, %c0_i32 : i32
    %1 = arith.extui %0 : i1 to i32
    %c0_i32_0 = arith.constant 0 : i32
    %2 = arith.cmpi ne, %1, %c0_i32_0 : i32
    scf.if %2 {
      %cst_9 = arith.constant 0.000000e+00 : f32
      %12 = vector.broadcast %cst_9 : f32 to vector<16x256xf32>
      %c0_10 = arith.constant 0 : index
      %c0_11 = arith.constant 0 : index
      %13 = vector.load %arg7[%c0_10, %c0_11] : memref<16x256xf32, #tpu.memory_space<vmem>>, vector<16x256xf32>
      tpu.vector_store %arg7[%c0_10, %c0_11], %12 {strides = array<i32>} : memref<16x256xf32, #tpu.memory_space<vmem>>, vector<16x256xf32>,
    } else {
    }
    %c0 = arith.constant 0 : index
    %c0_1 = arith.constant 0 : index
    %3 = vector.load %arg7[%c0, %c0_1] : memref<16x256xf32, #tpu.memory_space<vmem>>, vector<16x256xf32>
    %c0_2 = arith.constant 0 : index
    %c0_3 = arith.constant 0 : index
    %4 = vector.load %arg3[%c0_2, %c0_3] : memref<16x256xbf16, #tpu.memory_space<vmem>>, vector<16x256xbf16>
    %c0_4 = arith.constant 0 : index
    %c0_5 = arith.constant 0 : index
    %5 = vector.load %arg4[%c0_4, %c0_5] : memref<256x256xbf16, #tpu.memory_space<vmem>>, vector<256x256xbf16>
    %cst = arith.constant dense<0.000000e+00> : vector<16x256xf32>
    %6 = tpu.matmul %4, %5, %cst {dimension_numbers = #tpu.dot_dimension_numbers<[1], [0], [0], [1], [0, 0, 1, 1], [], []>} : vector<16x256xbf16>, vector<256x256xbf16>, vector<16x256xf32> -> vector<16x256xf32>
    %7 = arith.addf %3, %6 : vector<16x256xf32>
    %c0_6 = arith.constant 0 : index
    %c0_7 = arith.constant 0 : index
    %8 = vector.load %arg7[%c0_6, %c0_7] : memref<16x256xf32, #tpu.memory_space<vmem>>, vector<16x256xf32>
    tpu.vector_store %arg7[%c0_6, %c0_7], %7 {strides = array<i32>} : memref<16x256xf32, #tpu.memory_space<vmem>>, vector<16x256xf32>,
    %c2_i32 = arith.constant 2 : i32
    %9 = arith.cmpi eq, %arg2, %c2_i32 : i32
    %10 = arith.extui %9 : i1 to i32
    %c0_i32_8 = arith.constant 0 : i32
    %11 = arith.cmpi ne, %10, %c0_i32_8 : i32
    scf.if %11 {
      %c0_9 = arith.constant 0 : index
      %c0_10 = arith.constant 0 : index
      %12 = vector.load %arg7[%c0_9, %c0_10] : memref<16x256xf32, #tpu.memory_space<vmem>>, vector<16x256xf32>
      %c0_11 = arith.constant 0 : index
      %c0_12 = arith.constant 0 : index
      %13 = vector.load %arg5[%c0_11, %c0_12] : memref<1x256xf32, #tpu.memory_space<vmem>>, vector<1x256xf32>
      %14 = vector.broadcast %13 : vector<1x256xf32> to vector<16x256xf32>
      %15 = arith.addf %12, %14 : vector<16x256xf32>
      %16 = arith.truncf %15 : vector<16x256xf32> to vector<16x256xbf16>
      %c0_13 = arith.constant 0 : index
      %c0_14 = arith.constant 0 : index
      %17 = vector.load %arg6[%c0_13, %c0_14] : memref<16x256xbf16, #tpu.memory_space<vmem>>, vector<16x256xbf16>
      tpu.vector_store %arg6[%c0_13, %c0_14], %16 {strides = array<i32>} : memref<16x256xbf16, #tpu.memory_space<vmem>>, vector<16x256xbf16>,
    } else {
    }
    return
  }
  func.func @transform_0(%arg0: i32, %arg1: i32, %arg2: i32) -> (i32, i32) {
    %c0_i32 = arith.constant 0 : i32
    return %arg0, %arg2 : i32, i32
  }
  func.func @transform_1(%arg0: i32, %arg1: i32, %arg2: i32) -> (i32, i32) {
    %c0_i32 = arith.constant 0 : i32
    return %arg2, %arg1 : i32, i32
  }
  func.func @transform_2(%arg0: i32, %arg1: i32, %arg2: i32) -> (i32, i32) {
    %c0_i32 = arith.constant 0 : i32
    %c0_i32_0 = arith.constant 0 : i32
    return %c0_i32, %arg1 : i32, i32
  }
  func.func @transform_3(%arg0: i32, %arg1: i32, %arg2: i32) -> (i32, i32) {
    %c0_i32 = arith.constant 0 : i32
    return %arg0, %arg1 : i32, i32
  }
}

module attributes {stable_mosaic.version = 11 : i64} {
  func.func @_linear_kernel(%arg0: i32, %arg1: i32, %arg2: i32, %arg3: memref<16x256xbf16, #tpu.memory_space<vmem>>, %arg4: memref<256x256xbf16, #tpu.memory_space<vmem>>, %arg5: memref<1x256xf32, #tpu.memory_space<vmem>>, %arg6: memref<16x256xbf16, #tpu.memory_space<vmem>>, %arg7: memref<16x256xf32, #tpu.memory_space<vmem>>) attributes {dimension_semantics = [#tpu.dimension_semantics<parallel>, #tpu.dimension_semantics<parallel>, #tpu.dimension_semantics<arbitrary>], iteration_bounds = array<i64: 1, 3, 12>, scalar_prefetch = 0 : i64, scratch_operands = 1 : i64, tpu.core_type = #tpu.core_type<tc>, window_params = [{transform_indices = @transform_0, window_bounds = array<i64: 16, 256>}, {transform_indices = @transform_1, window_bounds = array<i64: 256, 256>}, {transform_indices = @transform_2, window_bounds = array<i64: 1, 256>}, {transform_indices = @transform_3, window_bounds = array<i64: 16, 256>}]} {
    %c0_i32 = arith.constant 0 : i32
    %0 = arith.cmpi eq, %arg2, %c0_i32 : i32
    %1 = arith.extui %0 : i1 to i32
    %c0_i32_0 = arith.constant 0 : i32
    %2 = arith.cmpi ne, %1, %c0_i32_0 : i32
    scf.if %2 {
      %cst_9 = arith.constant 0.000000e+00 : f32
      %12 = vector.broadcast %cst_9 : f32 to vector<16x256xf32>
      %c0_10 = arith.constant 0 : index
      %c0_11 = arith.constant 0 : index
      %13 = vector.load %arg7[%c0_10, %c0_11] : memref<16x256xf32, #tpu.memory_space<vmem>>, vector<16x256xf32>
      tpu.vector_store %arg7[%c0_10, %c0_11], %12 {strides = array<i32>} : memref<16x256xf32, #tpu.memory_space<vmem>>, vector<16x256xf32>,
    } else {
    }
    %c0 = arith.constant 0 : index
    %c0_1 = arith.constant 0 : index
    %3 = vector.load %arg7[%c0, %c0_1] : memref<16x256xf32, #tpu.memory_space<vmem>>, vector<16x256xf32>
    %c0_2 = arith.constant 0 : index
    %c0_3 = arith.constant 0 : index
    %4 = vector.load %arg3[%c0_2, %c0_3] : memref<16x256xbf16, #tpu.memory_space<vmem>>, vector<16x256xbf16>
    %c0_4 = arith.constant 0 : index
    %c0_5 = arith.constant 0 : index
    %5 = vector.load %arg4[%c0_4, %c0_5] : memref<256x256xbf16, #tpu.memory_space<vmem>>, vector<256x256xbf16>
    %cst = arith.constant dense<0.000000e+00> : vector<16x256xf32>
    %6 = tpu.matmul %4, %5, %cst {dimension_numbers = #tpu.dot_dimension_numbers<[1], [0], [0], [1], [0, 0, 1, 1], [], []>} : vector<16x256xbf16>, vector<256x256xbf16>, vector<16x256xf32> -> vector<16x256xf32>
    %7 = arith.addf %3, %6 : vector<16x256xf32>
    %c0_6 = arith.constant 0 : index
    %c0_7 = arith.constant 0 : index
    %8 = vector.load %arg7[%c0_6, %c0_7] : memref<16x256xf32, #tpu.memory_space<vmem>>, vector<16x256xf32>
    tpu.vector_store %arg7[%c0_6, %c0_7], %7 {strides = array<i32>} : memref<16x256xf32, #tpu.memory_space<vmem>>, vector<16x256xf32>,
    %c11_i32 = arith.constant 11 : i32
    %9 = arith.cmpi eq, %arg2, %c11_i32 : i32
    %10 = arith.extui %9 : i1 to i32
    %c0_i32_8 = arith.constant 0 : i32
    %11 = arith.cmpi ne, %10, %c0_i32_8 : i32
    scf.if %11 {
      %c0_9 = arith.constant 0 : index
      %c0_10 = arith.constant 0 : index
      %12 = vector.load %arg7[%c0_9, %c0_10] : memref<16x256xf32, #tpu.memory_space<vmem>>, vector<16x256xf32>
      %c0_11 = arith.constant 0 : index
      %c0_12 = arith.constant 0 : index
      %13 = vector.load %arg5[%c0_11, %c0_12] : memref<1x256xf32, #tpu.memory_space<vmem>>, vector<1x256xf32>
      %14 = vector.broadcast %13 : vector<1x256xf32> to vector<16x256xf32>
      %15 = arith.addf %12, %14 : vector<16x256xf32>
      %16 = arith.truncf %15 : vector<16x256xf32> to vector<16x256xbf16>
      %c0_13 = arith.constant 0 : index
      %c0_14 = arith.constant 0 : index
      %17 = vector.load %arg6[%c0_13, %c0_14] : memref<16x256xbf16, #tpu.memory_space<vmem>>, vector<16x256xbf16>
      tpu.vector_store %arg6[%c0_13, %c0_14], %16 {strides = array<i32>} : memref<16x256xbf16, #tpu.memory_space<vmem>>, vector<16x256xbf16>,
    } else {
    }
    return
  }
  func.func @transform_0(%arg0: i32, %arg1: i32, %arg2: i32) -> (i32, i32) {
    %c0_i32 = arith.constant 0 : i32
    return %arg0, %arg2 : i32, i32
  }
  func.func @transform_1(%arg0: i32, %arg1: i32, %arg2: i32) -> (i32, i32) {
    %c0_i32 = arith.constant 0 : i32
    return %arg2, %arg1 : i32, i32
  }
  func.func @transform_2(%arg0: i32, %arg1: i32, %arg2: i32) -> (i32, i32) {
    %c0_i32 = arith.constant 0 : i32
    %c0_i32_0 = arith.constant 0 : i32
    return %c0_i32, %arg1 : i32, i32
  }
  func.func @transform_3(%arg0: i32, %arg1: i32, %arg2: i32) -> (i32, i32) {
    %c0_i32 = arith.constant 0 : i32
    return %arg0, %arg1 : i32, i32
  }
}

module attributes {stable_mosaic.version = 11 : i64} {
  func.func @_linear_kernel(%arg0: i32, %arg1: i32, %arg2: i32, %arg3: memref<2x256xbf16, #tpu.memory_space<vmem>>, %arg4: memref<256x256xbf16, #tpu.memory_space<vmem>>, %arg5: memref<1x256xf32, #tpu.memory_space<vmem>>, %arg6: memref<2x256xbf16, #tpu.memory_space<vmem>>, %arg7: memref<2x256xf32, #tpu.memory_space<vmem>>) attributes {dimension_semantics = [#tpu.dimension_semantics<parallel>, #tpu.dimension_semantics<parallel>, #tpu.dimension_semantics<arbitrary>], iteration_bounds = array<i64: 1, 3, 3>, scalar_prefetch = 0 : i64, scratch_operands = 1 : i64, tpu.core_type = #tpu.core_type<tc>, window_params = [{transform_indices = @transform_0, window_bounds = array<i64: 2, 256>}, {transform_indices = @transform_1, window_bounds = array<i64: 256, 256>}, {transform_indices = @transform_2, window_bounds = array<i64: 1, 256>}, {transform_indices = @transform_3, window_bounds = array<i64: 2, 256>}]} {
    %c0_i32 = arith.constant 0 : i32
    %0 = arith.cmpi eq, %arg2, %c0_i32 : i32
    %1 = arith.extui %0 : i1 to i32
    %c0_i32_0 = arith.constant 0 : i32
    %2 = arith.cmpi ne, %1, %c0_i32_0 : i32
    scf.if %2 {
      %cst_9 = arith.constant 0.000000e+00 : f32
      %12 = vector.broadcast %cst_9 : f32 to vector<2x256xf32>
      %c0_10 = arith.constant 0 : index
      %c0_11 = arith.constant 0 : index
      %13 = vector.load %arg7[%c0_10, %c0_11] : memref<2x256xf32, #tpu.memory_space<vmem>>, vector<2x256xf32>
      tpu.vector_store %arg7[%c0_10, %c0_11], %12 {strides = array<i32>} : memref<2x256xf32, #tpu.memory_space<vmem>>, vector<2x256xf32>,
    } else {
    }
    %c0 = arith.constant 0 : index
    %c0_1 = arith.constant 0 : index
    %3 = vector.load %arg7[%c0, %c0_1] : memref<2x256xf32, #tpu.memory_space<vmem>>, vector<2x256xf32>
    %c0_2 = arith.constant 0 : index
    %c0_3 = arith.constant 0 : index
    %4 = vector.load %arg3[%c0_2, %c0_3] : memref<2x256xbf16, #tpu.memory_space<vmem>>, vector<2x256xbf16>
    %c0_4 = arith.constant 0 : index
    %c0_5 = arith.constant 0 : index
    %5 = vector.load %arg4[%c0_4, %c0_5] : memref<256x256xbf16, #tpu.memory_space<vmem>>, vector<256x256xbf16>
    %cst = arith.constant dense<0.000000e+00> : vector<2x256xf32>
    %6 = tpu.matmul %4, %5, %cst {dimension_numbers = #tpu.dot_dimension_numbers<[1], [0], [0], [1], [0, 0, 1, 1], [], []>} : vector<2x256xbf16>, vector<256x256xbf16>, vector<2x256xf32> -> vector<2x256xf32>
    %7 = arith.addf %3, %6 : vector<2x256xf32>
    %c0_6 = arith.constant 0 : index
    %c0_7 = arith.constant 0 : index
    %8 = vector.load %arg7[%c0_6, %c0_7] : memref<2x256xf32, #tpu.memory_space<vmem>>, vector<2x256xf32>
    tpu.vector_store %arg7[%c0_6, %c0_7], %7 {strides = array<i32>} : memref<2x256xf32, #tpu.memory_space<vmem>>, vector<2x256xf32>,
    %c2_i32 = arith.constant 2 : i32
    %9 = arith.cmpi eq, %arg2, %c2_i32 : i32
    %10 = arith.extui %9 : i1 to i32
    %c0_i32_8 = arith.constant 0 : i32
    %11 = arith.cmpi ne, %10, %c0_i32_8 : i32
    scf.if %11 {
      %c0_9 = arith.constant 0 : index
      %c0_10 = arith.constant 0 : index
      %12 = vector.load %arg7[%c0_9, %c0_10] : memref<2x256xf32, #tpu.memory_space<vmem>>, vector<2x256xf32>
      %c0_11 = arith.constant 0 : index
      %c0_12 = arith.constant 0 : index
      %13 = vector.load %arg5[%c0_11, %c0_12] : memref<1x256xf32, #tpu.memory_space<vmem>>, vector<1x256xf32>
      %14 = vector.broadcast %13 : vector<1x256xf32> to vector<2x256xf32>
      %15 = arith.addf %12, %14 : vector<2x256xf32>
      %16 = math.tanh %15 : vector<2x256xf32>
      %17 = arith.truncf %16 : vector<2x256xf32> to vector<2x256xbf16>
      %c0_13 = arith.constant 0 : index
      %c0_14 = arith.constant 0 : index
      %18 = vector.load %arg6[%c0_13, %c0_14] : memref<2x256xbf16, #tpu.memory_space<vmem>>, vector<2x256xbf16>
      tpu.vector_store %arg6[%c0_13, %c0_14], %17 {strides = array<i32>} : memref<2x256xbf16, #tpu.memory_space<vmem>>, vector<2x256xbf16>,
    } else {
    }
    return
  }
  func.func @transform_0(%arg0: i32, %arg1: i32, %arg2: i32) -> (i32, i32) {
    %c0_i32 = arith.constant 0 : i32
    return %arg0, %arg2 : i32, i32
  }
  func.func @transform_1(%arg0: i32, %arg1: i32, %arg2: i32) -> (i32, i32) {
    %c0_i32 = arith.constant 0 : i32
    return %arg2, %arg1 : i32, i32
  }
  func.func @transform_2(%arg0: i32, %arg1: i32, %arg2: i32) -> (i32, i32) {
    %c0_i32 = arith.constant 0 : i32
    %c0_i32_0 = arith.constant 0 : i32
    return %c0_i32, %arg1 : i32, i32
  }
  func.func @transform_3(%arg0: i32, %arg1: i32, %arg2: i32) -> (i32, i32) {
    %c0_i32 = arith.constant 0 : i32
    return %arg0, %arg1 : i32, i32
  }
}

module attributes {stable_mosaic.version = 11 : i64} {
  func.func @_linear_kernel(%arg0: i32, %arg1: i32, %arg2: i32, %arg3: memref<2x256xbf16, #tpu.memory_space<vmem>>, %arg4: memref<256x6xbf16, #tpu.memory_space<vmem>>, %arg5: memref<1x6xf32, #tpu.memory_space<vmem>>, %arg6: memref<2x6xf32, #tpu.memory_space<vmem>>, %arg7: memref<2x6xf32, #tpu.memory_space<vmem>>) attributes {dimension_semantics = [#tpu.dimension_semantics<parallel>, #tpu.dimension_semantics<parallel>, #tpu.dimension_semantics<arbitrary>], iteration_bounds = array<i64: 1, 1, 3>, scalar_prefetch = 0 : i64, scratch_operands = 1 : i64, tpu.core_type = #tpu.core_type<tc>, window_params = [{transform_indices = @transform_0, window_bounds = array<i64: 2, 256>}, {transform_indices = @transform_1, window_bounds = array<i64: 256, 6>}, {transform_indices = @transform_2, window_bounds = array<i64: 1, 6>}, {transform_indices = @transform_3, window_bounds = array<i64: 2, 6>}]} {
    %c0_i32 = arith.constant 0 : i32
    %0 = arith.cmpi eq, %arg2, %c0_i32 : i32
    %1 = arith.extui %0 : i1 to i32
    %c0_i32_0 = arith.constant 0 : i32
    %2 = arith.cmpi ne, %1, %c0_i32_0 : i32
    scf.if %2 {
      %cst_9 = arith.constant 0.000000e+00 : f32
      %12 = vector.broadcast %cst_9 : f32 to vector<2x6xf32>
      %c0_10 = arith.constant 0 : index
      %c0_11 = arith.constant 0 : index
      %13 = vector.load %arg7[%c0_10, %c0_11] : memref<2x6xf32, #tpu.memory_space<vmem>>, vector<2x6xf32>
      tpu.vector_store %arg7[%c0_10, %c0_11], %12 {strides = array<i32>} : memref<2x6xf32, #tpu.memory_space<vmem>>, vector<2x6xf32>,
    } else {
    }
    %c0 = arith.constant 0 : index
    %c0_1 = arith.constant 0 : index
    %3 = vector.load %arg7[%c0, %c0_1] : memref<2x6xf32, #tpu.memory_space<vmem>>, vector<2x6xf32>
    %c0_2 = arith.constant 0 : index
    %c0_3 = arith.constant 0 : index
    %4 = vector.load %arg3[%c0_2, %c0_3] : memref<2x256xbf16, #tpu.memory_space<vmem>>, vector<2x256xbf16>
    %c0_4 = arith.constant 0 : index
    %c0_5 = arith.constant 0 : index
    %5 = vector.load %arg4[%c0_4, %c0_5] : memref<256x6xbf16, #tpu.memory_space<vmem>>, vector<256x6xbf16>
    %cst = arith.constant dense<0.000000e+00> : vector<2x6xf32>
    %6 = tpu.matmul %4, %5, %cst {dimension_numbers = #tpu.dot_dimension_numbers<[1], [0], [0], [1], [0, 0, 1, 1], [], []>} : vector<2x256xbf16>, vector<256x6xbf16>, vector<2x6xf32> -> vector<2x6xf32>
    %7 = arith.addf %3, %6 : vector<2x6xf32>
    %c0_6 = arith.constant 0 : index
    %c0_7 = arith.constant 0 : index
    %8 = vector.load %arg7[%c0_6, %c0_7] : memref<2x6xf32, #tpu.memory_space<vmem>>, vector<2x6xf32>
    tpu.vector_store %arg7[%c0_6, %c0_7], %7 {strides = array<i32>} : memref<2x6xf32, #tpu.memory_space<vmem>>, vector<2x6xf32>,
    %c2_i32 = arith.constant 2 : i32
    %9 = arith.cmpi eq, %arg2, %c2_i32 : i32
    %10 = arith.extui %9 : i1 to i32
    %c0_i32_8 = arith.constant 0 : i32
    %11 = arith.cmpi ne, %10, %c0_i32_8 : i32
    scf.if %11 {
      %c0_9 = arith.constant 0 : index
      %c0_10 = arith.constant 0 : index
      %12 = vector.load %arg7[%c0_9, %c0_10] : memref<2x6xf32, #tpu.memory_space<vmem>>, vector<2x6xf32>
      %c0_11 = arith.constant 0 : index
      %c0_12 = arith.constant 0 : index
      %13 = vector.load %arg5[%c0_11, %c0_12] : memref<1x6xf32, #tpu.memory_space<vmem>>, vector<1x6xf32>
      %14 = vector.broadcast %13 : vector<1x6xf32> to vector<2x6xf32>
      %15 = arith.addf %12, %14 : vector<2x6xf32>
      %c0_13 = arith.constant 0 : index
      %c0_14 = arith.constant 0 : index
      %16 = vector.load %arg6[%c0_13, %c0_14] : memref<2x6xf32, #tpu.memory_space<vmem>>, vector<2x6xf32>
      tpu.vector_store %arg6[%c0_13, %c0_14], %15 {strides = array<i32>} : memref<2x6xf32, #tpu.memory_space<vmem>>, vector<2x6xf32>,
    } else {
    }
    return
  }
  func.func @transform_0(%arg0: i32, %arg1: i32, %arg2: i32) -> (i32, i32) {
    %c0_i32 = arith.constant 0 : i32
    return %arg0, %arg2 : i32, i32
  }
  func.func @transform_1(%arg0: i32, %arg1: i32, %arg2: i32) -> (i32, i32) {
    %c0_i32 = arith.constant 0 : i32
    return %arg2, %arg1 : i32, i32
  }
  func.func @transform_2(%arg0: i32, %arg1: i32, %arg2: i32) -> (i32, i32) {
    %c0_i32 = arith.constant 0 : i32
    %c0_i32_0 = arith.constant 0 : i32
    return %c0_i32, %arg1 : i32, i32
  }
  func.func @transform_3(%arg0: i32, %arg1: i32, %arg2: i32) -> (i32, i32) {
    %c0_i32 = arith.constant 0 : i32
    return %arg0, %arg1 : i32, i32
  }
}

</mosaic_0001>

<bundles_post_ra>
// kernel: longformer_forward.17
= control target key start
LH: loop header
LB: loop body
LE: loop exit
PB: predicated region body
PF: predicated region fallthrough
CT: control target
= control target key end

     0   :  { %v102_v61 = vlaneseq  ;;  %s384_s0 = inlined_call_operand.vmem [shape: f32[16,768], index: 0, kind: input, shape index: {}]   ;;  %s385_s1 = inlined_call_operand.vmem [shape: f32[1,768], index: 1, kind: input, shape index: {}]   ;;  %s386_s2 = inlined_call_operand.vmem [shape: f32[1,768], index: 2, kind: input, shape index: {}]   ;;  %s387_s3 = inlined_call_operand.vmem [shape: bf16[16,768], index: 3, kind: output, shape index: {}]  }
   0x1   :  { %v14_v0 = vld [vmem:[%s384_s0] sm:$0xff]  ;;  %v15_v1 = vld [vmem:[%s384_s0 + $0x8] sm:$0xff]  ;;  %v16_v2 = vld [vmem:[%s384_s0 + $0x10] sm:$0xff] }
   0x2   :  { %v17_v3 = vld [vmem:[%s384_s0 + $0x18] sm:$0xff]  ;;  %v28_v4 = vadd.f32 %v15_v1, %v14_v0  ;;  %v20_v5 = vld [vmem:[%s384_s0 + $0x30] sm:$0xff]  ;;  %v22_v7 = vld [vmem:[%s384_s0 + $0x40] sm:$0xff] }
   0x3   :  { %v21_v6 = vld [vmem:[%s384_s0 + $0x38] sm:$0xff]  ;;  %v18_v10 = vld [vmem:[%s384_s0 + $0x20] sm:$0xff]  ;;  %v23_v11 = vld [vmem:[%s384_s0 + $0x48] sm:$0xff] }
   0x4   :  { %v29_v8 = vadd.f32 %v28_v4, %v16_v2  ;;  %v35_v9 = vadd.f32 %v21_v6, %v20_v5  ;;  %v19_v14 = vld [vmem:[%s384_s0 + $0x28] sm:$0xff]  ;;  %v24_v15 = vld [vmem:[%s384_s0 + $0x50] sm:$0xff]  ;;  %v25_v18 = vld [vmem:[%s384_s0 + $0x58] sm:$0xff] }
   0x6   :  { %v30_v12 = vadd.f32 %v29_v8, %v17_v3  ;;  %v36_v13 = vadd.f32 %v35_v9, %v22_v7 }
   0x8   :  { %v31_v16 = vadd.f32 %v30_v12, %v18_v10  ;;  %v37_v17 = vadd.f32 %v36_v13, %v23_v11 }
   0xa   :  { %v32_v19 = vadd.f32 %v31_v16, %v19_v14  ;;  %v38_v20 = vadd.f32 %v37_v17, %v24_v15 }
   0xc   :  { %33 = vadd.xlane.f32.xlu0 %v32_v19  ;;  %v39_v21 = vadd.f32 %v38_v20, %v25_v18 }
  0x10   :  { %40 = vadd.xlane.f32.xlu0 %v39_v21 }
  0x99   :  { %v34_v22 = vpop.xlane.xlu0 %33 }
  0x9a   :  { %v43_v23 = vmul.f32 0.0013020834, %v34_v22 }
  0x9c   :  { %v305_v24 = vsub.f32 %v14_v0, %v43_v23  ;;  %v307_v25 = vsub.f32 %v15_v1, %v43_v23  ;;  %v309_v26 = vsub.f32 %v16_v2, %v43_v23  ;;  %v311_v28 = vsub.f32 %v17_v3, %v43_v23 }
  0x9d   :  { %v41_v27 = vpop.xlane.xlu0 %40  ;;  %v317_v32 = vsub.f32 %v18_v10, %v43_v23  ;;  %v50_v38 = vsub.f32 %v19_v14, %v43_v23  ;;  %v103_v1 = vshrl.u32 %v102_v61, 7 }
  0x9e   :  { %v44_v29 = vmul.f32 0.0013020834, %v41_v27  ;;  %v57_v30 = vmul.f32 %v305_v24, %v305_v24  ;;  %v58_v31 = vmul.f32 %v307_v25, %v307_v25  ;;  %v59_v33 = vmul.f32 %v309_v26, %v309_v26 }
  0x9f   :  { %v60_v39 = vmul.f32 %v311_v28, %v311_v28  ;;  %v61_v44 = vmul.f32 %v317_v32, %v317_v32  ;;  %v62_v49 = vmul.f32 %v50_v38, %v50_v38  ;;  %v104_v4 = vsub.s32 0, %v103_v1 }
  0xa0   :  { %v69_v34 = vadd.f32 %v58_v31, %v57_v30  ;;  %v321_v35 = vsub.f32 %v20_v5, %v44_v29  ;;  %v323_v36 = vsub.f32 %v21_v6, %v44_v29  ;;  %v325_v37 = vsub.f32 %v22_v7, %v44_v29  ;;  %v26_v6 = vld [vmem:[%s385_s1] sm:$0x3f] }
  0xa1   :  { %v329_v41 = vsub.f32 %v23_v11, %v44_v29  ;;  %v337_v46 = vsub.f32 %v24_v15, %v44_v29  ;;  %v341_v51 = vsub.f32 %v25_v18, %v44_v29  ;;  %v108_v5 = vsub.s32 1, %v103_v1  ;;  %v27_v11 = vld [vmem:[%s386_s2] sm:$0x3f] }
  0xa2   :  { %v70_v40 = vadd.f32 %v69_v34, %v59_v33  ;;  %v63_v42 = vmul.f32 %v321_v35, %v321_v35  ;;  %v64_v43 = vmul.f32 %v323_v36, %v323_v36  ;;  %v65_v47 = vmul.f32 %v325_v37, %v325_v37 }
  0xa3   :  { %v66_v52 = vmul.f32 %v329_v41, %v329_v41  ;;  %v67_v55 = vmul.f32 %v337_v46, %v337_v46  ;;  %v68_v57 = vmul.f32 %v341_v51, %v341_v51  ;;  %v112_v7 = vsub.s32 2, %v103_v1 }
  0xa4   :  { %v71_v45 = vadd.f32 %v70_v40, %v60_v39  ;;  %v76_v48 = vadd.f32 %v64_v43, %v63_v42  ;;  %v116_v8 = vsub.s32 3, %v103_v1  ;;  %v120_v9 = vsub.s32 4, %v103_v1 }
  0xa5   :  { %v124_v10 = vsub.s32 5, %v103_v1  ;;  %v105_v12 = vrot.slane %v26_v6, %v104_v4  ;;  %v109_v13 = vrot.slane %v26_v6, %v108_v5  ;;  %v113_v14 = vrot.slane %v26_v6, %v112_v7 }
  0xa6   :  { %v72_v50 = vadd.f32 %v71_v45, %v61_v44  ;;  %v77_v53 = vadd.f32 %v76_v48, %v65_v47  ;;  %v117_v15 = vrot.slane %v26_v6, %v116_v8  ;;  %v121_v16 = vrot.slane %v26_v6, %v120_v9 }
  0xa7   :  { %v125_v17 = vrot.slane %v26_v6, %v124_v10  ;;  %v148_v19 = vrot.slane %v27_v11, %v104_v4  ;;  %v152_v20 = vrot.slane %v27_v11, %v108_v5  ;;  %v156_v21 = vrot.slane %v27_v11, %v112_v7 }
  0xa8   :  { %v73_v54 = vadd.f32 %v72_v50, %v62_v49  ;;  %v78_v56 = vadd.f32 %v77_v53, %v66_v52  ;;  %v160_v22 = vrot.slane %v27_v11, %v116_v8  ;;  %v164_v31 = vrot.slane %v27_v11, %v120_v9 }
  0xa9   :  { %v168_v33 = vrot.slane %v27_v11, %v124_v10 }
  0xaa   :  { %74 = vadd.xlane.f32.xlu1 %v73_v54  ;;  %v79_v58 = vadd.f32 %v78_v56, %v67_v55 }
  0xac   :  { %v80_v59 = vadd.f32 %v79_v58, %v68_v57 }
  0xae   :  { %81 = vadd.xlane.f32.xlu1 %v80_v59 }
 0x137   :  { %v75_v60 = vpop.xlane.xlu1 %74 }
 0x138   :  { %v83_v62 = vmul.f32 0.0013020834, %v75_v60 }
 0x13a   :  { %v85_v63 = vadd.f32 1e-05, %v83_v62 }
 0x13b   :  { %v82_v0 = vpop.xlane.xlu1 %81 }
 0x13c   :  { %245 = vrsqrt.f32 %v85_v63  ;;  %v84_v2 = vmul.f32 0.0013020834, %v82_v0 }
 0x13e   :  { %v86_v3 = vadd.f32 1e-05, %v84_v2 }
 0x140   :  { %247 = vrsqrt.f32 %v86_v3 }
 0x146   :  { %v246_v18 = vpop.eup %245 }
 0x147   :  { %v89_v23 = vmul.f32 %v246_v18, %v305_v24  ;;  %v90_v27 = vmul.f32 %v246_v18, %v307_v25  ;;  %v91_v29 = vmul.f32 %v246_v18, %v309_v26  ;;  %v92_v30 = vmul.f32 %v246_v18, %v311_v28 }
 0x148   :  { %v93_v34 = vmul.f32 %v246_v18, %v317_v32  ;;  %v94_v39 = vmul.f32 %v246_v18, %v50_v38 }
 0x149   :  { %v132_v40 = vmul.f32 %v105_v12, %v89_v23  ;;  %v133_v42 = vmul.f32 %v109_v13, %v90_v27  ;;  %v134_v43 = vmul.f32 %v113_v14, %v91_v29  ;;  %v135_v44 = vmul.f32 %v117_v15, %v92_v30 }
 0x14a   :  { %v248_v45 = vpop.eup %247  ;;  %v136_v47 = vmul.f32 %v121_v16, %v93_v34  ;;  %v137_v48 = vmul.f32 %v125_v17, %v94_v39 }
 0x14b   :  { %v175_v49 = vadd.f32 %v148_v19, %v132_v40  ;;  %v176_v24 = vadd.f32 %v152_v20, %v133_v42  ;;  %v177_v50 = vadd.f32 %v156_v21, %v134_v43  ;;  %v178_v25 = vadd.f32 %v160_v22, %v135_v44 }
 0x14c   :  { %v179_v52 = vadd.f32 %v164_v31, %v136_v47  ;;  %v180_v26 = vadd.f32 %v168_v33, %v137_v48  ;;  %v95_v28 = vmul.f32 %v248_v45, %v321_v35  ;;  %v96_v53 = vmul.f32 %v248_v45, %v323_v36 }
 0x14d   :  { %v239_v54 = vpack.c.bf16 %v176_v24, %v175_v49  ;;  %v240_v32 = vpack.c.bf16 %v178_v25, %v177_v50  ;;  %v97_v38 = vmul.f32 %v248_v45, %v325_v37  ;;  %v98_v55 = vmul.f32 %v248_v45, %v329_v41 }
 0x14e   :  { %v241_v56 = vpack.c.bf16 %v180_v26, %v179_v52  ;;  %v99_v57 = vmul.f32 %v248_v45, %v337_v46  ;;  %v100_v58 = vmul.f32 %v248_v45, %v341_v51  ;;  %v138_v59 = vmul.f32 %v105_v12, %v95_v28 }
 0x14f   :  { %223 = vst [vmem:[%s387_s3] sm:$0xff] %v239_v54  ;;  %224 = vst [vmem:[%s387_s3 + $0x8] sm:$0xff] %v240_v32  ;;  %v139_v35 = vmul.f32 %v109_v13, %v96_v53  ;;  %v140_v36 = vmul.f32 %v113_v14, %v97_v38  ;;  %v141_v60 = vmul.f32 %v117_v15, %v98_v55 }
 0x150   :  { %225 = vst [vmem:[%s387_s3 + $0x10] sm:$0xff] %v241_v56  ;;  %v142_v37 = vmul.f32 %v121_v16, %v99_v57  ;;  %v143_v41 = vmul.f32 %v125_v17, %v100_v58  ;;  %v181_v46 = vadd.f32 %v148_v19, %v138_v59 }
 0x151   :  { %v182_v51 = vadd.f32 %v152_v20, %v139_v35  ;;  %v183_v61 = vadd.f32 %v156_v21, %v140_v36  ;;  %v184_v62 = vadd.f32 %v160_v22, %v141_v60 }
 0x152   :  { %v185_v63 = vadd.f32 %v164_v31, %v142_v37  ;;  %v186_v0 = vadd.f32 %v168_v33, %v143_v41 }
 0x153   :  { %v242_v1 = vpack.c.bf16 %v182_v51, %v181_v46  ;;  %v243_v2 = vpack.c.bf16 %v184_v62, %v183_v61 }
 0x154   :  { %v244_v3 = vpack.c.bf16 %v186_v0, %v185_v63 }
 0x155   :  { %226 = vst [vmem:[%s387_s3 + $0x18] sm:$0xff] %v242_v1  ;;  %227 = vst [vmem:[%s387_s3 + $0x20] sm:$0xff] %v243_v2 }
 0x156   :  { %228 = vst [vmem:[%s387_s3 + $0x28] sm:$0xff] %v244_v3 }

// kernel: longformer_forward.18
= control target key start
LH: loop header
LB: loop body
LE: loop exit
PB: predicated region body
PF: predicated region fallthrough
CT: control target
= control target key end

     0   :  { %8 = vsyncpa [#allocation5], 0  ;;  %s1404_s0 = inlined_call_operand.vmem [shape: bf16[16,768], index: 0, kind: input, shape index: {}]   ;;  %s1405_s1 = inlined_call_operand.hbm [shape: bf16[768,2304], index: 1, kind: input, shape index: {}]   ;;  %s1406_s2 = inlined_call_operand.vmem [shape: f32[1,2304], index: 2, kind: input, shape index: {}]   ;;  %s1407_s3 = inlined_call_operand.vmem [shape: bf16[16,2304], index: 3, kind: output, shape index: {}]  }
   0x1   :  { %10 = vsyncpa [#allocation5 + $0x1], 0  ;;  %s1137_s12 = smov 0   ;;  %s1139_s13 = smov 0  }
   0x2   :  { %s1141_s14 = smov 0   ;;  %s1143_s15 = smov 0  }
   0x3   :  { %s1145_s16 = smov 0   ;;  %s1147_s17 = smov 0  }
   0x4   :  { %s1149_s18 = smov 0   ;;  %s1151_s19 = smov 0  }
   0x5   :  { %s1153_s20 = smov 0   ;;  %s1155_s21 = smov 0  }
   0x6   :  { %s1157_s22 = smov 0   ;;  %s1159_s23 = smov 0  }
   0x7 LB: > { %1411 = sst [smem:[#allocation8_spill]] %s1090_s18  ;;  %s766_s24 = sadd.s32 4294967295, %s1110_s23   ;;  %s1110_s23 = sphi %s1159_s23, %s16_s23   ;;  %s1106_s22 = sphi %s1157_s22, %s1434_s22   ;;  %s1102_s21 = sphi %s1155_s21, %s1433_s21   ;;  %s1098_s20 = sphi %s1153_s20, %s1432_s20   ;;  %s1094_s19 = sphi %s1151_s19, %s1431_s19   ;;  %s1090_s18 = sphi %s1149_s18, %s1423_s18   ;;  %s1086_s17 = sphi %s1147_s17, %s1422_s17   ;;  %s1082_s16 = sphi %s1145_s16, %s1430_s16   ;;  %s1078_s15 = sphi %s1143_s15, %s1429_s15   ;;  %s1074_s14 = sphi %s1141_s14, %s1428_s14   ;;  %s1070_s13 = sphi %s1139_s13, %s1427_s13   ;;  %s1066_s12 = sphi %s1137_s12, %s1426_s12  }
   0x8   : > { %s28_s25 = sadd.s32 1, %s1102_s21  ;;  %s31_s26 = sadd.s32 1, %s1106_s22 }
   0x9   : > { %p29_p0 = scmp.ge.s32.totalorder %s28_s25, 3  ;;  %s44_s27 = sadd.s32 1, %s1090_s18 }
   0xa   : > { %p51_p1 = scmp.ne.s32.totalorder %s1090_s18, %s1086_s17  ;;  %p52_p2 = scmp.eq.s32.totalorder %s1110_s23, 0 }
   0xb   : > { %s1436_s25 = smov (%p29_p0, %s28_s25), 0  ;;  %s1438_s26 = smov (!%p29_p0, %s31_s26), %s1106_s22 }
   0xc   : > { %1412 = sst [smem:[#allocation9_spill]] %s1436_s25  ;;  %s40_s28 = ssub.s32 %s1102_s21, %s1436_s25 }
   0xd   : > { %p33_p3 = scmp.ge.s32.totalorder %s1438_s26, 9  ;;  %p42_p4 = scmp.eq.s32.totalorder %s40_s28, 0 }
   0xe   : > { %p1209_p5 = por %p52_p2, %p51_p1  ;;  %s72_s30 = sadd.s32 1, %s1082_s16 }
   0xf   : > { %s1440_s26 = smov (%p33_p3, %s1438_s26), 0  ;;  %p79_p6 = scmp.ne.s32.totalorder %s1082_s16, %s1078_s15 }
  0x10   : > { %1414 = sst [smem:[#allocation10_spill]] %s1440_s26  ;;  %s68_s5 = ssub.s32 %s1106_s22, %s1440_s26 }
  0x11   : > { %s1217_s4 = scalar_select %p42_p4, %s1090_s18, %s44_s27  }
  0x12   : > { %s69_s6 = sor.u32 %s68_s5, %s40_s28  ;;  %p85_p7 = scmp.ne.s32.totalorder %s1078_s15, %s1074_s14 }
  0x13   : > { %1415 = sst [smem:[#allocation11_spill]] %s1217_s4  ;;  %p70_p8 = scmp.eq.s32.totalorder %s69_s6, 0 }
  0x14   : > { %p1225_p9 = por %p79_p6, %p52_p2  ;;  %p86_p10 = scmp.eq.s32.totalorder %s766_s24, 0 }
  0x15   : > { %p124_p11 = scmp.eq.s32.totalorder %s68_s5, 0  ;;  %s126_s10 = sadd.s32 1, %s1070_s13 }
  0x16   : > { %s1232_s8 = scalar_select %p70_p8, %s1082_s16, %s72_s30  }
  0x17   : > { %p1234_p12 = por %p86_p10, %p85_p7  ;;  %p136_p13 = scmp.ne.s32.totalorder %s1070_s13, %s1066_s12 }
  0x18   : > { %1417 = sst [smem:[#allocation12_spill]] %s1232_s8  ;;  %p137_p0 = scmp.eq.s32.totalorder %s766_s24, 26 }
  0x19   : > { %s1240_s11 = scalar_select %p124_p11, %s1070_s13, %s126_s10  }
  0x1a   : > { %p1246_p1 = por %p137_p0, %p136_p13  ;;  %p769_p2 = scmp.ge.s32.totalorder %s1110_s23, 27 }
  0x1c   : > { %s1419_s14 = scalar_select %p1246_p1, 1, 0 }
  0x1d   : > { %159 = sbr.rel (%p769_p2) target bundleno = 72 (0x48), region = 16 }
  0x24   : > { %162 = sbr.rel (!%p1209_p5) target bundleno = 43 (0x2b), region = 20  ;;  %s164_s27 = sand.u32 (%p1209_p5), 1, %s1090_s18  }
  0x25   : > { %s826_s28 = sshll.u32 (%p1209_p5), %s1102_s21, 3  ;;  %s770_s30 = sshll.u32 (%p1209_p5), %s164_s27, 4 }
  0x26   : > { %s172_s10 = scalar_lea.vmem (%p1209_p5), %s1404_s0, %s826_s28  ;;  %s166_s24 = scalar_lea.vmem (%p1209_p5), [#allocation3], %s770_s30 }
  0x27   : > { %v202_v0 = vld [vmem:[%s172_s10] sm:$0xff] (%p1209_p5)  ;;  %v204_v1 = vld [vmem:[%s172_s10 + $0x18] sm:$0xff] (%p1209_p5) }
  0x28   : > { %203 = vst [vmem:[%s166_s24] sm:$0xff] (%p1209_p5), %v202_v0  ;;  %205 = vst [vmem:[%s166_s24 + $0x8] sm:$0xff] (%p1209_p5), %v204_v1 }
  0x2b PF: > { %s212_s29 = sand.u32 1, %s1082_s16   ;;  %s775_s26 = sshll.u32 %s1106_s22, 1 }
  0x2c   : > { %s773_s25 = sshll.u32 %s212_s29, 8  ;;  %s830_s4 = smul.u32 576, %s1102_s21 }
  0x2d   : > { %s216_s18 = scalar_lea.vmem [#allocation4], %s773_s25  ;;  %s1268_s10 = scalar_lea.sflag [#allocation5], %s212_s29 }
  0x2e   : > { %s226_s27 = sshll.u32 %s216_s18, 4  ;;  %s223_s8 = sadd.s32 %s830_s4, %s775_s26  ;;  %s1261_s27 = int_to_ptr.vmem [resolvable:$true] %s226_s27 }
  0x2f   : > { %s777_s28 = sshll.u32 %s223_s8, 6  ;;  %s988_s26 = scalar_lea.hbm %s1405_s1, 110592 }
  0x30   : > { %s1266_s30 = scalar_lea.hbm %s1405_s1, %s777_s28 }
  0x31   : > { %s984_s24 = scalar_lea.hbm %s1266_s30, 4096  ;;  %p989_p6 = scmp.lt.u32.totalorder %s1266_s30, %s1405_s1 }
  0x32   : > { %p985_p3 = scmp.ne.s32.totalorder %s1266_s30, %s984_s24  ;;  %p990_p7 = scmp.lt.u32.totalorder %s988_s26, %s984_s24 }
  0x33   : > { %p992_p10 = scmp.lt.u32.totalorder %s984_s24, %s1266_s30 }
  0x34   : > { %p986_p4 = pnand %p985_p3, %p1225_p9  ;;  %p991_p8 = por %p990_p7, %p989_p6 }
  0x36   : > { %p987_p5 = pneg %p986_p4  ;;  %p993_p11 = por %p992_p10, %p991_p8 }
  0x38   : > { %p994_p13 = pnand %p993_p11, %p987_p5 }
  0x3a   : > { %997 = shalt.err (!%p994_p13)
}
  0x3b   : > { %s998_s29 = scalar_lea.vmem %s1261_s27, 4096  ;;  %s1112_s28 = smov [#allocation4]  }
  0x3c   : > { %p999_p0 = scmp.ne.s32.totalorder %s1261_s27, %s998_s29  ;;  %s1002_s5 = sshll.u32 %s1112_s28, 4  ;;  %s1003_s5 = int_to_ptr.vmem [resolvable:$false] %s1002_s5 }
  0x3d   : > { %s1004_s6 = scalar_lea.vmem %s1003_s5, 8192  ;;  %p1005_p4 = scmp.lt.s32.totalorder %s1261_s27, %s1003_s5 }
  0x3e   : > { %p1000_p2 = pnand %p999_p0, %p1225_p9  ;;  %p1006_p1 = scmp.lt.s32.totalorder %s1004_s6, %s998_s29 }
  0x40   : > { %p1001_p3 = pneg %p1000_p2  ;;  %p1007_p6 = por %p1006_p1, %p1005_p4 }
  0x42   : > { %p1008_p7 = pnand %p1007_p6, %p1001_p3 }
  0x44   : > { %1011 = shalt.err (!%p1008_p7)
}
  0x45   : > { %s1113_s24 = smov 1152   ;;  %s1114_s18 = smov 128  }
  0x46   : > { %s1115_s25 = smov 8  }
  0x47   : > { %831 = dma.hbm_to_vmem [thread:$0]  (%p1225_p9), %s1266_s30, 4096, %s1261_s27, %s1268_s10, %s1113_s24, %s1114_s18, %s1115_s25  }
  0x48 PF: > { %p778_p5 = scmp.ge.s32.totalorder %s1110_s23, 1  ;;  %p242_p8 = scmp.lt.s32.totalorder %s1110_s23, 28 }
  0x4a   : > { %p243_p10 = pnand %p778_p5, %p242_p8 }
  0x4b   : > { %s249_s26 = sand.u32 (!%p243_p10), 1, %s1086_s17   ;;  %s255_s4 = sand.u32 (!%p243_p10), 1, %s1078_s15  }
  0x4c   : > { %246 = sbr.rel (%p243_p10) target bundleno = 399 (0x18f), region = 66  ;;  %s1296_s8 = sshll.u32 (!%p243_p10), %s249_s26, 4 }
  0x4d   : > { %s780_s29 = sshll.u32 (!%p243_p10), %s255_s4, 8  ;;  %s251_s28 = scalar_lea.vmem (!%p243_p10), [#allocation3], %s1296_s8 }
  0x4e   : > { %s256_s5 = scalar_lea.sflag (!%p243_p10), [#allocation5], %s255_s4  ;;  %s1299_s7 = scalar_lea.vmem (!%p243_p10), [#allocation4], %s780_s29 }
  0x53   : > { %1061 = dma.done.wait (%p1234_p12), %s256_s5, 4096  }
  0x54   : > { %1063 = vsyncadd (%p1234_p12), %s256_s5, 4294963200  ;;  %s286_s27 = sand.u32 1, %s1066_s12   ;;  %s782_s30 = sshll.u32 %s1098_s20, 1 }
  0x55   : > { %s781_s10 = sshll.u32 %s286_s27, 4  ;;  %p294_p9 = scmp.lt.s32.totalorder %s782_s30, 17 }
  0x56   : > { %s1313_s18 = scalar_lea.vmem [#allocation6], %s781_s10  ;;  %p783_p1 = scmp.ne.s32.totalorder %s1094_s19, 0 }
  0x57   : > { %s1442_s30 = smov (!%p294_p9, %s782_s30), 17  ;;  %v1116_v2 = vmov (!%p783_p1), 0.0  }
  0x58   : > { %s296_s24 = scalar_lea.vmem %s1406_s2, %s1442_s30  ;;  %303 = sbr.rel (%p783_p1) target bundleno = 95 (0x5f), region = 78  ;;  %304 = vst [vmem:[#allocation2] sm:$0xff] (!%p783_p1), %v1116_v2  ;;  %305 = vst [vmem:[#allocation2 + $0x8] sm:$0xff] (!%p783_p1), %v1116_v2 }
  0x59   : > { %306 = vst [vmem:[#allocation2 + $0x10] sm:$0xff] (!%p783_p1), %v1116_v2  ;;  %307 = vst [vmem:[#allocation2 + $0x18] sm:$0xff] (!%p783_p1), %v1116_v2 }
  0x5f PF: > { %v933_v3 = vld [vmem:[%s1299_s7 + $0x4] ss:$8 sps:$4 sm:$0xff]   ;;  %v935_v4 = vld [vmem:[%s1299_s7] ss:$8 sps:$4 sm:$0xff]   ;;  %v936_v5 = vld [vmem:[%s1299_s7 + $0x14] ss:$8 sps:$4 sm:$0xff]  }
  0x60   : > { %516 = vmatprep.subr.bf16.mxu0 %v933_v3  ;;  %v938_v6 = vld [vmem:[%s1299_s7 + $0x10] ss:$8 sps:$4 sm:$0xff]   ;;  %v939_v7 = vld [vmem:[%s1299_s7 + $0x24] ss:$8 sps:$4 sm:$0xff]   ;;  %v941_v8 = vld [vmem:[%s1299_s7 + $0x20] ss:$8 sps:$4 sm:$0xff]  }
  0x61   : > { %517 = vmatpush1.bf16.msra.mxu0 %v935_v4  ;;  %v942_v9 = vld [vmem:[%s1299_s7 + $0x34] ss:$8 sps:$4 sm:$0xff]   ;;  %v944_v10 = vld [vmem:[%s1299_s7 + $0x30] ss:$8 sps:$4 sm:$0xff]   ;;  %v945_v11 = vld [vmem:[%s1299_s7 + $0x44] ss:$8 sps:$4 sm:$0xff]  }
  0x62   : > { %518 = vmatprep.subr.bf16.mxu0 %v936_v5  ;;  %v947_v12 = vld [vmem:[%s1299_s7 + $0x40] ss:$8 sps:$4 sm:$0xff]   ;;  %v948_v13 = vld [vmem:[%s1299_s7 + $0x54] ss:$8 sps:$4 sm:$0xff]   ;;  %v950_v14 = vld [vmem:[%s1299_s7 + $0x50] ss:$8 sps:$4 sm:$0xff]  }
  0x63   : > { %v951_v15 = vld [vmem:[%s1299_s7 + $0x64] ss:$8 sps:$4 sm:$0xff]   ;;  %v953_v17 = vld [vmem:[%s1299_s7 + $0x60] ss:$8 sps:$4 sm:$0xff]   ;;  %v954_v18 = vld [vmem:[%s1299_s7 + $0x74] ss:$8 sps:$4 sm:$0xff]  }
  0x64   : > { %v983_v16 = vld [vmem:[%s251_s28 + $0x4] ss:$8 sps:$4 sm:$0xff]   ;;  %v956_v19 = vld [vmem:[%s1299_s7 + $0x70] ss:$8 sps:$4 sm:$0xff]   ;;  %v959_v21 = vld [vmem:[%s1299_s7 + $0x80] ss:$8 sps:$4 sm:$0xff]  }
  0x65   : > { %519 = vmatpush1.bf16.msra.mxu0 %v938_v6  ;;  %548 = vmatprep.mubr.bf16.mxu0 %v983_v16  ;;  %v957_v20 = vld [vmem:[%s1299_s7 + $0x84] ss:$8 sps:$4 sm:$0xff]   ;;  %v960_v22 = vld [vmem:[%s1299_s7 + $0x94] ss:$8 sps:$4 sm:$0xff]   ;;  %v962_v23 = vld [vmem:[%s1299_s7 + $0x90] ss:$8 sps:$4 sm:$0xff]  }
  0x66   : > { %520 = vmatprep.subr.bf16.mxu0 %v939_v7  ;;  %v963_v24 = vld [vmem:[%s1299_s7 + $0xa4] ss:$8 sps:$4 sm:$0xff]   ;;  %v965_v25 = vld [vmem:[%s1299_s7 + $0xa0] ss:$8 sps:$4 sm:$0xff]   ;;  %v966_v26 = vld [vmem:[%s1299_s7 + $0xb4] ss:$8 sps:$4 sm:$0xff]  }
  0x67   : > { %v968_v27 = vld [vmem:[%s1299_s7 + $0xb0] ss:$8 sps:$4 sm:$0xff]   ;;  %v969_v28 = vld [vmem:[%s1299_s7 + $0xc4] ss:$8 sps:$4 sm:$0xff]   ;;  %v971_v29 = vld [vmem:[%s1299_s7 + $0xc0] ss:$8 sps:$4 sm:$0xff]  }
  0x68   : > { %v972_v30 = vld [vmem:[%s1299_s7 + $0xd4] ss:$8 sps:$4 sm:$0xff]   ;;  %v974_v31 = vld [vmem:[%s1299_s7 + $0xd0] ss:$8 sps:$4 sm:$0xff]   ;;  %v975_v32 = vld [vmem:[%s1299_s7 + $0xe4] ss:$8 sps:$4 sm:$0xff]  }
  0x69   : > { %521 = vmatpush1.bf16.msra.mxu0 %v941_v8  ;;  %v977_v33 = vld [vmem:[%s1299_s7 + $0xe0] ss:$8 sps:$4 sm:$0xff]   ;;  %v978_v34 = vld [vmem:[%s1299_s7 + $0xf4] ss:$8 sps:$4 sm:$0xff]   ;;  %v980_v35 = vld [vmem:[%s1299_s7 + $0xf0] ss:$8 sps:$4 sm:$0xff]  }
  0x6a   : > { %522 = vmatprep.subr.bf16.mxu0 %v942_v9  ;;  %v981_v36 = vld [vmem:[%s251_s28] ss:$8 sps:$4 sm:$0xff]   ;;  %p818_p12 = scmp.ne.s32.totalorder %s1094_s19, 2 }
  0x6b   : > { %v308_v37 = vld [vmem:[#allocation2] sm:$0xff]  ;;  %v309_v38 = vld [vmem:[#allocation2 + $0x8] sm:$0xff]  ;;  %v310_v40 = vld [vmem:[#allocation2 + $0x10] sm:$0xff]  ;;  %v577_v49 = vlaneseq (!%p818_p12) }
  0x6c   : > { %v311_v43 = vld [vmem:[#allocation2 + $0x18] sm:$0xff]  ;;  %v575_v51 = vld [vmem:[%s296_s24] sm:$0x3] (!%p818_p12) }
  0x6d   : > { %523 = vmatpush1.bf16.msra.mxu0 %v944_v10  ;;  %v578_v50 = vshrl.u32 (!%p818_p12), %v577_v49, 7 }
  0x6e   : > { %524 = vmatprep.subr.bf16.mxu0 %v945_v11 }
  0x6f   : > { %v579_v53 = vsub.s32 (!%p818_p12), 0, %v578_v50  ;;  %v583_v54 = vsub.s32 (!%p818_p12), 1, %v578_v50 }
  0x71   : > { %525 = vmatpush1.bf16.msra.mxu0 %v947_v12  ;;  %v580_v58 = vrot.slane (!%p818_p12), %v575_v51, %v579_v53  ;;  %v584_v59 = vrot.slane (!%p818_p12), %v575_v51, %v583_v54 }
  0x72   : > { %526 = vmatprep.subr.bf16.mxu0 %v948_v13 }
  0x75   : > { %527 = vmatpush1.bf16.msra.mxu0 %v950_v14 }
  0x76   : > { %528 = vmatprep.subr.bf16.mxu0 %v951_v15 }
  0x79   : > { %529 = vmatpush1.bf16.msra.mxu0 %v953_v17 }
  0x7a   : > { %530 = vmatprep.subr.bf16.mxu0 %v954_v18 }
  0x7d   : > { %531 = vmatpush1.bf16.msra.mxu0 %v956_v19 }
  0x7e   : > { %532 = vmatprep.subr.bf16.mxu0 %v957_v20 }
  0x81   : > { %533 = vmatpush1.bf16.msra.mxu0 %v959_v21 }
  0x82   : > { %534 = vmatprep.subr.bf16.mxu0 %v960_v22 }
  0x85   : > { %535 = vmatpush1.bf16.msra.mxu0 %v962_v23 }
  0x86   : > { %536 = vmatprep.subr.bf16.mxu0 %v963_v24 }
  0x89   : > { %537 = vmatpush1.bf16.msra.mxu0 %v965_v25 }
  0x8a   : > { %538 = vmatprep.subr.bf16.mxu0 %v966_v26 }
  0x8d   : > { %539 = vmatpush1.bf16.msra.mxu0 %v968_v27 }
  0x8e   : > { %540 = vmatprep.subr.bf16.mxu0 %v969_v28 }
  0x91   : > { %541 = vmatpush1.bf16.msra.mxu0 %v971_v29 }
  0x92   : > { %542 = vmatprep.subr.bf16.mxu0 %v972_v30 }
  0x95   : > { %543 = vmatpush1.bf16.msra.mxu0 %v974_v31 }
  0x96   : > { %544 = vmatprep.subr.bf16.mxu0 %v975_v32 }
  0x99   : > { %545 = vmatpush1.bf16.msra.mxu0 %v977_v33 }
  0x9a   : > { %546 = vmatprep.subr.bf16.mxu0 %v978_v34 }
  0x9d   : > { %547 = vmatpush1.bf16.msra.mxu0 %v980_v35 }
  0xa0   : > { %549 = vmatmul.mubr.bf16.vlgmr.msra.gmra.mrb[0].mxu0 %v981_v36 }
 0x173   : > { %v550_v39 = vpop.f32.mrb[0].mxu0  ;;  %570 = sbr.rel (%p818_p12) target bundleno = 390 (0x186), region = 82 }
 0x174   : > { %v559_v41 = vadd.f32 %v550_v39, %v308_v37  ;;  %v552_v42 = vpop.f32.mrb[1].mxu0 }
 0x175   : > { %v560_v44 = vadd.f32 %v552_v42, %v309_v38  ;;  %v554_v45 = vpop.f32.mrb[2].mxu0 }
 0x176   : > { %563 = vst [vmem:[#allocation2] sm:$0xff] %v559_v41  ;;  %v561_v46 = vadd.f32 %v554_v45, %v310_v40  ;;  %v556_v47 = vpop.f32.mrb[3].mxu0 }
 0x177   : > { %564 = vst [vmem:[#allocation2 + $0x8] sm:$0xff] %v560_v44  ;;  %v562_v48 = vadd.f32 %v556_v47, %v311_v43 }
 0x178   : > { %565 = vst [vmem:[#allocation2 + $0x10] sm:$0xff] %v561_v46 }
 0x179   : > { %566 = vst [vmem:[#allocation2 + $0x18] sm:$0xff] %v562_v48 }
 0x17d   : > { %v571_v52 = vld [vmem:[#allocation2] sm:$0xff] }
 0x17e   : > { %v572_v55 = vld [vmem:[#allocation2 + $0x8] sm:$0xff]  ;;  %v587_v60 = vadd.f32 %v580_v58, %v571_v52 }
 0x17f   : > { %v573_v56 = vld [vmem:[#allocation2 + $0x10] sm:$0xff]  ;;  %v588_v61 = vadd.f32 %v584_v59, %v572_v55 }
 0x180   : > { %v574_v57 = vld [vmem:[#allocation2 + $0x18] sm:$0xff]  ;;  %v589_v62 = vadd.f32 %v580_v58, %v573_v56 }
 0x181   : > { %v590_v63 = vadd.f32 %v584_v59, %v574_v57  ;;  %v827_v0 = vpack.c.bf16 %v588_v61, %v587_v60 }
 0x183   : > { %v828_v1 = vpack.c.bf16 %v590_v63, %v589_v62  ;;  %603 = vst [vmem:[%s1313_s18] sm:$0xff] %v827_v0 }
 0x185   : > { %604 = vst [vmem:[%s1313_s18 + $0x8] sm:$0xff] %v828_v1 }
 0x186 PF: > { %p1420_p11 = scmp.ne.s32.totalorder %s1419_s14, 0 }
 0x187   : > { %s829_s19 = sshll.u32 (%p1420_p11), %s1098_s20, 3 }
 0x188   : > { %611 = sbr.rel (!%p1420_p11) target bundleno = 399 (0x18f), region = 86  ;;  %s617_s4 = scalar_lea.vmem (%p1420_p11), %s1407_s3, %s829_s19 }
 0x18a   : > { %v647_v2 = vld [vmem:[%s1313_s18] sm:$0xff] (%p1420_p11) }
 0x18b   : > { %648 = vst [vmem:[%s617_s4] sm:$0xff] (%p1420_p11), %v647_v2 }
 0x18c   : > { %v649_v3 = vld [vmem:[%s1313_s18 + $0x8] sm:$0xff] (%p1420_p11) }
 0x18d   : > { %650 = vst [vmem:[%s617_s4 + $0x48] sm:$0xff] (%p1420_p11), %v649_v3 }
 0x18f PF: > { %s16_s23 = sadd.s32 1, %s1110_s23   ;;  %s1421_s8 = sld [smem:[#allocation12_spill]] }
 0x190   : > { %p13_p13 = scmp.ge.s32.totalorder %s16_s23, 29   ;;  %s1422_s17 = sld [smem:[#allocation8_spill]] }
 0x191   : > { %s1423_s18 = sld [smem:[#allocation11_spill]]  ;;  %s1424_s29 = sld [smem:[#allocation9_spill]] }
 0x192   : > { %s1425_s28 = sld [smem:[#allocation10_spill]]  ;;  %s1426_s12 = smov %s1070_s13 }
 0x193   : > { %s1427_s13 = smov %s1240_s11  ;;  %s1428_s14 = smov %s1078_s15 }
 0x194   : > { %s1429_s15 = smov %s1082_s16  ;;  %s1431_s19 = smov %s1102_s21 }
 0x195   : > { %s1430_s16 = smov %s1421_s8  ;;  %s1432_s20 = smov %s1106_s22 }
 0x196   :  { %15 = sbr.rel (!%p13_p13) target bundleno = 7 (0x7), region = 167 }
 0x197   : > { %s1433_s21 = smov %s1424_s29 }
 0x198   : > { %s1434_s22 = smov %s1425_s28 }
 0x19d   :  { %666 = vsyncpa [#allocation5], 1 }
 0x19e   :  { %668 = vsyncpa [#allocation5 + $0x1], 1 }

// kernel: longformer_forward.20
= control target key start
LH: loop header
LB: loop body
LE: loop exit
PB: predicated region body
PF: predicated region fallthrough
CT: control target
= control target key end

     0   :  { %s1214_s12 = smov 0   ;;  %s1216_s13 = smov 0   ;;  %s1501_s0 = inlined_call_operand.vmem [shape: bf16[16,768], index: 0, kind: input, shape index: {}]   ;;  %s1502_s1 = inlined_call_operand.vmem [shape: bf16[768,768], index: 1, kind: input, shape index: {}]   ;;  %s1503_s2 = inlined_call_operand.vmem [shape: f32[1,768], index: 2, kind: input, shape index: {}]   ;;  %s1504_s3 = inlined_call_operand.vmem [shape: bf16[16,768], index: 3, kind: output, shape index: {}]  }
   0x1   :  { %s1218_s14 = smov 0   ;;  %s1220_s15 = smov 0  }
   0x2   :  { %s1222_s16 = smov 0   ;;  %s1224_s17 = smov 0  }
   0x3   :  { %s1226_s18 = smov 0   ;;  %s1228_s19 = smov 0  }
   0x4   :  { %s1230_s20 = smov 0   ;;  %s1232_s21 = smov 0  }
   0x5   :  { %s1234_s22 = smov 0  }
   0x6 LB: > { %s900_s23 = sadd.s32 4294967295, %s1191_s22   ;;  %s25_s24 = sadd.s32 1, %s1183_s20  ;;  %s1191_s22 = sphi %s1234_s22, %s13_s22   ;;  %s1187_s21 = sphi %s1232_s21, %s1525_s21   ;;  %s1183_s20 = sphi %s1230_s20, %s1524_s20   ;;  %s1179_s19 = sphi %s1228_s19, %s1523_s19   ;;  %s1175_s18 = sphi %s1226_s18, %s1522_s18   ;;  %s1171_s17 = sphi %s1224_s17, %s1521_s17   ;;  %s1167_s16 = sphi %s1222_s16, %s1520_s16   ;;  %s1163_s15 = sphi %s1220_s15, %s1519_s15   ;;  %s1159_s14 = sphi %s1218_s14, %s1518_s14   ;;  %s1155_s13 = sphi %s1216_s13, %s1517_s13   ;;  %s1151_s12 = sphi %s1214_s12, %s1516_s12  }
   0x7   : > { %p26_p0 = scmp.ge.s32.totalorder %s25_s24, 3  ;;  %s28_s25 = sadd.s32 1, %s1187_s21 }
   0x8   : > { %s41_s26 = sadd.s32 1, %s1171_s17  ;;  %p48_p1 = scmp.ne.s32.totalorder %s1171_s17, %s1167_s16 }
   0x9   : > { %s1527_s24 = smov (%p26_p0, %s25_s24), 0  ;;  %s1529_s25 = smov (!%p26_p0, %s28_s25), %s1187_s21 }
   0xa   : > { %1507 = sst [smem:[#allocation6_spill]] %s1527_s24  ;;  %s37_s27 = ssub.s32 %s1183_s20, %s1527_s24 }
   0xb   : > { %p49_p2 = scmp.eq.s32.totalorder %s1191_s22, 0  ;;  %p30_p3 = scmp.ge.s32.totalorder %s1529_s25, 3 }
   0xc   : > { %p39_p4 = scmp.eq.s32.totalorder %s37_s27, 0  ;;  %s69_s29 = sadd.s32 1, %s1163_s15 }
   0xd   : > { %p1281_p5 = por %p49_p2, %p48_p1  ;;  %s1531_s25 = smov (%p30_p3, %s1529_s25), 0 }
   0xe   : > { %1509 = sst [smem:[#allocation7_spill]] %s1531_s25  ;;  %s65_s4 = ssub.s32 %s1187_s21, %s1531_s25 }
   0xf   : > { %s1289_s30 = scalar_select %p39_p4, %s1171_s17, %s41_s26  }
  0x10   : > { %p76_p6 = scmp.ne.s32.totalorder %s1163_s15, %s1159_s14  ;;  %s66_s5 = sor.u32 %s65_s4, %s37_s27 }
  0x11   : > { %1510 = sst [smem:[#allocation8_spill]] %s1289_s30  ;;  %p121_p7 = scmp.eq.s32.totalorder %s65_s4, 0 }
  0x12   : > { %p67_p8 = scmp.eq.s32.totalorder %s66_s5, 0  ;;  %p1295_p9 = por %p76_p6, %p49_p2 }
  0x13   : > { %s123_s7 = sadd.s32 1, %s1155_s13  ;;  %p133_p10 = scmp.ne.s32.totalorder %s1155_s13, %s1151_s12 }
  0x14   : > { %s1303_s8 = scalar_select %p67_p8, %s1163_s15, %s69_s29  }
  0x15   : > { %s1306_s9 = scalar_select %p121_p7, %s1155_s13, %s123_s7  }
  0x16   : > { %p134_p11 = scmp.eq.s32.totalorder %s900_s23, 8  ;;  %p903_p13 = scmp.ge.s32.totalorder %s1191_s22, 9 }
  0x18   : > { %p1308_p12 = por %p134_p11, %p133_p10  ;;  %156 = sbr.rel (%p903_p13) target bundleno = 62 (0x3e), region = 16 }
  0x1f   : > { %159 = sbr.rel (!%p1281_p5) target bundleno = 38 (0x26), region = 20  ;;  %s161_s11 = sand.u32 (%p1281_p5), 1, %s1171_s17  }
  0x20   : > { %s960_s26 = sshll.u32 (%p1281_p5), %s1183_s20, 3  ;;  %s904_s27 = sshll.u32 (%p1281_p5), %s161_s11, 4 }
  0x21   : > { %s169_s5 = scalar_lea.vmem (%p1281_p5), %s1501_s0, %s960_s26  ;;  %s163_s23 = scalar_lea.vmem (%p1281_p5), [#allocation3], %s904_s27 }
  0x22   : > { %v199_v0 = vld [vmem:[%s169_s5] sm:$0xff] (%p1281_p5)  ;;  %v201_v1 = vld [vmem:[%s169_s5 + $0x18] sm:$0xff] (%p1281_p5) }
  0x23   : > { %200 = vst [vmem:[%s163_s23] sm:$0xff] (%p1281_p5), %v199_v0  ;;  %202 = vst [vmem:[%s163_s23 + $0x8] sm:$0xff] (%p1281_p5), %v201_v1 }
  0x26 PF: > { %208 = sbr.rel (!%p1295_p9) target bundleno = 62 (0x3e), region = 58  ;;  %s210_s28 = sand.u32 (%p1295_p9), 1, %s1163_s15  }
  0x27   : > { %s909_s7 = sshll.u32 (%p1295_p9), %s1187_s21, 1  ;;  %s907_s25 = sshll.u32 (%p1295_p9), %s210_s28, 8 }
  0x28   : > { %s964_s11 = smul.u32 (%p1295_p9), 192, %s1183_s20  ;;  %s1333_s6 = scalar_lea.vmem (%p1295_p9), [#allocation4], %s907_s25 }
  0x2a   : > { %s216_s24 = sadd.s32 (%p1295_p9), %s964_s11, %s909_s7 }
  0x2b   : > { %s911_s30 = sshll.u32 (%p1295_p9), %s216_s24, 2 }
  0x2c   : > { %s1328_s4 = scalar_lea.vmem (%p1295_p9), %s1502_s1, %s911_s30 }
  0x2d   : > { %v308_v2 = vld [vmem:[%s1328_s4] sm:$0xff]  ;;  %v310_v3 = vld [vmem:[%s1328_s4 + $0x18] sm:$0xff]  ;;  %v312_v4 = vld [vmem:[%s1328_s4 + $0x30] sm:$0xff] }
  0x2e   : > { %309 = vst [vmem:[%s1333_s6] sm:$0xff] %v308_v2  ;;  %311 = vst [vmem:[%s1333_s6 + $0x8] sm:$0xff] %v310_v3  ;;  %v314_v5 = vld [vmem:[%s1328_s4 + $0x48] sm:$0xff]  ;;  %v316_v6 = vld [vmem:[%s1328_s4 + $0x60] sm:$0xff] }
  0x2f   : > { %313 = vst [vmem:[%s1333_s6 + $0x10] sm:$0xff] %v312_v4  ;;  %v318_v7 = vld [vmem:[%s1328_s4 + $0x78] sm:$0xff]  ;;  %315 = vst [vmem:[%s1333_s6 + $0x18] sm:$0xff] %v314_v5  ;;  %v320_v8 = vld [vmem:[%s1328_s4 + $0x90] sm:$0xff] }
  0x30   : > { %317 = vst [vmem:[%s1333_s6 + $0x20] sm:$0xff] %v316_v6  ;;  %319 = vst [vmem:[%s1333_s6 + $0x28] sm:$0xff] %v318_v7  ;;  %v322_v9 = vld [vmem:[%s1328_s4 + $0xa8] sm:$0xff]  ;;  %v324_v10 = vld [vmem:[%s1328_s4 + $0xc0] sm:$0xff] }
  0x31   : > { %321 = vst [vmem:[%s1333_s6 + $0x30] sm:$0xff] %v320_v8  ;;  %323 = vst [vmem:[%s1333_s6 + $0x38] sm:$0xff] %v322_v9  ;;  %v326_v11 = vld [vmem:[%s1328_s4 + $0xd8] sm:$0xff]  ;;  %v328_v12 = vld [vmem:[%s1328_s4 + $0xf0] sm:$0xff] }
  0x32   : > { %325 = vst [vmem:[%s1333_s6 + $0x40] sm:$0xff] %v324_v10  ;;  %v330_v13 = vld [vmem:[%s1328_s4 + $0x108] sm:$0xff]  ;;  %327 = vst [vmem:[%s1333_s6 + $0x48] sm:$0xff] %v326_v11  ;;  %v332_v14 = vld [vmem:[%s1328_s4 + $0x120] sm:$0xff] }
  0x33   : > { %329 = vst [vmem:[%s1333_s6 + $0x50] sm:$0xff] %v328_v12  ;;  %331 = vst [vmem:[%s1333_s6 + $0x58] sm:$0xff] %v330_v13  ;;  %v334_v15 = vld [vmem:[%s1328_s4 + $0x138] sm:$0xff]  ;;  %v336_v16 = vld [vmem:[%s1328_s4 + $0x150] sm:$0xff] }
  0x34   : > { %333 = vst [vmem:[%s1333_s6 + $0x60] sm:$0xff] %v332_v14  ;;  %335 = vst [vmem:[%s1333_s6 + $0x68] sm:$0xff] %v334_v15  ;;  %v338_v17 = vld [vmem:[%s1328_s4 + $0x168] sm:$0xff]  ;;  %v340_v18 = vld [vmem:[%s1328_s4 + $0x180] sm:$0xff] }
  0x35   : > { %337 = vst [vmem:[%s1333_s6 + $0x70] sm:$0xff] %v336_v16  ;;  %v342_v19 = vld [vmem:[%s1328_s4 + $0x198] sm:$0xff]  ;;  %339 = vst [vmem:[%s1333_s6 + $0x78] sm:$0xff] %v338_v17  ;;  %v344_v20 = vld [vmem:[%s1328_s4 + $0x1b0] sm:$0xff] }
  0x36   : > { %341 = vst [vmem:[%s1333_s6 + $0x80] sm:$0xff] %v340_v18  ;;  %343 = vst [vmem:[%s1333_s6 + $0x88] sm:$0xff] %v342_v19  ;;  %v346_v21 = vld [vmem:[%s1328_s4 + $0x1c8] sm:$0xff]  ;;  %v348_v22 = vld [vmem:[%s1328_s4 + $0x1e0] sm:$0xff] }
  0x37   : > { %345 = vst [vmem:[%s1333_s6 + $0x90] sm:$0xff] %v344_v20  ;;  %347 = vst [vmem:[%s1333_s6 + $0x98] sm:$0xff] %v346_v21  ;;  %v350_v23 = vld [vmem:[%s1328_s4 + $0x1f8] sm:$0xff]  ;;  %v352_v24 = vld [vmem:[%s1328_s4 + $0x210] sm:$0xff] }
  0x38   : > { %349 = vst [vmem:[%s1333_s6 + $0xa0] sm:$0xff] %v348_v22  ;;  %v354_v25 = vld [vmem:[%s1328_s4 + $0x228] sm:$0xff]  ;;  %351 = vst [vmem:[%s1333_s6 + $0xa8] sm:$0xff] %v350_v23  ;;  %v356_v26 = vld [vmem:[%s1328_s4 + $0x240] sm:$0xff] }
  0x39   : > { %353 = vst [vmem:[%s1333_s6 + $0xb0] sm:$0xff] %v352_v24  ;;  %355 = vst [vmem:[%s1333_s6 + $0xb8] sm:$0xff] %v354_v25  ;;  %v358_v27 = vld [vmem:[%s1328_s4 + $0x258] sm:$0xff]  ;;  %v360_v28 = vld [vmem:[%s1328_s4 + $0x270] sm:$0xff] }
  0x3a   : > { %357 = vst [vmem:[%s1333_s6 + $0xc0] sm:$0xff] %v356_v26  ;;  %359 = vst [vmem:[%s1333_s6 + $0xc8] sm:$0xff] %v358_v27  ;;  %v362_v29 = vld [vmem:[%s1328_s4 + $0x288] sm:$0xff]  ;;  %v364_v30 = vld [vmem:[%s1328_s4 + $0x2a0] sm:$0xff] }
  0x3b   : > { %361 = vst [vmem:[%s1333_s6 + $0xd0] sm:$0xff] %v360_v28  ;;  %v366_v31 = vld [vmem:[%s1328_s4 + $0x2b8] sm:$0xff]  ;;  %363 = vst [vmem:[%s1333_s6 + $0xd8] sm:$0xff] %v362_v29  ;;  %v368_v32 = vld [vmem:[%s1328_s4 + $0x2d0] sm:$0xff] }
  0x3c   : > { %365 = vst [vmem:[%s1333_s6 + $0xe0] sm:$0xff] %v364_v30  ;;  %367 = vst [vmem:[%s1333_s6 + $0xe8] sm:$0xff] %v366_v31  ;;  %v370_v33 = vld [vmem:[%s1328_s4 + $0x2e8] sm:$0xff] }
  0x3d   : > { %369 = vst [vmem:[%s1333_s6 + $0xf0] sm:$0xff] %v368_v32  ;;  %371 = vst [vmem:[%s1333_s6 + $0xf8] sm:$0xff] %v370_v33 }
  0x3e PF: > { %p912_p0 = scmp.ge.s32.totalorder %s1191_s22, 1  ;;  %p384_p1 = scmp.lt.s32.totalorder %s1191_s22, 10 }
  0x40   : > { %p385_p2 = pnand %p912_p0, %p384_p1 }
  0x41   : > { %s391_s24 = sand.u32 (!%p385_p2), 1, %s1167_s16   ;;  %s398_s25 = sand.u32 (!%p385_p2), 1, %s1159_s14  }
  0x42   : > { %388 = sbr.rel (%p385_p2) target bundleno = 383 (0x17f), region = 100  ;;  %s1400_s30 = sshll.u32 (!%p385_p2), %s391_s24, 4 }
  0x43   : > { %s914_s27 = sshll.u32 (!%p385_p2), %s398_s25, 8  ;;  %s425_s5 = sand.u32 (!%p385_p2), 1, %s1151_s12  }
  0x44   : > { %s916_s23 = sshll.u32 (!%p385_p2), %s1179_s19, 1  ;;  %s915_s28 = sshll.u32 (!%p385_p2), %s425_s5, 4 }
  0x45   : > { %p433_p3 = scmp.lt.s32.totalorder (!%p385_p2), %s916_s23, 5  ;;  %s393_s26 = scalar_lea.vmem (!%p385_p2), [#allocation3], %s1400_s30 }
  0x46   : > { %s1411_s4 = scalar_lea.vmem (!%p385_p2), [#allocation4], %s914_s27  ;;  %s1413_s16 = scalar_lea.vmem (!%p385_p2), [#allocation5], %s915_s28 }
  0x47   : > { %p917_p4 = scmp.ne.s32.totalorder (!%p385_p2), %s1175_s18, 0 }
  0x49   : > { %s1533_s23 = smov (!%p433_p3, %s916_s23), 5  ;;  %442 = sbr.rel (%p917_p4) target bundleno = 80 (0x50), region = 112 }
  0x4a   : > { %s435_s29 = scalar_lea.vmem %s1503_s2, %s1533_s23  ;;  %v1193_v34 = vmov (!%p917_p4), 0.0  }
  0x4b   : > { %443 = vst [vmem:[#allocation2] sm:$0xff] (!%p917_p4), %v1193_v34  ;;  %444 = vst [vmem:[#allocation2 + $0x8] sm:$0xff] (!%p917_p4), %v1193_v34 }
  0x4c   : > { %445 = vst [vmem:[#allocation2 + $0x10] sm:$0xff] (!%p917_p4), %v1193_v34  ;;  %446 = vst [vmem:[#allocation2 + $0x18] sm:$0xff] (!%p917_p4), %v1193_v34 }
  0x50 PF: > { %v1054_v35 = vld [vmem:[%s1411_s4 + $0x4] ss:$8 sps:$4 sm:$0xff]   ;;  %v1056_v36 = vld [vmem:[%s1411_s4] ss:$8 sps:$4 sm:$0xff]   ;;  %v1057_v37 = vld [vmem:[%s1411_s4 + $0x14] ss:$8 sps:$4 sm:$0xff]  }
  0x51   : > { %655 = vmatprep.subr.bf16.mxu0 %v1054_v35  ;;  %v1059_v38 = vld [vmem:[%s1411_s4 + $0x10] ss:$8 sps:$4 sm:$0xff]   ;;  %v1060_v39 = vld [vmem:[%s1411_s4 + $0x24] ss:$8 sps:$4 sm:$0xff]   ;;  %v1062_v40 = vld [vmem:[%s1411_s4 + $0x20] ss:$8 sps:$4 sm:$0xff]  }
  0x52   : > { %656 = vmatpush1.bf16.msra.mxu0 %v1056_v36  ;;  %v1063_v41 = vld [vmem:[%s1411_s4 + $0x34] ss:$8 sps:$4 sm:$0xff]   ;;  %v1065_v42 = vld [vmem:[%s1411_s4 + $0x30] ss:$8 sps:$4 sm:$0xff]   ;;  %v1066_v43 = vld [vmem:[%s1411_s4 + $0x44] ss:$8 sps:$4 sm:$0xff]  }
  0x53   : > { %657 = vmatprep.subr.bf16.mxu0 %v1057_v37  ;;  %v1068_v44 = vld [vmem:[%s1411_s4 + $0x40] ss:$8 sps:$4 sm:$0xff]   ;;  %v1069_v45 = vld [vmem:[%s1411_s4 + $0x54] ss:$8 sps:$4 sm:$0xff]   ;;  %v1071_v46 = vld [vmem:[%s1411_s4 + $0x50] ss:$8 sps:$4 sm:$0xff]  }
  0x54   : > { %v1072_v47 = vld [vmem:[%s1411_s4 + $0x64] ss:$8 sps:$4 sm:$0xff]   ;;  %v1074_v49 = vld [vmem:[%s1411_s4 + $0x60] ss:$8 sps:$4 sm:$0xff]   ;;  %v1075_v50 = vld [vmem:[%s1411_s4 + $0x74] ss:$8 sps:$4 sm:$0xff]  }
  0x55   : > { %v1104_v48 = vld [vmem:[%s393_s26 + $0x4] ss:$8 sps:$4 sm:$0xff]   ;;  %v1077_v51 = vld [vmem:[%s1411_s4 + $0x70] ss:$8 sps:$4 sm:$0xff]   ;;  %v1080_v53 = vld [vmem:[%s1411_s4 + $0x80] ss:$8 sps:$4 sm:$0xff]  }
  0x56   : > { %658 = vmatpush1.bf16.msra.mxu0 %v1059_v38  ;;  %687 = vmatprep.mubr.bf16.mxu0 %v1104_v48  ;;  %v1078_v52 = vld [vmem:[%s1411_s4 + $0x84] ss:$8 sps:$4 sm:$0xff]   ;;  %v1081_v54 = vld [vmem:[%s1411_s4 + $0x94] ss:$8 sps:$4 sm:$0xff]   ;;  %v1083_v55 = vld [vmem:[%s1411_s4 + $0x90] ss:$8 sps:$4 sm:$0xff]  }
  0x57   : > { %659 = vmatprep.subr.bf16.mxu0 %v1060_v39  ;;  %v1084_v56 = vld [vmem:[%s1411_s4 + $0xa4] ss:$8 sps:$4 sm:$0xff]   ;;  %v1086_v57 = vld [vmem:[%s1411_s4 + $0xa0] ss:$8 sps:$4 sm:$0xff]   ;;  %v1087_v58 = vld [vmem:[%s1411_s4 + $0xb4] ss:$8 sps:$4 sm:$0xff]  }
  0x58   : > { %v1089_v59 = vld [vmem:[%s1411_s4 + $0xb0] ss:$8 sps:$4 sm:$0xff]   ;;  %v1090_v60 = vld [vmem:[%s1411_s4 + $0xc4] ss:$8 sps:$4 sm:$0xff]   ;;  %v1092_v61 = vld [vmem:[%s1411_s4 + $0xc0] ss:$8 sps:$4 sm:$0xff]  }
  0x59   : > { %v1093_v62 = vld [vmem:[%s1411_s4 + $0xd4] ss:$8 sps:$4 sm:$0xff]   ;;  %v1095_v63 = vld [vmem:[%s1411_s4 + $0xd0] ss:$8 sps:$4 sm:$0xff]   ;;  %v1096_v0 = vld [vmem:[%s1411_s4 + $0xe4] ss:$8 sps:$4 sm:$0xff]  }
  0x5a   : > { %660 = vmatpush1.bf16.msra.mxu0 %v1062_v40  ;;  %v1098_v1 = vld [vmem:[%s1411_s4 + $0xe0] ss:$8 sps:$4 sm:$0xff]   ;;  %v1099_v2 = vld [vmem:[%s1411_s4 + $0xf4] ss:$8 sps:$4 sm:$0xff]   ;;  %v1101_v3 = vld [vmem:[%s1411_s4 + $0xf0] ss:$8 sps:$4 sm:$0xff]  }
  0x5b   : > { %661 = vmatprep.subr.bf16.mxu0 %v1063_v41  ;;  %v1102_v4 = vld [vmem:[%s393_s26] ss:$8 sps:$4 sm:$0xff]   ;;  %p952_p5 = scmp.ne.s32.totalorder %s1175_s18, 2 }
  0x5c   : > { %v447_v5 = vld [vmem:[#allocation2] sm:$0xff]  ;;  %v448_v6 = vld [vmem:[#allocation2 + $0x8] sm:$0xff]  ;;  %v449_v8 = vld [vmem:[#allocation2 + $0x10] sm:$0xff]  ;;  %v716_v17 = vlaneseq (!%p952_p5) }
  0x5d   : > { %v450_v11 = vld [vmem:[#allocation2 + $0x18] sm:$0xff]  ;;  %v714_v19 = vld [vmem:[%s435_s29] sm:$0x3] (!%p952_p5) }
  0x5e   : > { %662 = vmatpush1.bf16.msra.mxu0 %v1065_v42  ;;  %v717_v18 = vshrl.u32 (!%p952_p5), %v716_v17, 7 }
  0x5f   : > { %663 = vmatprep.subr.bf16.mxu0 %v1066_v43 }
  0x60   : > { %v718_v21 = vsub.s32 (!%p952_p5), 0, %v717_v18  ;;  %v722_v22 = vsub.s32 (!%p952_p5), 1, %v717_v18 }
  0x62   : > { %664 = vmatpush1.bf16.msra.mxu0 %v1068_v44  ;;  %v719_v26 = vrot.slane (!%p952_p5), %v714_v19, %v718_v21  ;;  %v723_v27 = vrot.slane (!%p952_p5), %v714_v19, %v722_v22 }
  0x63   : > { %665 = vmatprep.subr.bf16.mxu0 %v1069_v45 }
  0x66   : > { %666 = vmatpush1.bf16.msra.mxu0 %v1071_v46 }
  0x67   : > { %667 = vmatprep.subr.bf16.mxu0 %v1072_v47 }
  0x6a   : > { %668 = vmatpush1.bf16.msra.mxu0 %v1074_v49 }
  0x6b   : > { %669 = vmatprep.subr.bf16.mxu0 %v1075_v50 }
  0x6e   : > { %670 = vmatpush1.bf16.msra.mxu0 %v1077_v51 }
  0x6f   : > { %671 = vmatprep.subr.bf16.mxu0 %v1078_v52 }
  0x72   : > { %672 = vmatpush1.bf16.msra.mxu0 %v1080_v53 }
  0x73   : > { %673 = vmatprep.subr.bf16.mxu0 %v1081_v54 }
  0x76   : > { %674 = vmatpush1.bf16.msra.mxu0 %v1083_v55 }
  0x77   : > { %675 = vmatprep.subr.bf16.mxu0 %v1084_v56 }
  0x7a   : > { %676 = vmatpush1.bf16.msra.mxu0 %v1086_v57 }
  0x7b   : > { %677 = vmatprep.subr.bf16.mxu0 %v1087_v58 }
  0x7e   : > { %678 = vmatpush1.bf16.msra.mxu0 %v1089_v59 }
  0x7f   : > { %679 = vmatprep.subr.bf16.mxu0 %v1090_v60 }
  0x82   : > { %680 = vmatpush1.bf16.msra.mxu0 %v1092_v61 }
  0x83   : > { %681 = vmatprep.subr.bf16.mxu0 %v1093_v62 }
  0x86   : > { %682 = vmatpush1.bf16.msra.mxu0 %v1095_v63 }
  0x87   : > { %683 = vmatprep.subr.bf16.mxu0 %v1096_v0 }
  0x8a   : > { %684 = vmatpush1.bf16.msra.mxu0 %v1098_v1 }
  0x8b   : > { %685 = vmatprep.subr.bf16.mxu0 %v1099_v2 }
  0x8e   : > { %686 = vmatpush1.bf16.msra.mxu0 %v1101_v3 }
  0x91   : > { %688 = vmatmul.mubr.bf16.vlgmr.msra.gmra.mrb[0].mxu0 %v1102_v4 }
 0x164   : > { %v689_v7 = vpop.f32.mrb[0].mxu0  ;;  %709 = sbr.rel (%p952_p5) target bundleno = 375 (0x177), region = 116 }
 0x165   : > { %v698_v9 = vadd.f32 %v689_v7, %v447_v5  ;;  %v691_v10 = vpop.f32.mrb[1].mxu0 }
 0x166   : > { %v699_v12 = vadd.f32 %v691_v10, %v448_v6  ;;  %v693_v13 = vpop.f32.mrb[2].mxu0 }
 0x167   : > { %702 = vst [vmem:[#allocation2] sm:$0xff] %v698_v9  ;;  %v700_v14 = vadd.f32 %v693_v13, %v449_v8  ;;  %v695_v15 = vpop.f32.mrb[3].mxu0 }
 0x168   : > { %703 = vst [vmem:[#allocation2 + $0x8] sm:$0xff] %v699_v12  ;;  %v701_v16 = vadd.f32 %v695_v15, %v450_v11 }
 0x169   : > { %704 = vst [vmem:[#allocation2 + $0x10] sm:$0xff] %v700_v14 }
 0x16a   : > { %705 = vst [vmem:[#allocation2 + $0x18] sm:$0xff] %v701_v16 }
 0x16e   : > { %v710_v20 = vld [vmem:[#allocation2] sm:$0xff] }
 0x16f   : > { %v711_v23 = vld [vmem:[#allocation2 + $0x8] sm:$0xff]  ;;  %v726_v28 = vadd.f32 %v719_v26, %v710_v20 }
 0x170   : > { %v712_v24 = vld [vmem:[#allocation2 + $0x10] sm:$0xff]  ;;  %v727_v29 = vadd.f32 %v723_v27, %v711_v23 }
 0x171   : > { %v713_v25 = vld [vmem:[#allocation2 + $0x18] sm:$0xff]  ;;  %v728_v30 = vadd.f32 %v719_v26, %v712_v24 }
 0x172   : > { %v729_v31 = vadd.f32 %v723_v27, %v713_v25  ;;  %v961_v32 = vpack.c.bf16 %v727_v29, %v726_v28 }
 0x174   : > { %v962_v33 = vpack.c.bf16 %v729_v31, %v728_v30  ;;  %742 = vst [vmem:[%s1413_s16] sm:$0xff] %v961_v32 }
 0x176   : > { %743 = vst [vmem:[%s1413_s16 + $0x8] sm:$0xff] %v962_v33 }
 0x177 PF: > { %750 = sbr.rel (!%p1308_p12) target bundleno = 383 (0x17f), region = 120  ;;  %s963_s18 = sshll.u32 (%p1308_p12), %s1179_s19, 3 }
 0x178   : > { %s756_s25 = scalar_lea.vmem (%p1308_p12), %s1504_s3, %s963_s18 }
 0x17b   : > { %v786_v34 = vld [vmem:[%s1413_s16] sm:$0xff] (%p1308_p12) }
 0x17c   : > { %787 = vst [vmem:[%s756_s25] sm:$0xff] (%p1308_p12), %v786_v34 }
 0x17d   : > { %v788_v35 = vld [vmem:[%s1413_s16 + $0x8] sm:$0xff] (%p1308_p12) }
 0x17e   : > { %789 = vst [vmem:[%s756_s25 + $0x18] sm:$0xff] %v788_v35 }
 0x17f PF: > { %s13_s22 = sadd.s32 1, %s1191_s22   ;;  %s1513_s10 = sld [smem:[#allocation8_spill]] }
 0x180   : > { %p10_p6 = scmp.ge.s32.totalorder %s13_s22, 11   ;;  %s1514_s30 = sld [smem:[#allocation6_spill]] }
 0x181   : > { %s1515_s27 = sld [smem:[#allocation7_spill]]  ;;  %s1516_s12 = smov %s1155_s13 }
 0x182   : > { %s1517_s13 = smov %s1306_s9  ;;  %s1518_s14 = smov %s1163_s15 }
 0x183   : > { %s1519_s15 = smov %s1303_s8  ;;  %s1520_s16 = smov %s1171_s17 }
 0x184   : > { %s1522_s18 = smov %s1183_s20  ;;  %s1523_s19 = smov %s1187_s21 }
 0x185   : > { %s1521_s17 = smov %s1513_s10  ;;  %12 = sbr.rel (!%p10_p6) target bundleno = 6 (0x6), region = 200 }
 0x186   : > { %s1524_s20 = smov %s1514_s30 }
 0x187   : > { %s1525_s21 = smov %s1515_s27 }

// kernel: longformer_forward.21
= control target key start
LH: loop header
LB: loop body
LE: loop exit
PB: predicated region body
PF: predicated region fallthrough
CT: control target
= control target key end

     0   :  { %s428_s0 = inlined_call_operand.vmem [shape: bf16[16,768], index: 0, kind: input, shape index: {}]   ;;  %s429_s1 = inlined_call_operand.vmem [shape: bf16[16,768], index: 1, kind: input, shape index: {}]   ;;  %s430_s2 = inlined_call_operand.vmem [shape: f32[1,768], index: 2, kind: input, shape index: {}]   ;;  %s431_s3 = inlined_call_operand.vmem [shape: f32[1,768], index: 3, kind: input, shape index: {}]   ;;  %s432_s4 = inlined_call_operand.vmem [shape: bf16[16,768], index: 4, kind: output, shape index: {}]  }
   0x1   :  { %v17_v0 = vld [vmem:[%s428_s0] sm:$0xff]  ;;  %v18_v1 = vld [vmem:[%s428_s0 + $0x8] sm:$0xff]  ;;  %v19_v2 = vld [vmem:[%s428_s0 + $0x10] sm:$0xff] }
   0x2   :  { %v23_v3 = vunpack.c.l.bf16 %v17_v0  ;;  %v24_v4 = vunpack.c.h.bf16 %v17_v0  ;;  %v25_v5 = vunpack.c.l.bf16 %v18_v1  ;;  %v35_v6 = vld [vmem:[%s429_s1] sm:$0xff]  ;;  %v36_v7 = vld [vmem:[%s429_s1 + $0x8] sm:$0xff]  ;;  %v37_v8 = vld [vmem:[%s429_s1 + $0x10] sm:$0xff]  ;;  %v26_v9 = vunpack.c.h.bf16 %v18_v1 }
   0x3   :  { %v41_v10 = vunpack.c.l.bf16 %v35_v6  ;;  %v42_v11 = vunpack.c.h.bf16 %v35_v6  ;;  %v20_v12 = vld [vmem:[%s428_s0 + $0x18] sm:$0xff]  ;;  %v43_v13 = vunpack.c.l.bf16 %v36_v7  ;;  %v44_v14 = vunpack.c.h.bf16 %v36_v7  ;;  %v21_v15 = vld [vmem:[%s428_s0 + $0x20] sm:$0xff]  ;;  %v22_v24 = vld [vmem:[%s428_s0 + $0x28] sm:$0xff] }
   0x4   :  { %v27_v16 = vunpack.c.l.bf16 %v19_v2  ;;  %v45_v17 = vunpack.c.l.bf16 %v37_v8  ;;  %v38_v20 = vld [vmem:[%s429_s1 + $0x18] sm:$0xff]  ;;  %v39_v21 = vld [vmem:[%s429_s1 + $0x20] sm:$0xff]  ;;  %v28_v22 = vunpack.c.h.bf16 %v19_v2  ;;  %v29_v25 = vunpack.c.l.bf16 %v20_v12  ;;  %v40_v31 = vld [vmem:[%s429_s1 + $0x28] sm:$0xff] }
   0x5   :  { %v53_v18 = vadd.f32 %v41_v10, %v23_v3  ;;  %v54_v19 = vadd.f32 %v42_v11, %v24_v4  ;;  %v55_v23 = vadd.f32 %v43_v13, %v25_v5  ;;  %v30_v26 = vunpack.c.h.bf16 %v20_v12 }
   0x6   :  { %v46_v27 = vunpack.c.h.bf16 %v37_v8  ;;  %v56_v28 = vadd.f32 %v44_v14, %v26_v9  ;;  %v31_v30 = vunpack.c.l.bf16 %v21_v15  ;;  %v32_v32 = vunpack.c.h.bf16 %v21_v15 }
   0x7   :  { %v67_v29 = vadd.f32 %v54_v19, %v53_v18  ;;  %v47_v33 = vunpack.c.l.bf16 %v38_v20  ;;  %v48_v34 = vunpack.c.h.bf16 %v38_v20  ;;  %v49_v35 = vunpack.c.l.bf16 %v39_v21 }
   0x8   :  { %v57_v36 = vadd.f32 %v45_v17, %v27_v16  ;;  %v33_v38 = vunpack.c.l.bf16 %v22_v24  ;;  %v50_v39 = vunpack.c.h.bf16 %v39_v21  ;;  %v51_v40 = vunpack.c.l.bf16 %v40_v31 }
   0x9   :  { %v68_v37 = vadd.f32 %v67_v29, %v55_v23  ;;  %v59_v41 = vadd.f32 %v47_v33, %v29_v25  ;;  %v60_v42 = vadd.f32 %v48_v34, %v30_v26  ;;  %v61_v43 = vadd.f32 %v49_v35, %v31_v30 }
   0xa   :  { %v58_v44 = vadd.f32 %v46_v27, %v28_v22  ;;  %v34_v46 = vunpack.c.h.bf16 %v22_v24  ;;  %v52_v47 = vunpack.c.h.bf16 %v40_v31  ;;  %v62_v48 = vadd.f32 %v50_v39, %v32_v32 }
   0xb   :  { %v69_v45 = vadd.f32 %v68_v37, %v56_v28  ;;  %v74_v49 = vadd.f32 %v60_v42, %v59_v41  ;;  %v63_v51 = vadd.f32 %v51_v40, %v33_v38  ;;  %v141_v33 = vlaneseq }
   0xc   :  { %v64_v54 = vadd.f32 %v52_v47, %v34_v46  ;;  %v66_v47 = vld [vmem:[%s431_s3] sm:$0x3f] }
   0xd   :  { %v70_v50 = vadd.f32 %v69_v45, %v57_v36  ;;  %v75_v52 = vadd.f32 %v74_v49, %v61_v43 }
   0xf   :  { %v71_v53 = vadd.f32 %v70_v50, %v58_v44  ;;  %v76_v55 = vadd.f32 %v75_v52, %v62_v48 }
  0x11   :  { %72 = vadd.xlane.f32.xlu0 %v71_v53  ;;  %v77_v56 = vadd.f32 %v76_v55, %v63_v51 }
  0x13   :  { %v78_v57 = vadd.f32 %v77_v56, %v64_v54 }
  0x15   :  { %79 = vadd.xlane.f32.xlu0 %v78_v57 }
  0x9e   :  { %v73_v58 = vpop.xlane.xlu0 %72 }
  0x9f   :  { %v82_v59 = vmul.f32 0.0013020834, %v73_v58 }
  0xa1   :  { %v349_v60 = vsub.f32 %v53_v18, %v82_v59  ;;  %v351_v61 = vsub.f32 %v54_v19, %v82_v59  ;;  %v353_v62 = vsub.f32 %v55_v23, %v82_v59  ;;  %v355_v0 = vsub.f32 %v56_v28, %v82_v59 }
  0xa2   :  { %v80_v63 = vpop.xlane.xlu0 %79  ;;  %v361_v4 = vsub.f32 %v57_v36, %v82_v59  ;;  %v89_v10 = vsub.f32 %v58_v44, %v82_v59  ;;  %v142_v36 = vshrl.u32 %v141_v33, 7 }
  0xa3   :  { %v96_v1 = vmul.f32 %v349_v60, %v349_v60  ;;  %v97_v2 = vmul.f32 %v351_v61, %v351_v61  ;;  %v83_v3 = vmul.f32 0.0013020834, %v80_v63  ;;  %v98_v5 = vmul.f32 %v353_v62, %v353_v62 }
  0xa4   :  { %v99_v11 = vmul.f32 %v355_v0, %v355_v0  ;;  %v100_v16 = vmul.f32 %v361_v4, %v361_v4  ;;  %v101_v21 = vmul.f32 %v89_v10, %v89_v10  ;;  %v143_v40 = vsub.s32 0, %v142_v36 }
  0xa5   :  { %v108_v6 = vadd.f32 %v97_v2, %v96_v1  ;;  %v365_v7 = vsub.f32 %v59_v41, %v83_v3  ;;  %v367_v8 = vsub.f32 %v60_v42, %v83_v3  ;;  %v369_v9 = vsub.f32 %v61_v43, %v83_v3  ;;  %v65_v43 = vld [vmem:[%s430_s2] sm:$0x3f] }
  0xa6   :  { %v373_v13 = vsub.f32 %v62_v48, %v83_v3  ;;  %v381_v18 = vsub.f32 %v63_v51, %v83_v3  ;;  %v385_v23 = vsub.f32 %v64_v54, %v83_v3  ;;  %v147_v41 = vsub.s32 1, %v142_v36 }
  0xa7   :  { %v109_v12 = vadd.f32 %v108_v6, %v98_v5  ;;  %v102_v14 = vmul.f32 %v365_v7, %v365_v7  ;;  %v103_v15 = vmul.f32 %v367_v8, %v367_v8  ;;  %v104_v19 = vmul.f32 %v369_v9, %v369_v9 }
  0xa8   :  { %v105_v24 = vmul.f32 %v373_v13, %v373_v13  ;;  %v106_v27 = vmul.f32 %v381_v18, %v381_v18  ;;  %v107_v29 = vmul.f32 %v385_v23, %v385_v23  ;;  %v151_v42 = vsub.s32 2, %v142_v36 }
  0xa9   :  { %v110_v17 = vadd.f32 %v109_v12, %v99_v11  ;;  %v115_v20 = vadd.f32 %v103_v15, %v102_v14  ;;  %v155_v44 = vsub.s32 3, %v142_v36  ;;  %v159_v45 = vsub.s32 4, %v142_v36 }
  0xaa   :  { %v163_v46 = vsub.s32 5, %v142_v36  ;;  %v144_v48 = vrot.slane %v65_v43, %v143_v40  ;;  %v148_v49 = vrot.slane %v65_v43, %v147_v41  ;;  %v152_v50 = vrot.slane %v65_v43, %v151_v42 }
  0xab   :  { %v111_v22 = vadd.f32 %v110_v17, %v100_v16  ;;  %v116_v25 = vadd.f32 %v115_v20, %v104_v19  ;;  %v156_v51 = vrot.slane %v65_v43, %v155_v44  ;;  %v160_v52 = vrot.slane %v65_v43, %v159_v45 }
  0xac   :  { %v164_v53 = vrot.slane %v65_v43, %v163_v46  ;;  %v187_v55 = vrot.slane %v66_v47, %v143_v40  ;;  %v191_v56 = vrot.slane %v66_v47, %v147_v41  ;;  %v195_v57 = vrot.slane %v66_v47, %v151_v42 }
  0xad   :  { %v112_v26 = vadd.f32 %v111_v22, %v101_v21  ;;  %v117_v28 = vadd.f32 %v116_v25, %v105_v24  ;;  %v199_v58 = vrot.slane %v66_v47, %v155_v44  ;;  %v203_v3 = vrot.slane %v66_v47, %v159_v45 }
  0xae   :  { %v207_v5 = vrot.slane %v66_v47, %v163_v46 }
  0xaf   :  { %113 = vadd.xlane.f32.xlu1 %v112_v26  ;;  %v118_v30 = vadd.f32 %v117_v28, %v106_v27 }
  0xb1   :  { %v119_v31 = vadd.f32 %v118_v30, %v107_v29 }
  0xb3   :  { %120 = vadd.xlane.f32.xlu1 %v119_v31 }
 0x13c   :  { %v114_v32 = vpop.xlane.xlu1 %113 }
 0x13d   :  { %v122_v34 = vmul.f32 0.0013020834, %v114_v32 }
 0x13f   :  { %v124_v35 = vadd.f32 1e-05, %v122_v34 }
 0x140   :  { %v121_v37 = vpop.xlane.xlu1 %120 }
 0x141   :  { %284 = vrsqrt.f32 %v124_v35  ;;  %v123_v38 = vmul.f32 0.0013020834, %v121_v37 }
 0x143   :  { %v125_v39 = vadd.f32 1e-05, %v123_v38 }
 0x145   :  { %286 = vrsqrt.f32 %v125_v39 }
 0x14b   :  { %v285_v54 = vpop.eup %284 }
 0x14c   :  { %v128_v59 = vmul.f32 %v285_v54, %v349_v60  ;;  %v129_v63 = vmul.f32 %v285_v54, %v351_v61  ;;  %v130_v1 = vmul.f32 %v285_v54, %v353_v62  ;;  %v131_v2 = vmul.f32 %v285_v54, %v355_v0 }
 0x14d   :  { %v132_v6 = vmul.f32 %v285_v54, %v361_v4  ;;  %v133_v11 = vmul.f32 %v285_v54, %v89_v10 }
 0x14e   :  { %v171_v12 = vmul.f32 %v144_v48, %v128_v59  ;;  %v172_v14 = vmul.f32 %v148_v49, %v129_v63  ;;  %v173_v15 = vmul.f32 %v152_v50, %v130_v1  ;;  %v174_v16 = vmul.f32 %v156_v51, %v131_v2 }
 0x14f   :  { %v175_v17 = vmul.f32 %v160_v52, %v132_v6  ;;  %v176_v19 = vmul.f32 %v164_v53, %v133_v11  ;;  %v287_v20 = vpop.eup %286 }
 0x150   :  { %v214_v21 = vadd.f32 %v187_v55, %v171_v12  ;;  %v215_v60 = vadd.f32 %v191_v56, %v172_v14  ;;  %v216_v22 = vadd.f32 %v195_v57, %v173_v15  ;;  %v217_v61 = vadd.f32 %v199_v58, %v174_v16 }
 0x151   :  { %v218_v24 = vadd.f32 %v203_v3, %v175_v17  ;;  %v219_v62 = vadd.f32 %v207_v5, %v176_v19  ;;  %v134_v0 = vmul.f32 %v287_v20, %v365_v7  ;;  %v135_v25 = vmul.f32 %v287_v20, %v367_v8 }
 0x152   :  { %v278_v26 = vpack.c.bf16 %v215_v60, %v214_v21  ;;  %v279_v4 = vpack.c.bf16 %v217_v61, %v216_v22  ;;  %v136_v10 = vmul.f32 %v287_v20, %v369_v9  ;;  %v137_v27 = vmul.f32 %v287_v20, %v373_v13 }
 0x153   :  { %v280_v28 = vpack.c.bf16 %v219_v62, %v218_v24  ;;  %v138_v29 = vmul.f32 %v287_v20, %v381_v18  ;;  %v139_v30 = vmul.f32 %v287_v20, %v385_v23  ;;  %v177_v31 = vmul.f32 %v144_v48, %v134_v0 }
 0x154   :  { %262 = vst [vmem:[%s432_s4] sm:$0xff] %v278_v26  ;;  %263 = vst [vmem:[%s432_s4 + $0x8] sm:$0xff] %v279_v4  ;;  %v178_v7 = vmul.f32 %v148_v49, %v135_v25  ;;  %v179_v8 = vmul.f32 %v152_v50, %v136_v10  ;;  %v180_v32 = vmul.f32 %v156_v51, %v137_v27 }
 0x155   :  { %264 = vst [vmem:[%s432_s4 + $0x10] sm:$0xff] %v280_v28  ;;  %v181_v9 = vmul.f32 %v160_v52, %v138_v29  ;;  %v182_v13 = vmul.f32 %v164_v53, %v139_v30  ;;  %v220_v18 = vadd.f32 %v187_v55, %v177_v31 }
 0x156   :  { %v221_v23 = vadd.f32 %v191_v56, %v178_v7  ;;  %v222_v33 = vadd.f32 %v195_v57, %v179_v8  ;;  %v223_v34 = vadd.f32 %v199_v58, %v180_v32 }
 0x157   :  { %v224_v35 = vadd.f32 %v203_v3, %v181_v9  ;;  %v225_v36 = vadd.f32 %v207_v5, %v182_v13 }
 0x158   :  { %v281_v37 = vpack.c.bf16 %v221_v23, %v220_v18  ;;  %v282_v38 = vpack.c.bf16 %v223_v34, %v222_v33 }
 0x159   :  { %v283_v39 = vpack.c.bf16 %v225_v36, %v224_v35 }
 0x15a   :  { %265 = vst [vmem:[%s432_s4 + $0x18] sm:$0xff] %v281_v37  ;;  %266 = vst [vmem:[%s432_s4 + $0x20] sm:$0xff] %v282_v38 }
 0x15b   :  { %267 = vst [vmem:[%s432_s4 + $0x28] sm:$0xff] %v283_v39 }

// kernel: longformer_forward.22
= control target key start
LH: loop header
LB: loop body
LE: loop exit
PB: predicated region body
PF: predicated region fallthrough
CT: control target
= control target key end

     0   :  { %s1258_s12 = smov 0   ;;  %s1260_s13 = smov 0   ;;  %s1545_s0 = inlined_call_operand.vmem [shape: bf16[16,768], index: 0, kind: input, shape index: {}]   ;;  %s1546_s1 = inlined_call_operand.vmem [shape: bf16[768,3072], index: 1, kind: input, shape index: {}]   ;;  %s1547_s2 = inlined_call_operand.vmem [shape: f32[1,3072], index: 2, kind: input, shape index: {}]   ;;  %s1548_s3 = inlined_call_operand.vmem [shape: bf16[16,3072], index: 3, kind: output, shape index: {}]  }
   0x1   :  { %s1262_s14 = smov 0   ;;  %s1264_s15 = smov 0  }
   0x2   :  { %s1266_s16 = smov 0   ;;  %s1268_s17 = smov 0  }
   0x3   :  { %s1270_s18 = smov 0   ;;  %s1272_s19 = smov 0  }
   0x4   :  { %s1274_s20 = smov 0   ;;  %s1276_s21 = smov 0  }
   0x5   :  { %s1278_s22 = smov 0  }
   0x6 LB: > { %s936_s23 = sadd.s32 4294967295, %s1235_s22   ;;  %s25_s24 = sadd.s32 1, %s1227_s20  ;;  %s1235_s22 = sphi %s1278_s22, %s13_s22   ;;  %s1231_s21 = sphi %s1276_s21, %s1569_s21   ;;  %s1227_s20 = sphi %s1274_s20, %s1568_s20   ;;  %s1223_s19 = sphi %s1272_s19, %s1567_s19   ;;  %s1219_s18 = sphi %s1270_s18, %s1566_s18   ;;  %s1215_s17 = sphi %s1268_s17, %s1565_s17   ;;  %s1211_s16 = sphi %s1266_s16, %s1564_s16   ;;  %s1207_s15 = sphi %s1264_s15, %s1563_s15   ;;  %s1203_s14 = sphi %s1262_s14, %s1562_s14   ;;  %s1199_s13 = sphi %s1260_s13, %s1561_s13   ;;  %s1195_s12 = sphi %s1258_s12, %s1560_s12  }
   0x7   : > { %p26_p0 = scmp.ge.s32.totalorder %s25_s24, 3  ;;  %s28_s25 = sadd.s32 1, %s1231_s21 }
   0x8   : > { %s41_s26 = sadd.s32 1, %s1215_s17  ;;  %p48_p1 = scmp.ne.s32.totalorder %s1215_s17, %s1211_s16 }
   0x9   : > { %s1571_s24 = smov (%p26_p0, %s25_s24), 0  ;;  %s1573_s25 = smov (!%p26_p0, %s28_s25), %s1231_s21 }
   0xa   : > { %1551 = sst [smem:[#allocation6_spill]] %s1571_s24  ;;  %s37_s27 = ssub.s32 %s1227_s20, %s1571_s24 }
   0xb   : > { %p49_p2 = scmp.eq.s32.totalorder %s1235_s22, 0  ;;  %p30_p3 = scmp.ge.s32.totalorder %s1573_s25, 12 }
   0xc   : > { %p39_p4 = scmp.eq.s32.totalorder %s37_s27, 0  ;;  %s69_s29 = sadd.s32 1, %s1207_s15 }
   0xd   : > { %p1325_p5 = por %p49_p2, %p48_p1  ;;  %s1575_s25 = smov (%p30_p3, %s1573_s25), 0 }
   0xe   : > { %1553 = sst [smem:[#allocation7_spill]] %s1575_s25  ;;  %s65_s4 = ssub.s32 %s1231_s21, %s1575_s25 }
   0xf   : > { %s1333_s30 = scalar_select %p39_p4, %s1215_s17, %s41_s26  }
  0x10   : > { %p76_p6 = scmp.ne.s32.totalorder %s1207_s15, %s1203_s14  ;;  %s66_s5 = sor.u32 %s65_s4, %s37_s27 }
  0x11   : > { %1554 = sst [smem:[#allocation8_spill]] %s1333_s30  ;;  %p121_p7 = scmp.eq.s32.totalorder %s65_s4, 0 }
  0x12   : > { %p67_p8 = scmp.eq.s32.totalorder %s66_s5, 0  ;;  %p1339_p9 = por %p76_p6, %p49_p2 }
  0x13   : > { %s123_s7 = sadd.s32 1, %s1199_s13  ;;  %p133_p10 = scmp.ne.s32.totalorder %s1199_s13, %s1195_s12 }
  0x14   : > { %s1347_s8 = scalar_select %p67_p8, %s1207_s15, %s69_s29  }
  0x15   : > { %s1350_s9 = scalar_select %p121_p7, %s1199_s13, %s123_s7  }
  0x16   : > { %p134_p11 = scmp.eq.s32.totalorder %s936_s23, 35  ;;  %p939_p13 = scmp.ge.s32.totalorder %s1235_s22, 36 }
  0x18   : > { %p1352_p12 = por %p134_p11, %p133_p10  ;;  %156 = sbr.rel (%p939_p13) target bundleno = 78 (0x4e), region = 16 }
  0x1f   : > { %159 = sbr.rel (!%p1325_p5) target bundleno = 38 (0x26), region = 20  ;;  %s161_s11 = sand.u32 (%p1325_p5), 1, %s1215_s17  }
  0x20   : > { %s996_s26 = sshll.u32 (%p1325_p5), %s1227_s20, 3  ;;  %s940_s27 = sshll.u32 (%p1325_p5), %s161_s11, 4 }
  0x21   : > { %s169_s5 = scalar_lea.vmem (%p1325_p5), %s1545_s0, %s996_s26  ;;  %s163_s23 = scalar_lea.vmem (%p1325_p5), [#allocation3], %s940_s27 }
  0x22   : > { %v199_v0 = vld [vmem:[%s169_s5] sm:$0xff] (%p1325_p5)  ;;  %v201_v1 = vld [vmem:[%s169_s5 + $0x18] sm:$0xff] (%p1325_p5) }
  0x23   : > { %200 = vst [vmem:[%s163_s23] sm:$0xff] (%p1325_p5), %v199_v0  ;;  %202 = vst [vmem:[%s163_s23 + $0x8] sm:$0xff] (%p1325_p5), %v201_v1 }
  0x26 PF: > { %208 = sbr.rel (!%p1339_p9) target bundleno = 78 (0x4e), region = 58  ;;  %s210_s28 = sand.u32 (%p1339_p9), 1, %s1207_s15  }
  0x27   : > { %s945_s7 = sshll.u32 (%p1339_p9), %s1231_s21, 1  ;;  %s943_s25 = sshll.u32 (%p1339_p9), %s210_s28, 8 }
  0x28   : > { %s1000_s11 = smul.u32 (%p1339_p9), 768, %s1227_s20  ;;  %s1377_s6 = scalar_lea.vmem (%p1339_p9), [#allocation4], %s943_s25 }
  0x2a   : > { %s216_s24 = sadd.s32 (%p1339_p9), %s1000_s11, %s945_s7 }
  0x2b   : > { %s947_s30 = sshll.u32 (%p1339_p9), %s216_s24, 2 }
  0x2c   : > { %s1372_s4 = scalar_lea.vmem (%p1339_p9), %s1546_s1, %s947_s30 }
  0x2d   : > { %v308_v2 = vld [vmem:[%s1372_s4] sm:$0xff] }
  0x2e   : > { %v310_v3 = vld [vmem:[%s1372_s4 + $0x60] sm:$0xff]  ;;  %309 = vst [vmem:[%s1377_s6] sm:$0xff] %v308_v2 }
  0x2f   : > { %v312_v4 = vld [vmem:[%s1372_s4 + $0xc0] sm:$0xff]  ;;  %311 = vst [vmem:[%s1377_s6 + $0x8] sm:$0xff] %v310_v3 }
  0x30   : > { %313 = vst [vmem:[%s1377_s6 + $0x10] sm:$0xff] %v312_v4  ;;  %v314_v5 = vld [vmem:[%s1372_s4 + $0x120] sm:$0xff] }
  0x31   : > { %v316_v6 = vld [vmem:[%s1372_s4 + $0x180] sm:$0xff]  ;;  %315 = vst [vmem:[%s1377_s6 + $0x18] sm:$0xff] %v314_v5 }
  0x32   : > { %v318_v7 = vld [vmem:[%s1372_s4 + $0x1e0] sm:$0xff]  ;;  %317 = vst [vmem:[%s1377_s6 + $0x20] sm:$0xff] %v316_v6 }
  0x33   : > { %319 = vst [vmem:[%s1377_s6 + $0x28] sm:$0xff] %v318_v7  ;;  %v320_v8 = vld [vmem:[%s1372_s4 + $0x240] sm:$0xff] }
  0x34   : > { %v322_v9 = vld [vmem:[%s1372_s4 + $0x2a0] sm:$0xff]  ;;  %321 = vst [vmem:[%s1377_s6 + $0x30] sm:$0xff] %v320_v8 }
  0x35   : > { %v324_v10 = vld [vmem:[%s1372_s4 + $0x300] sm:$0xff]  ;;  %323 = vst [vmem:[%s1377_s6 + $0x38] sm:$0xff] %v322_v9 }
  0x36   : > { %325 = vst [vmem:[%s1377_s6 + $0x40] sm:$0xff] %v324_v10  ;;  %v326_v11 = vld [vmem:[%s1372_s4 + $0x360] sm:$0xff] }
  0x37   : > { %v328_v12 = vld [vmem:[%s1372_s4 + $0x3c0] sm:$0xff]  ;;  %327 = vst [vmem:[%s1377_s6 + $0x48] sm:$0xff] %v326_v11 }
  0x38   : > { %v330_v13 = vld [vmem:[%s1372_s4 + $0x420] sm:$0xff]  ;;  %329 = vst [vmem:[%s1377_s6 + $0x50] sm:$0xff] %v328_v12 }
  0x39   : > { %331 = vst [vmem:[%s1377_s6 + $0x58] sm:$0xff] %v330_v13  ;;  %v332_v14 = vld [vmem:[%s1372_s4 + $0x480] sm:$0xff] }
  0x3a   : > { %v334_v15 = vld [vmem:[%s1372_s4 + $0x4e0] sm:$0xff]  ;;  %333 = vst [vmem:[%s1377_s6 + $0x60] sm:$0xff] %v332_v14 }
  0x3b   : > { %v336_v16 = vld [vmem:[%s1372_s4 + $0x540] sm:$0xff]  ;;  %335 = vst [vmem:[%s1377_s6 + $0x68] sm:$0xff] %v334_v15 }
  0x3c   : > { %337 = vst [vmem:[%s1377_s6 + $0x70] sm:$0xff] %v336_v16  ;;  %v338_v17 = vld [vmem:[%s1372_s4 + $0x5a0] sm:$0xff] }
  0x3d   : > { %v340_v18 = vld [vmem:[%s1372_s4 + $0x600] sm:$0xff]  ;;  %339 = vst [vmem:[%s1377_s6 + $0x78] sm:$0xff] %v338_v17 }
  0x3e   : > { %v342_v19 = vld [vmem:[%s1372_s4 + $0x660] sm:$0xff]  ;;  %341 = vst [vmem:[%s1377_s6 + $0x80] sm:$0xff] %v340_v18 }
  0x3f   : > { %343 = vst [vmem:[%s1377_s6 + $0x88] sm:$0xff] %v342_v19  ;;  %v344_v20 = vld [vmem:[%s1372_s4 + $0x6c0] sm:$0xff] }
  0x40   : > { %v346_v21 = vld [vmem:[%s1372_s4 + $0x720] sm:$0xff]  ;;  %345 = vst [vmem:[%s1377_s6 + $0x90] sm:$0xff] %v344_v20 }
  0x41   : > { %v348_v22 = vld [vmem:[%s1372_s4 + $0x780] sm:$0xff]  ;;  %347 = vst [vmem:[%s1377_s6 + $0x98] sm:$0xff] %v346_v21 }
  0x42   : > { %349 = vst [vmem:[%s1377_s6 + $0xa0] sm:$0xff] %v348_v22  ;;  %v350_v23 = vld [vmem:[%s1372_s4 + $0x7e0] sm:$0xff] }
  0x43   : > { %v352_v24 = vld [vmem:[%s1372_s4 + $0x840] sm:$0xff]  ;;  %351 = vst [vmem:[%s1377_s6 + $0xa8] sm:$0xff] %v350_v23 }
  0x44   : > { %v354_v25 = vld [vmem:[%s1372_s4 + $0x8a0] sm:$0xff]  ;;  %353 = vst [vmem:[%s1377_s6 + $0xb0] sm:$0xff] %v352_v24 }
  0x45   : > { %355 = vst [vmem:[%s1377_s6 + $0xb8] sm:$0xff] %v354_v25  ;;  %v356_v26 = vld [vmem:[%s1372_s4 + $0x900] sm:$0xff] }
  0x46   : > { %v358_v27 = vld [vmem:[%s1372_s4 + $0x960] sm:$0xff]  ;;  %357 = vst [vmem:[%s1377_s6 + $0xc0] sm:$0xff] %v356_v26 }
  0x47   : > { %v360_v28 = vld [vmem:[%s1372_s4 + $0x9c0] sm:$0xff]  ;;  %359 = vst [vmem:[%s1377_s6 + $0xc8] sm:$0xff] %v358_v27 }
  0x48   : > { %361 = vst [vmem:[%s1377_s6 + $0xd0] sm:$0xff] %v360_v28  ;;  %v362_v29 = vld [vmem:[%s1372_s4 + $0xa20] sm:$0xff] }
  0x49   : > { %v364_v30 = vld [vmem:[%s1372_s4 + $0xa80] sm:$0xff]  ;;  %363 = vst [vmem:[%s1377_s6 + $0xd8] sm:$0xff] %v362_v29 }
  0x4a   : > { %v366_v31 = vld [vmem:[%s1372_s4 + $0xae0] sm:$0xff]  ;;  %365 = vst [vmem:[%s1377_s6 + $0xe0] sm:$0xff] %v364_v30 }
  0x4b   : > { %367 = vst [vmem:[%s1377_s6 + $0xe8] sm:$0xff] %v366_v31  ;;  %v368_v32 = vld [vmem:[%s1372_s4 + $0xb40] sm:$0xff] }
  0x4c   : > { %v370_v33 = vld [vmem:[%s1372_s4 + $0xba0] sm:$0xff]  ;;  %369 = vst [vmem:[%s1377_s6 + $0xf0] sm:$0xff] %v368_v32 }
  0x4d   : > { %371 = vst [vmem:[%s1377_s6 + $0xf8] sm:$0xff] %v370_v33 }
  0x4e PF: > { %p948_p0 = scmp.ge.s32.totalorder %s1235_s22, 1  ;;  %p384_p1 = scmp.lt.s32.totalorder %s1235_s22, 37 }
  0x50   : > { %p385_p2 = pnand %p948_p0, %p384_p1 }
  0x51   : > { %s391_s24 = sand.u32 (!%p385_p2), 1, %s1211_s16   ;;  %s398_s25 = sand.u32 (!%p385_p2), 1, %s1203_s14  }
  0x52   : > { %388 = sbr.rel (%p385_p2) target bundleno = 424 (0x1a8), region = 100  ;;  %s1444_s30 = sshll.u32 (!%p385_p2), %s391_s24, 4 }
  0x53   : > { %s950_s27 = sshll.u32 (!%p385_p2), %s398_s25, 8  ;;  %s425_s5 = sand.u32 (!%p385_p2), 1, %s1195_s12  }
  0x54   : > { %s952_s23 = sshll.u32 (!%p385_p2), %s1223_s19, 1  ;;  %s951_s28 = sshll.u32 (!%p385_p2), %s425_s5, 4 }
  0x55   : > { %p433_p3 = scmp.lt.s32.totalorder (!%p385_p2), %s952_s23, 23  ;;  %s393_s26 = scalar_lea.vmem (!%p385_p2), [#allocation3], %s1444_s30 }
  0x56   : > { %s1455_s4 = scalar_lea.vmem (!%p385_p2), [#allocation4], %s950_s27  ;;  %s1457_s16 = scalar_lea.vmem (!%p385_p2), [#allocation5], %s951_s28 }
  0x57   : > { %p953_p4 = scmp.ne.s32.totalorder (!%p385_p2), %s1219_s18, 0 }
  0x59   : > { %s1577_s23 = smov (!%p433_p3, %s952_s23), 23  ;;  %442 = sbr.rel (%p953_p4) target bundleno = 96 (0x60), region = 112 }
  0x5a   : > { %s435_s29 = scalar_lea.vmem %s1547_s2, %s1577_s23  ;;  %v1237_v34 = vmov (!%p953_p4), 0.0  }
  0x5b   : > { %443 = vst [vmem:[#allocation2] sm:$0xff] (!%p953_p4), %v1237_v34  ;;  %444 = vst [vmem:[#allocation2 + $0x8] sm:$0xff] (!%p953_p4), %v1237_v34 }
  0x5c   : > { %445 = vst [vmem:[#allocation2 + $0x10] sm:$0xff] (!%p953_p4), %v1237_v34  ;;  %446 = vst [vmem:[#allocation2 + $0x18] sm:$0xff] (!%p953_p4), %v1237_v34 }
  0x60 PF: > { %v1090_v35 = vld [vmem:[%s1455_s4 + $0x4] ss:$8 sps:$4 sm:$0xff]   ;;  %v1092_v36 = vld [vmem:[%s1455_s4] ss:$8 sps:$4 sm:$0xff]   ;;  %v1093_v37 = vld [vmem:[%s1455_s4 + $0x14] ss:$8 sps:$4 sm:$0xff]  }
  0x61   : > { %655 = vmatprep.subr.bf16.mxu0 %v1090_v35  ;;  %v1095_v38 = vld [vmem:[%s1455_s4 + $0x10] ss:$8 sps:$4 sm:$0xff]   ;;  %v1096_v39 = vld [vmem:[%s1455_s4 + $0x24] ss:$8 sps:$4 sm:$0xff]   ;;  %v1098_v40 = vld [vmem:[%s1455_s4 + $0x20] ss:$8 sps:$4 sm:$0xff]  }
  0x62   : > { %656 = vmatpush1.bf16.msra.mxu0 %v1092_v36  ;;  %v1099_v41 = vld [vmem:[%s1455_s4 + $0x34] ss:$8 sps:$4 sm:$0xff]   ;;  %v1101_v42 = vld [vmem:[%s1455_s4 + $0x30] ss:$8 sps:$4 sm:$0xff]   ;;  %v1102_v43 = vld [vmem:[%s1455_s4 + $0x44] ss:$8 sps:$4 sm:$0xff]  }
  0x63   : > { %657 = vmatprep.subr.bf16.mxu0 %v1093_v37  ;;  %v1104_v44 = vld [vmem:[%s1455_s4 + $0x40] ss:$8 sps:$4 sm:$0xff]   ;;  %v1105_v45 = vld [vmem:[%s1455_s4 + $0x54] ss:$8 sps:$4 sm:$0xff]   ;;  %v1107_v46 = vld [vmem:[%s1455_s4 + $0x50] ss:$8 sps:$4 sm:$0xff]  }
  0x64   : > { %v1108_v47 = vld [vmem:[%s1455_s4 + $0x64] ss:$8 sps:$4 sm:$0xff]   ;;  %v1110_v49 = vld [vmem:[%s1455_s4 + $0x60] ss:$8 sps:$4 sm:$0xff]   ;;  %v1111_v50 = vld [vmem:[%s1455_s4 + $0x74] ss:$8 sps:$4 sm:$0xff]  }
  0x65   : > { %v1140_v48 = vld [vmem:[%s393_s26 + $0x4] ss:$8 sps:$4 sm:$0xff]   ;;  %v1113_v51 = vld [vmem:[%s1455_s4 + $0x70] ss:$8 sps:$4 sm:$0xff]   ;;  %v1116_v53 = vld [vmem:[%s1455_s4 + $0x80] ss:$8 sps:$4 sm:$0xff]  }
  0x66   : > { %658 = vmatpush1.bf16.msra.mxu0 %v1095_v38  ;;  %687 = vmatprep.mubr.bf16.mxu0 %v1140_v48  ;;  %v1114_v52 = vld [vmem:[%s1455_s4 + $0x84] ss:$8 sps:$4 sm:$0xff]   ;;  %v1117_v54 = vld [vmem:[%s1455_s4 + $0x94] ss:$8 sps:$4 sm:$0xff]   ;;  %v1119_v55 = vld [vmem:[%s1455_s4 + $0x90] ss:$8 sps:$4 sm:$0xff]  }
  0x67   : > { %659 = vmatprep.subr.bf16.mxu0 %v1096_v39  ;;  %v1120_v56 = vld [vmem:[%s1455_s4 + $0xa4] ss:$8 sps:$4 sm:$0xff]   ;;  %v1122_v57 = vld [vmem:[%s1455_s4 + $0xa0] ss:$8 sps:$4 sm:$0xff]   ;;  %v1123_v58 = vld [vmem:[%s1455_s4 + $0xb4] ss:$8 sps:$4 sm:$0xff]  }
  0x68   : > { %v1125_v59 = vld [vmem:[%s1455_s4 + $0xb0] ss:$8 sps:$4 sm:$0xff]   ;;  %v1126_v60 = vld [vmem:[%s1455_s4 + $0xc4] ss:$8 sps:$4 sm:$0xff]   ;;  %v1128_v61 = vld [vmem:[%s1455_s4 + $0xc0] ss:$8 sps:$4 sm:$0xff]  }
  0x69   : > { %v1129_v62 = vld [vmem:[%s1455_s4 + $0xd4] ss:$8 sps:$4 sm:$0xff]   ;;  %v1131_v63 = vld [vmem:[%s1455_s4 + $0xd0] ss:$8 sps:$4 sm:$0xff]   ;;  %v1132_v0 = vld [vmem:[%s1455_s4 + $0xe4] ss:$8 sps:$4 sm:$0xff]  }
  0x6a   : > { %660 = vmatpush1.bf16.msra.mxu0 %v1098_v40  ;;  %v1134_v1 = vld [vmem:[%s1455_s4 + $0xe0] ss:$8 sps:$4 sm:$0xff]   ;;  %v1135_v2 = vld [vmem:[%s1455_s4 + $0xf4] ss:$8 sps:$4 sm:$0xff]   ;;  %v1137_v3 = vld [vmem:[%s1455_s4 + $0xf0] ss:$8 sps:$4 sm:$0xff]  }
  0x6b   : > { %661 = vmatprep.subr.bf16.mxu0 %v1099_v41  ;;  %v1138_v4 = vld [vmem:[%s393_s26] ss:$8 sps:$4 sm:$0xff]   ;;  %p988_p5 = scmp.ne.s32.totalorder %s1219_s18, 2 }
  0x6c   : > { %v447_v5 = vld [vmem:[#allocation2] sm:$0xff]  ;;  %v448_v6 = vld [vmem:[#allocation2 + $0x8] sm:$0xff]  ;;  %v449_v8 = vld [vmem:[#allocation2 + $0x10] sm:$0xff]  ;;  %v716_v17 = vlaneseq (!%p988_p5) }
  0x6d   : > { %v450_v11 = vld [vmem:[#allocation2 + $0x18] sm:$0xff]  ;;  %v714_v19 = vld [vmem:[%s435_s29] sm:$0x3] (!%p988_p5) }
  0x6e   : > { %662 = vmatpush1.bf16.msra.mxu0 %v1101_v42  ;;  %v717_v18 = vshrl.u32 (!%p988_p5), %v716_v17, 7 }
  0x6f   : > { %663 = vmatprep.subr.bf16.mxu0 %v1102_v43 }
  0x70   : > { %v718_v21 = vsub.s32 (!%p988_p5), 0, %v717_v18  ;;  %v722_v22 = vsub.s32 (!%p988_p5), 1, %v717_v18 }
  0x72   : > { %664 = vmatpush1.bf16.msra.mxu0 %v1104_v44  ;;  %v719_v26 = vrot.slane (!%p988_p5), %v714_v19, %v718_v21  ;;  %v723_v27 = vrot.slane (!%p988_p5), %v714_v19, %v722_v22 }
  0x73   : > { %665 = vmatprep.subr.bf16.mxu0 %v1105_v45 }
  0x76   : > { %666 = vmatpush1.bf16.msra.mxu0 %v1107_v46 }
  0x77   : > { %667 = vmatprep.subr.bf16.mxu0 %v1108_v47 }
  0x7a   : > { %668 = vmatpush1.bf16.msra.mxu0 %v1110_v49 }
  0x7b   : > { %669 = vmatprep.subr.bf16.mxu0 %v1111_v50 }
  0x7e   : > { %670 = vmatpush1.bf16.msra.mxu0 %v1113_v51 }
  0x7f   : > { %671 = vmatprep.subr.bf16.mxu0 %v1114_v52 }
  0x82   : > { %672 = vmatpush1.bf16.msra.mxu0 %v1116_v53 }
  0x83   : > { %673 = vmatprep.subr.bf16.mxu0 %v1117_v54 }
  0x86   : > { %674 = vmatpush1.bf16.msra.mxu0 %v1119_v55 }
  0x87   : > { %675 = vmatprep.subr.bf16.mxu0 %v1120_v56 }
  0x8a   : > { %676 = vmatpush1.bf16.msra.mxu0 %v1122_v57 }
  0x8b   : > { %677 = vmatprep.subr.bf16.mxu0 %v1123_v58 }
  0x8e   : > { %678 = vmatpush1.bf16.msra.mxu0 %v1125_v59 }
  0x8f   : > { %679 = vmatprep.subr.bf16.mxu0 %v1126_v60 }
  0x92   : > { %680 = vmatpush1.bf16.msra.mxu0 %v1128_v61 }
  0x93   : > { %681 = vmatprep.subr.bf16.mxu0 %v1129_v62 }
  0x96   : > { %682 = vmatpush1.bf16.msra.mxu0 %v1131_v63 }
  0x97   : > { %683 = vmatprep.subr.bf16.mxu0 %v1132_v0 }
  0x9a   : > { %684 = vmatpush1.bf16.msra.mxu0 %v1134_v1 }
  0x9b   : > { %685 = vmatprep.subr.bf16.mxu0 %v1135_v2 }
  0x9e   : > { %686 = vmatpush1.bf16.msra.mxu0 %v1137_v3 }
  0xa1   : > { %688 = vmatmul.mubr.bf16.vlgmr.msra.gmra.mrb[0].mxu0 %v1138_v4 }
 0x174   : > { %v689_v7 = vpop.f32.mrb[0].mxu0  ;;  %709 = sbr.rel (%p988_p5) target bundleno = 416 (0x1a0), region = 116 }
 0x175   : > { %v698_v9 = vadd.f32 %v689_v7, %v447_v5  ;;  %v691_v10 = vpop.f32.mrb[1].mxu0 }
 0x176   : > { %v699_v12 = vadd.f32 %v691_v10, %v448_v6  ;;  %v693_v13 = vpop.f32.mrb[2].mxu0 }
 0x177   : > { %702 = vst [vmem:[#allocation2] sm:$0xff] %v698_v9  ;;  %v700_v14 = vadd.f32 %v693_v13, %v449_v8  ;;  %v695_v15 = vpop.f32.mrb[3].mxu0 }
 0x178   : > { %703 = vst [vmem:[#allocation2 + $0x8] sm:$0xff] %v699_v12  ;;  %v701_v16 = vadd.f32 %v695_v15, %v450_v11 }
 0x179   : > { %704 = vst [vmem:[#allocation2 + $0x10] sm:$0xff] %v700_v14 }
 0x17a   : > { %705 = vst [vmem:[#allocation2 + $0x18] sm:$0xff] %v701_v16 }
 0x17e   : > { %v710_v20 = vld [vmem:[#allocation2] sm:$0xff] }
 0x17f   : > { %v711_v23 = vld [vmem:[#allocation2 + $0x8] sm:$0xff]  ;;  %v726_v28 = vadd.f32 %v719_v26, %v710_v20 }
 0x180   : > { %v712_v24 = vld [vmem:[#allocation2 + $0x10] sm:$0xff]  ;;  %v727_v29 = vadd.f32 %v723_v27, %v711_v23 }
 0x181   : > { %v713_v25 = vld [vmem:[#allocation2 + $0x18] sm:$0xff]  ;;  %v728_v30 = vadd.f32 %v719_v26, %v712_v24  ;;  %v734_v32 = vmul.f32 0.044715, %v726_v28  ;;  %v730_v52 = vmul.f32 0.5, %v726_v28 }
 0x182   : > { %v729_v31 = vadd.f32 %v723_v27, %v713_v25  ;;  %v735_v33 = vmul.f32 0.044715, %v727_v29  ;;  %v731_v54 = vmul.f32 0.5, %v727_v29 }
 0x183   : > { %v736_v34 = vmul.f32 0.044715, %v728_v30  ;;  %v738_v36 = vmul.f32 %v734_v32, %v726_v28  ;;  %v732_v57 = vmul.f32 0.5, %v728_v30 }
 0x184   : > { %v737_v35 = vmul.f32 0.044715, %v729_v31  ;;  %v739_v37 = vmul.f32 %v735_v33, %v727_v29  ;;  %v733_v60 = vmul.f32 0.5, %v729_v31 }
 0x185   : > { %v740_v38 = vmul.f32 %v736_v34, %v728_v30  ;;  %v742_v40 = vmul.f32 %v738_v36, %v726_v28 }
 0x186   : > { %v741_v39 = vmul.f32 %v737_v35, %v729_v31  ;;  %v743_v41 = vmul.f32 %v739_v37, %v727_v29 }
 0x187   : > { %v744_v42 = vmul.f32 %v740_v38, %v728_v30  ;;  %v746_v44 = vadd.f32 %v742_v40, %v726_v28 }
 0x188   : > { %v745_v43 = vmul.f32 %v741_v39, %v729_v31  ;;  %v747_v45 = vadd.f32 %v743_v41, %v727_v29 }
 0x189   : > { %v748_v46 = vadd.f32 %v744_v42, %v728_v30  ;;  %v750_v48 = vmul.f32 0.7978846, %v746_v44 }
 0x18a   : > { %v749_v47 = vadd.f32 %v745_v43, %v729_v31  ;;  %v751_v49 = vmul.f32 0.7978846, %v747_v45 }
 0x18b   : > { %v752_v50 = vmul.f32 0.7978846, %v748_v46  ;;  %1141 = vtanh.f32 %v750_v48 }
 0x18c   : > { %v753_v51 = vmul.f32 0.7978846, %v749_v47  ;;  %1143 = vtanh.f32 %v751_v49 }
 0x18d   : > { %1145 = vtanh.f32 %v752_v50 }
 0x18e   : > { %1147 = vtanh.f32 %v753_v51 }
 0x195   : > { %v1142_v53 = vpop.eup %1141 }
 0x196   : > { %v1144_v55 = vpop.eup %1143  ;;  %v758_v56 = vadd.f32 1.0, %v1142_v53 }
 0x197   : > { %v1146_v58 = vpop.eup %1145  ;;  %v759_v59 = vadd.f32 1.0, %v1144_v55 }
 0x198   : > { %v1148_v61 = vpop.eup %1147  ;;  %v762_v62 = vmul.f32 %v758_v56, %v730_v52  ;;  %v760_v63 = vadd.f32 1.0, %v1146_v58 }
 0x199   : > { %v763_v0 = vmul.f32 %v759_v59, %v731_v54  ;;  %v761_v1 = vadd.f32 1.0, %v1148_v61 }
 0x19a   : > { %v764_v2 = vmul.f32 %v760_v63, %v732_v57 }
 0x19b   : > { %v997_v3 = vpack.c.bf16 %v763_v0, %v762_v62  ;;  %v765_v4 = vmul.f32 %v761_v1, %v733_v60 }
 0x19d   : > { %778 = vst [vmem:[%s1457_s16] sm:$0xff] %v997_v3  ;;  %v998_v5 = vpack.c.bf16 %v765_v4, %v764_v2 }
 0x19f   : > { %779 = vst [vmem:[%s1457_s16 + $0x8] sm:$0xff] %v998_v5 }
 0x1a0 PF: > { %786 = sbr.rel (!%p1352_p12) target bundleno = 424 (0x1a8), region = 120  ;;  %s999_s18 = sshll.u32 (%p1352_p12), %s1223_s19, 3 }
 0x1a1   : > { %s792_s25 = scalar_lea.vmem (%p1352_p12), %s1548_s3, %s999_s18 }
 0x1a4   : > { %v822_v6 = vld [vmem:[%s1457_s16] sm:$0xff] (%p1352_p12) }
 0x1a5   : > { %823 = vst [vmem:[%s792_s25] sm:$0xff] (%p1352_p12), %v822_v6 }
 0x1a6   : > { %v824_v7 = vld [vmem:[%s1457_s16 + $0x8] sm:$0xff] (%p1352_p12) }
 0x1a7   : > { %825 = vst [vmem:[%s792_s25 + $0x60] sm:$0xff] %v824_v7 }
 0x1a8 PF: > { %s13_s22 = sadd.s32 1, %s1235_s22   ;;  %s1557_s10 = sld [smem:[#allocation8_spill]] }
 0x1a9   : > { %p10_p6 = scmp.ge.s32.totalorder %s13_s22, 38   ;;  %s1558_s30 = sld [smem:[#allocation6_spill]] }
 0x1aa   : > { %s1559_s27 = sld [smem:[#allocation7_spill]]  ;;  %s1560_s12 = smov %s1199_s13 }
 0x1ab   : > { %s1561_s13 = smov %s1350_s9  ;;  %s1562_s14 = smov %s1207_s15 }
 0x1ac   : > { %s1563_s15 = smov %s1347_s8  ;;  %s1564_s16 = smov %s1215_s17 }
 0x1ad   : > { %s1566_s18 = smov %s1227_s20  ;;  %s1567_s19 = smov %s1231_s21 }
 0x1ae   : > { %s1565_s17 = smov %s1557_s10  ;;  %12 = sbr.rel (!%p10_p6) target bundleno = 6 (0x6), region = 200 }
 0x1af   : > { %s1568_s20 = smov %s1558_s30 }
 0x1b0   : > { %s1569_s21 = smov %s1559_s27 }

// kernel: longformer_forward.19
= control target key start
LH: loop header
LB: loop body
LE: loop exit
PB: predicated region body
PF: predicated region fallthrough
CT: control target
= control target key end

     0   :  { %s2077_s15 = smov 0   ;;  %s2429_s0 = inlined_call_operand.vmem [shape: bf16[2,12,8,64], index: 0, kind: input, shape index: {}]   ;;  %s2430_s1 = inlined_call_operand.vmem [shape: bf16[2,12,8,64], index: 1, kind: input, shape index: {}]   ;;  %s2431_s2 = inlined_call_operand.vmem [shape: bf16[2,12,8,64], index: 2, kind: input, shape index: {}]   ;;  %s2432_s3 = inlined_call_operand.vmem [shape: f32[2,1,8], index: 3, kind: input, shape index: {}]   ;;  %s2433_s4 = inlined_call_operand.vmem [shape: bf16[2,8,768], index: 4, kind: output, shape index: {}]  }
   0x1 LB: > { %s1729_s16 = sadd.s32 4294967295, %s2046_s15   ;;  %p1733_p0 = scmp.ge.s32.totalorder %s2046_s15, 1  ;;  %s2046_s15 = sphi %s2077_s15, %s14_s15  }
   0x2   : > { %p190_p1 = scmp.lt.s32.totalorder %s2046_s15, 3 }
   0x4   : > { %p191_p2 = pnand %p1733_p0, %p190_p1 }
   0x5   : > { %p229_p3 = scmp.lt.s32.totalorder (!%p191_p2), %s1729_s16, 1  ;;  %v2048_v0 = vmov (!%p191_p2), 0.0   ;;  %vm2049_vm0 = vmmov (!%p191_p2), 0   ;;  %vm289_vm1 = vcmask (!%p191_p2), 523264   ;;  %v854_v37 = vlaneseq (!%p191_p2)  ;;  %s2051_s30 = smov (!%p191_p2), 64  }
   0x6   : > { %194 = sbr.rel (%p191_p2) target bundleno = 932 (0x3a4), region = 36  ;;  %1825 = vmatprep.subr.bf16.mxu1 (!%p191_p2), %v2048_v0  ;;  %1827 = vmatprep.mubr.msk.bf16.mxu1 (!%p191_p2), %vm2049_vm0, %v2048_v0  ;;  %v2050_v44 = vmov (!%p191_p2), 0   ;;  %vm886_vm6 = vcmask (!%p191_p2), 64512   ;;  %vm1034_vm7 = vcmask (!%p191_p2), 1043456  }
   0x7   : > { %1819 = vmatprep.subr.bf16.mxu0 (!%p191_p2), %v2048_v0  ;;  %1821 = vmatprep.mubr.msk.bf16.mxu0 (!%p191_p2), %vm2049_vm0, %v2048_v0  ;;  %v855_v38 = vshrl.u32 (!%p191_p2), %v854_v37, 7  ;;  %v857_v39 = vand.u32 (!%p191_p2), 127, %v854_v37 }
   0x9   : > { %v858_v41 = vsub.s32 (!%p191_p2), %v855_v38, %v857_v39  ;;  %v868_v43 = vsub.s32 (!%p191_p2), 0, %v855_v38 }
   0xb   : > { %v860_v42 = vsub.s32 (!%p191_p2), 0, %v858_v41 }
   0xd   : > { %s2437_s16 = smov (!%p229_p3, %s1729_s16), 1  ;;  %v1750_v46 = vmin.u32 %v860_v42, %v858_v41 }
   0xe   : > { %s2094_s17 = smul.u32 48, %s2437_s16  ;;  %s246_s26 = scalar_lea.vmem %s2432_s3, %s2437_s16 }
   0xf   : > { %v863_v40 = vld [vmem:[%s246_s26] sm:$0x1]  ;;  %vm862_vm3 = vcmp.le.s32.totalorder %v1750_v46, 2  ;;  %s1964_s5 = smul.u32 24, %s2437_s16 }
  0x10   : > { %s2100_s20 = scalar_lea.vmem %s2430_s1, %s2094_s17  ;;  %s2110_s23 = scalar_lea.vmem %s2429_s0, %s2094_s17  ;;  %vm864_vm2 = vcmp.gt.f32.partialorder %v863_v40, 0.5 }
  0x11   : > { %v266_v1 = vld [vmem:[%s2100_s20 + $0x4] sm:$0xf]  ;;  %v265_v3 = vld [vmem:[%s2100_s20] sm:$0xf]  ;;  %v268_v5 = vld [vmem:[%s2100_s20 + $0xc] sm:$0xf]  ;;  %s2300_s29 = scalar_lea.vmem %s2431_s2, %s2094_s17  ;;  %s251_s8 = scalar_lea.vmem %s2433_s4, %s1964_s5 }
  0x12   : > { %v340_v2 = vsel %vm289_vm1, %v266_v1, 0  ;;  %v294_v4 = vsel %vm289_vm1, %v265_v3, 0  ;;  %v254_v6 = vld [vmem:[%s2110_s23 + $0x4] sm:$0xf]  ;;  %v267_v7 = vld [vmem:[%s2100_s20 + $0x8] sm:$0xf] }
  0x13   : > { %1826 = vmatpush3.bf16.xpose.msra.mxu1 %v340_v2  ;;  %1820 = vmatpush3.bf16.xpose.msra.mxu0 %v294_v4  ;;  %v432_v8 = vsel %vm289_vm1, %v268_v5, 0  ;;  %v253_v9 = vld [vmem:[%s2110_s23] sm:$0xf]  ;;  %v386_v10 = vsel %vm289_vm1, %v267_v7, 0  ;;  %v270_v11 = vld [vmem:[%s2100_s20 + $0x14] sm:$0xf] }
  0x14   : > { %1837 = vmatprep.subr.bf16.mxu1 %v2048_v0  ;;  %1831 = vmatprep.subr.bf16.mxu0 %v2048_v0  ;;  %v256_v12 = vld [vmem:[%s2110_s23 + $0xc] sm:$0xf]  ;;  %v269_v13 = vld [vmem:[%s2100_s20 + $0x10] sm:$0xf]  ;;  %v524_v14 = vsel %vm289_vm1, %v270_v11, 0  ;;  %v865_v45 = vsel %vm864_vm2, 1, %v2050_v44 }
  0x15   : > { %v255_v15 = vld [vmem:[%s2110_s23 + $0x8] sm:$0xf]  ;;  %v478_v16 = vsel %vm289_vm1, %v269_v13, 0  ;;  %v272_v17 = vld [vmem:[%s2100_s20 + $0x1c] sm:$0xf]  ;;  %v869_v47 = vrot.slane %v865_v45, %v868_v43 }
  0x16   : > { %v258_v18 = vld [vmem:[%s2110_s23 + $0x14] sm:$0xf]  ;;  %v271_v19 = vld [vmem:[%s2100_s20 + $0x18] sm:$0xf]  ;;  %v616_v20 = vsel %vm289_vm1, %v272_v17, 0 }
  0x17   : > { %v257_v21 = vld [vmem:[%s2110_s23 + $0x10] sm:$0xf]  ;;  %v570_v22 = vsel %vm289_vm1, %v271_v19, 0  ;;  %v274_v23 = vld [vmem:[%s2100_s20 + $0x24] sm:$0xf]  ;;  %vm870_vm4 = vcmp.eq.s32.totalorder %v869_v47, 1 }
  0x18   : > { %v260_v24 = vld [vmem:[%s2110_s23 + $0x1c] sm:$0xf]  ;;  %v273_v25 = vld [vmem:[%s2100_s20 + $0x20] sm:$0xf]  ;;  %v708_v26 = vsel %vm289_vm1, %v274_v23, 0  ;;  %vm2196_vm5 = vmand %vm862_vm3, %vm870_vm4 }
  0x19   : > { %v259_v27 = vld [vmem:[%s2110_s23 + $0x18] sm:$0xf]  ;;  %v662_v28 = vsel %vm289_vm1, %v273_v25, 0  ;;  %v276_v29 = vld [vmem:[%s2100_s20 + $0x2c] sm:$0xf] }
  0x1a   : > { %1828 = vmatmul.mubr.msk.bf16.vlgmr.msra.gmra.mrb[0].mxu1 %vm289_vm1, %v254_v6  ;;  %1822 = vmatmul.mubr.msk.bf16.vlgmr.msra.gmra.mrb[0].mxu0 %vm289_vm1, %v253_v9  ;;  %v262_v30 = vld [vmem:[%s2110_s23 + $0x24] sm:$0xf]  ;;  %v275_v31 = vld [vmem:[%s2100_s20 + $0x28] sm:$0xf]  ;;  %v800_v32 = vsel %vm289_vm1, %v276_v29, 0 }
  0x1b   : > { %1838 = vmatpush3.bf16.xpose.msra.mxu1 %v432_v8  ;;  %1839 = vmatprep.mubr.msk.bf16.mxu1 %vm2049_vm0, %v2048_v0  ;;  %v261_v33 = vld [vmem:[%s2110_s23 + $0x20] sm:$0xf]  ;;  %v754_v34 = vsel %vm289_vm1, %v275_v31, 0  ;;  %v264_v35 = vld [vmem:[%s2110_s23 + $0x2c] sm:$0xf] }
  0x1c   : > { %1849 = vmatprep.subr.bf16.mxu1 %v2048_v0  ;;  %1832 = vmatpush3.bf16.xpose.msra.mxu0 %v386_v10  ;;  %v263_v36 = vld [vmem:[%s2110_s23 + $0x28] sm:$0xf] }
  0x1d   : > { %1833 = vmatprep.mubr.msk.bf16.mxu0 %vm2049_vm0, %v2048_v0  ;;  %1843 = vmatprep.subr.bf16.mxu0 %v2048_v0 }
  0x22   : > { %1840 = vmatmul.mubr.msk.bf16.vlgmr.msra.gmra.mrb[4].mxu1 %vm289_vm1, %v256_v12 }
  0x23   : > { %1850 = vmatpush3.bf16.xpose.msra.mxu1 %v524_v14  ;;  %1851 = vmatprep.mubr.msk.bf16.mxu1 %vm2049_vm0, %v2048_v0 }
  0x24   : > { %1861 = vmatprep.subr.bf16.mxu1 %v2048_v0  ;;  %1834 = vmatmul.mubr.msk.bf16.vlgmr.msra.gmra.mrb[4].mxu0 %vm289_vm1, %v255_v15 }
  0x25   : > { %1844 = vmatpush3.bf16.xpose.msra.mxu0 %v478_v16  ;;  %1845 = vmatprep.mubr.msk.bf16.mxu0 %vm2049_vm0, %v2048_v0 }
  0x26   : > { %1855 = vmatprep.subr.bf16.mxu0 %v2048_v0 }
  0x2a   : > { %1852 = vmatmul.mubr.msk.bf16.vlgmr.msra.gmra.mrb[8].mxu1 %vm289_vm1, %v258_v18 }
  0x2b   : > { %1862 = vmatpush3.bf16.xpose.msra.mxu1 %v616_v20  ;;  %1863 = vmatprep.mubr.msk.bf16.mxu1 %vm2049_vm0, %v2048_v0 }
  0x2c   : > { %1873 = vmatprep.subr.bf16.mxu1 %v2048_v0  ;;  %1846 = vmatmul.mubr.msk.bf16.vlgmr.msra.gmra.mrb[8].mxu0 %vm289_vm1, %v257_v21 }
  0x2d   : > { %1856 = vmatpush3.bf16.xpose.msra.mxu0 %v570_v22  ;;  %1857 = vmatprep.mubr.msk.bf16.mxu0 %vm2049_vm0, %v2048_v0 }
  0x2e   : > { %1867 = vmatprep.subr.bf16.mxu0 %v2048_v0 }
  0x32   : > { %1864 = vmatmul.mubr.msk.bf16.vlgmr.msra.gmra.mrb[12].mxu1 %vm289_vm1, %v260_v24 }
  0x33   : > { %1874 = vmatpush3.bf16.xpose.msra.mxu1 %v708_v26  ;;  %1875 = vmatprep.mubr.msk.bf16.mxu1 %vm2049_vm0, %v2048_v0 }
  0x34   : > { %1885 = vmatprep.subr.bf16.mxu1 %v2048_v0  ;;  %1858 = vmatmul.mubr.msk.bf16.vlgmr.msra.gmra.mrb[12].mxu0 %vm289_vm1, %v259_v27 }
  0x35   : > { %1868 = vmatpush3.bf16.xpose.msra.mxu0 %v662_v28  ;;  %1869 = vmatprep.mubr.msk.bf16.mxu0 %vm2049_vm0, %v2048_v0 }
  0x36   : > { %1879 = vmatprep.subr.bf16.mxu0 %v2048_v0 }
  0x3a   : > { %1876 = vmatmul.mubr.msk.bf16.vlgmr.msra.gmra.mrb[16].mxu1 %vm289_vm1, %v262_v30 }
  0x3b   : > { %1886 = vmatpush3.bf16.xpose.msra.mxu1 %v800_v32  ;;  %1887 = vmatprep.mubr.msk.bf16.mxu1 %vm2049_vm0, %v2048_v0 }
  0x3c   : > { %1870 = vmatmul.mubr.msk.bf16.vlgmr.msra.gmra.mrb[16].mxu0 %vm289_vm1, %v261_v33  ;;  %1897 = vmatprep.subr.bf16.mxu1 %v2048_v0 }
  0x3d   : > { %1880 = vmatpush3.bf16.xpose.msra.mxu0 %v754_v34  ;;  %1881 = vmatprep.mubr.msk.bf16.mxu0 %vm2049_vm0, %v2048_v0 }
  0x3e   : > { %1891 = vmatprep.subr.bf16.mxu0 %v2048_v0 }
  0x42   : > { %1888 = vmatmul.mubr.msk.bf16.vlgmr.msra.gmra.mrb[20].mxu1 %vm289_vm1, %v264_v35 }
  0x43   : > { %1899 = vmatprep.mubr.msk.bf16.mxu1 %vm2049_vm0, %v2048_v0 }
  0x44   : > { %1882 = vmatmul.mubr.msk.bf16.vlgmr.msra.gmra.mrb[20].mxu0 %vm289_vm1, %v263_v36 }
  0x45   : > { %1893 = vmatprep.mubr.msk.bf16.mxu0 %vm2049_vm0, %v2048_v0 }
  0xed   : > { %v376_v48 = vpop.f32.mrb[0].mxu1  ;;  %v330_v53 = vpop.f32.mrb[0].mxu0 }
  0xee   : > { %v843_v50 = vmul.f32 0.125, %v376_v48  ;;  %v1829_v51 = vpop.f32.mrb[1].mxu1  ;;  %v1823_v56 = vpop.f32.mrb[1].mxu0  ;;  %v842_v30 = vmul.f32 0.125, %v330_v53 }
  0xef   : > { %v379_v52 = vpop.f32.mrb[2].mxu1  ;;  %v333_v58 = vpop.f32.mrb[2].mxu0 }
  0xf0   : > { %v1830_v54 = vpop.f32.mrb[3].mxu1  ;;  %v2202_v55 = vsel %vm2196_vm5, %v843_v50, -1e+09  ;;  %v1824_v59 = vpop.f32.mrb[3].mxu0  ;;  %v2226_v35 = vsel %vm2196_vm5, %v842_v30, -1e+09 }
  0xf1   : > { %v890_v57 = vsel %vm886_vm6, %v2202_v55, -inf  ;;  %v887_v45 = vsel %vm886_vm6, %v2226_v35, -inf }
  0xf2   : > { %891 = vmax.xlane.f32.xlu0 %v890_v57 }
  0xf5   : > { %v468_v60 = vpop.f32.mrb[4].mxu1 }
  0xf6   : > { %v845_v61 = vmul.f32 0.125, %v468_v60  ;;  %v1841_v62 = vpop.f32.mrb[5].mxu1 }
  0xf7   : > { %v471_v63 = vpop.f32.mrb[6].mxu1  ;;  %v422_v1 = vpop.f32.mrb[4].mxu0 }
  0xf8   : > { %v1842_v2 = vpop.f32.mrb[7].mxu1  ;;  %v2208_v3 = vsel %vm2196_vm5, %v845_v61, -1e+09  ;;  %v1835_v4 = vpop.f32.mrb[5].mxu0  ;;  %v844_v44 = vmul.f32 0.125, %v422_v1 }
  0xf9   : > { %v896_v5 = vsel %vm886_vm6, %v2208_v3, -inf  ;;  %v425_v6 = vpop.f32.mrb[6].mxu0 }
  0xfa   : > { %897 = vmax.xlane.f32.xlu0 %v896_v5  ;;  %v1836_v7 = vpop.f32.mrb[7].mxu0  ;;  %v2244_v53 = vsel %vm2196_vm5, %v844_v44, -1e+09 }
  0xfb   : > { %v893_v63 = vsel %vm886_vm6, %v2244_v53, -inf }
  0xfd   : > { %v560_v8 = vpop.f32.mrb[8].mxu1 }
  0xfe   : > { %v847_v9 = vmul.f32 0.125, %v560_v8  ;;  %v1853_v10 = vpop.f32.mrb[9].mxu1 }
  0xff   : > { %v563_v11 = vpop.f32.mrb[10].mxu1  ;;  %v514_v12 = vpop.f32.mrb[8].mxu0 }
 0x100   : > { %v1854_v13 = vpop.f32.mrb[11].mxu1  ;;  %v2214_v14 = vsel %vm2196_vm5, %v847_v9, -1e+09  ;;  %v1847_v15 = vpop.f32.mrb[9].mxu0  ;;  %v846_v39 = vmul.f32 0.125, %v514_v12 }
 0x101   : > { %v902_v16 = vsel %vm886_vm6, %v2214_v14, -inf  ;;  %v517_v17 = vpop.f32.mrb[10].mxu0 }
 0x102   : > { %903 = vmax.xlane.f32.xlu1 %v902_v16  ;;  %v1848_v18 = vpop.f32.mrb[11].mxu0  ;;  %v2238_v46 = vsel %vm2196_vm5, %v846_v39, -1e+09 }
 0x103   : > { %v899_v52 = vsel %vm886_vm6, %v2238_v46, -inf }
 0x105   : > { %v652_v19 = vpop.f32.mrb[12].mxu1 }
 0x106   : > { %v849_v20 = vmul.f32 0.125, %v652_v19  ;;  %v1865_v21 = vpop.f32.mrb[13].mxu1 }
 0x107   : > { %v655_v22 = vpop.f32.mrb[14].mxu1  ;;  %v606_v23 = vpop.f32.mrb[12].mxu0 }
 0x108   : > { %v1866_v24 = vpop.f32.mrb[15].mxu1  ;;  %v2220_v25 = vsel %vm2196_vm5, %v849_v20, -1e+09  ;;  %v1859_v26 = vpop.f32.mrb[13].mxu0  ;;  %v848_v58 = vmul.f32 0.125, %v606_v23 }
 0x109   : > { %v908_v27 = vsel %vm886_vm6, %v2220_v25, -inf  ;;  %v609_v28 = vpop.f32.mrb[14].mxu0 }
 0x10a   : > { %909 = vmax.xlane.f32.xlu1 %v908_v27  ;;  %v1860_v29 = vpop.f32.mrb[15].mxu0  ;;  %v2256_v2 = vsel %vm2196_vm5, %v848_v58, -1e+09 }
 0x10b   : > { %v905_v4 = vsel %vm886_vm6, %v2256_v2, -inf }
 0x10d   : > { %v744_v31 = vpop.f32.mrb[16].mxu1 }
 0x10e   : > { %v851_v32 = vmul.f32 0.125, %v744_v31  ;;  %v1877_v33 = vpop.f32.mrb[17].mxu1 }
 0x10f   : > { %v747_v34 = vpop.f32.mrb[18].mxu1  ;;  %v698_v36 = vpop.f32.mrb[16].mxu0 }
 0x110   : > { %v1878_v37 = vpop.f32.mrb[19].mxu1  ;;  %v2230_v38 = vsel %vm2196_vm5, %v851_v32, -1e+09  ;;  %v1871_v40 = vpop.f32.mrb[17].mxu0  ;;  %v850_v1 = vmul.f32 0.125, %v698_v36 }
 0x111   : > { %v914_v41 = vsel %vm886_vm6, %v2230_v38, -inf  ;;  %v701_v42 = vpop.f32.mrb[18].mxu0 }
 0x112   : > { %915 = vmax.xlane.f32.xlu0 %v914_v41  ;;  %v1872_v43 = vpop.f32.mrb[19].mxu0  ;;  %v2262_v6 = vsel %vm2196_vm5, %v850_v1, -1e+09 }
 0x113   : > { %v911_v7 = vsel %vm886_vm6, %v2262_v6, -inf }
 0x115   : > { %v836_v47 = vpop.f32.mrb[20].mxu1 }
 0x116   : > { %v853_v48 = vmul.f32 0.125, %v836_v47  ;;  %v1889_v50 = vpop.f32.mrb[21].mxu1  ;;  %888 = vmax.xlane.f32.xlu0 %v887_v45 }
 0x117   : > { %v839_v51 = vpop.f32.mrb[22].mxu1  ;;  %v790_v54 = vpop.f32.mrb[20].mxu0 }
 0x118   : > { %v1890_v56 = vpop.f32.mrb[23].mxu1  ;;  %v2248_v57 = vsel %vm2196_vm5, %v853_v48, -1e+09  ;;  %v1883_v59 = vpop.f32.mrb[21].mxu0  ;;  %v852_v5 = vmul.f32 0.125, %v790_v54 }
 0x119   : > { %v920_v60 = vsel %vm886_vm6, %v2248_v57, -inf  ;;  %v793_v61 = vpop.f32.mrb[22].mxu0 }
 0x11a   : > { %921 = vmax.xlane.f32.xlu1 %v920_v60  ;;  %900 = vmax.xlane.f32.xlu0 %v899_v52  ;;  %v1884_v62 = vpop.f32.mrb[23].mxu0  ;;  %v2268_v8 = vsel %vm2196_vm5, %v852_v5, -1e+09 }
 0x11b   : > { %v917_v9 = vsel %vm886_vm6, %v2268_v8, -inf }
 0x11e   : > { %894 = vmax.xlane.f32.xlu1 %v893_v63 }
 0x122   : > { %906 = vmax.xlane.f32.xlu1 %v905_v4 }
 0x126   : > { %912 = vmax.xlane.f32.xlu1 %v911_v7 }
 0x12a   : > { %918 = vmax.xlane.f32.xlu1 %v917_v9  ;;  %v277_v9 = vld [vmem:[%s2300_s29] sm:$0xf] }
 0x17f   : > { %v892_v10 = vpop.xlane.xlu0 %891 }
 0x180   : > { %v924_v11 = vsub.f32 %v2202_v55, %v892_v10  ;;  %v1036_v10 = vsel %vm1034_vm7, %v277_v9, 0 }
 0x181   : > { %1892 = vmatpush3.bf16.msra.mxu0 %v1036_v10 }
 0x182   : > { %v937_v12 = vmul.f32 1.442695, %v924_v11  ;;  %1903 = vmatprep.subr.bf16.mxu0 %v2048_v0 }
 0x184   : > { %1992 = vpow2.f32 %v937_v12 }
 0x187   : > { %v898_v13 = vpop.xlane.xlu0 %897 }
 0x188   : > { %v926_v15 = vsub.f32 %v2208_v3, %v898_v13 }
 0x18a   : > { %v941_v16 = vmul.f32 1.442695, %v926_v15  ;;  %v280_v15 = vld [vmem:[%s2300_s29 + $0xc] sm:$0xf] }
 0x18c   : > { %1994 = vpow2.f32 %v941_v16 }
 0x18e   : > { %v2274_v17 = vpop.eup %1992 }
 0x18f   : > { %v904_v49 = vpop.xlane.xlu1 %903  ;;  %v962_v18 = vsel %vm886_vm6, %v2274_v17, 0.0 }
 0x190   : > { %v928_v19 = vsub.f32 %v2214_v14, %v904_v49  ;;  %963 = vadd.xlane.f32.xlu0 %v962_v18  ;;  %v1174_v18 = vsel %vm1034_vm7, %v280_v15, 0 }
 0x192   : > { %v945_v20 = vmul.f32 1.442695, %v928_v19 }
 0x194   : > { %1996 = vpow2.f32 %v945_v20 }
 0x196   : > { %v2279_v21 = vpop.eup %1994 }
 0x197   : > { %v910_v55 = vpop.xlane.xlu1 %909  ;;  %v968_v22 = vsel %vm886_vm6, %v2279_v21, 0.0 }
 0x198   : > { %v930_v3 = vsub.f32 %v2220_v25, %v910_v55  ;;  %969 = vadd.xlane.f32.xlu0 %v968_v22  ;;  %v282_v55 = vld [vmem:[%s2300_s29 + $0x14] sm:$0xf] }
 0x19a   : > { %v949_v23 = vmul.f32 1.442695, %v930_v3 }
 0x19c   : > { %1998 = vpow2.f32 %v949_v23 }
 0x19e   : > { %v2284_v24 = vpop.eup %1996 }
 0x19f   : > { %v916_v26 = vpop.xlane.xlu0 %915  ;;  %v974_v14 = vsel %vm886_vm6, %v2284_v24, 0.0 }
 0x1a0   : > { %v932_v27 = vsub.f32 %v2230_v38, %v916_v26  ;;  %975 = vadd.xlane.f32.xlu0 %v974_v14  ;;  %v284_v14 = vld [vmem:[%s2300_s29 + $0x1c] sm:$0xf] }
 0x1a2   : > { %v953_v28 = vmul.f32 1.442695, %v932_v27 }
 0x1a3   : > { %v889_v29 = vpop.xlane.xlu0 %888 }
 0x1a4   : > { %2000 = vpow2.f32 %v953_v28  ;;  %v923_v30 = vsub.f32 %v2226_v35, %v889_v29  ;;  %v278_v35 = vld [vmem:[%s2300_s29 + $0x4] sm:$0xf] }
 0x1a5   : > { %v1082_v40 = vsel %vm1034_vm7, %v278_v35, 0  ;;  %v288_v35 = vld [vmem:[%s2300_s29 + $0x2c] sm:$0xf] }
 0x1a6   : > { %v2290_v31 = vpop.eup %1998  ;;  %v935_v25 = vmul.f32 1.442695, %v923_v30  ;;  %1898 = vmatpush3.bf16.msra.mxu1 %v1082_v40 }
 0x1a7   : > { %v922_v32 = vpop.xlane.xlu1 %921  ;;  %v901_v33 = vpop.xlane.xlu0 %900  ;;  %v980_v34 = vsel %vm886_vm6, %v2290_v31, 0.0  ;;  %1909 = vmatprep.subr.bf16.mxu1 %v2048_v0 }
 0x1a8   : > { %2002 = vpow2.f32 %v935_v25  ;;  %v934_v36 = vsub.f32 %v2248_v57, %v922_v32  ;;  %v927_v37 = vsub.f32 %v2238_v46, %v901_v33  ;;  %981 = vadd.xlane.f32.xlu1 %v980_v34  ;;  %v286_v25 = vld [vmem:[%s2300_s29 + $0x24] sm:$0xf] }
 0x1a9   : > { %v1450_v34 = vsel %vm1034_vm7, %v286_v25, 0 }
 0x1aa   : > { %v957_v38 = vmul.f32 1.442695, %v934_v36  ;;  %v943_v39 = vmul.f32 1.442695, %v927_v37 }
 0x1ab   : > { %v895_v41 = vpop.xlane.xlu1 %894 }
 0x1ac   : > { %2004 = vpow2.f32 %v957_v38  ;;  %v925_v42 = vsub.f32 %v2244_v53, %v895_v41  ;;  %v1542_v41 = vsel %vm1034_vm7, %v288_v35, 0 }
 0x1ad   : > { %2006 = vpow2.f32 %v943_v39 }
 0x1ae   : > { %v2306_v43 = vpop.eup %2000  ;;  %v939_v44 = vmul.f32 1.442695, %v925_v42 }
 0x1af   : > { %v907_v45 = vpop.xlane.xlu1 %906  ;;  %v986_v46 = vsel %vm886_vm6, %v2306_v43, 0.0 }
 0x1b0   : > { %2008 = vpow2.f32 %v939_v44  ;;  %v929_v47 = vsub.f32 %v2256_v2, %v907_v45  ;;  %987 = vadd.xlane.f32.xlu0 %v986_v46  ;;  %v279_v44 = vld [vmem:[%s2300_s29 + $0x8] sm:$0xf] }
 0x1b2   : > { %v2311_v48 = vpop.eup %2002  ;;  %v947_v50 = vmul.f32 1.442695, %v929_v47 }
 0x1b3   : > { %v913_v51 = vpop.xlane.xlu1 %912  ;;  %v959_v52 = vsel %vm886_vm6, %v2311_v48, 0.0 }
 0x1b4   : > { %2010 = vpow2.f32 %v947_v50  ;;  %v931_v53 = vsub.f32 %v2262_v6, %v913_v51  ;;  %960 = vadd.xlane.f32.xlu0 %v959_v52 }
 0x1b6   : > { %v2316_v54 = vpop.eup %2004  ;;  %v951_v56 = vmul.f32 1.442695, %v931_v53  ;;  %v281_v53 = vld [vmem:[%s2300_s29 + $0x10] sm:$0xf] }
 0x1b7   : > { %v2318_v57 = vpop.eup %2006  ;;  %v919_v58 = vpop.xlane.xlu1 %918  ;;  %v992_v59 = vsel %vm886_vm6, %v2316_v54, 0.0 }
 0x1b8   : > { %2012 = vpow2.f32 %v951_v56  ;;  %v933_v60 = vsub.f32 %v2268_v8, %v919_v58  ;;  %v971_v61 = vsel %vm886_vm6, %v2318_v57, 0.0  ;;  %993 = vadd.xlane.f32.xlu1 %v992_v59 }
 0x1b9   : > { %972 = vadd.xlane.f32.xlu0 %v971_v61 }
 0x1ba   : > { %v2325_v62 = vpop.eup %2008  ;;  %v955_v63 = vmul.f32 1.442695, %v933_v60 }
 0x1bb   : > { %v965_v1 = vsel %vm886_vm6, %v2325_v62, 0.0 }
 0x1bc   : > { %2014 = vpow2.f32 %v955_v63  ;;  %966 = vadd.xlane.f32.xlu1 %v965_v1 }
 0x1be   : > { %v2329_v2 = vpop.eup %2010 }
 0x1bf   : > { %v977_v4 = vsel %vm886_vm6, %v2329_v2, 0.0 }
 0x1c0   : > { %978 = vadd.xlane.f32.xlu1 %v977_v4 }
 0x1c2   : > { %v2333_v5 = vpop.eup %2012 }
 0x1c3   : > { %v983_v6 = vsel %vm886_vm6, %v2333_v5, 0.0 }
 0x1c4   : > { %984 = vadd.xlane.f32.xlu0 %v983_v6 }
 0x1c6   : > { %v2337_v7 = vpop.eup %2014 }
 0x1c7   : > { %v989_v8 = vsel %vm886_vm6, %v2337_v7, 0.0 }
 0x1c8   : > { %990 = vadd.xlane.f32.xlu1 %v989_v8 }
 0x21d   : > { %v964_v11 = vpop.xlane.xlu0 %963 }
 0x21e   : > { %2016 = vrcp.f32 %v964_v11 }
 0x225   : > { %v970_v12 = vpop.xlane.xlu0 %969 }
 0x226   : > { %2018 = vrcp.f32 %v970_v12 }
 0x228   : > { %v2017_v13 = vpop.eup %2016 }
 0x229   : > { %v1008_v16 = vmul.f32 %v2017_v13, %v2274_v17  ;;  %v1266_v17 = vsel %vm1034_vm7, %v282_v55, 0 }
 0x22b   : > { %v1020_v49 = vpack.c.bf16 %v1008_v16, %v1008_v16 }
 0x22d   : > { %1900 = vmatmul.mubr.msk.bf16.vlgmr.msra.gmra.mrb[24].mxu1 %vm886_vm6, %v1020_v49  ;;  %v976_v19 = vpop.xlane.xlu0 %975 }
 0x22e   : > { %2020 = vrcp.f32 %v976_v19  ;;  %1910 = vmatpush3.bf16.msra.mxu1 %v1174_v18  ;;  %1911 = vmatprep.mubr.msk.bf16.mxu1 %vm2049_vm0, %v2048_v0 }
 0x22f   : > { %1921 = vmatprep.subr.bf16.mxu1 %v2048_v0 }
 0x230   : > { %v2019_v20 = vpop.eup %2018 }
 0x231   : > { %v1010_v22 = vmul.f32 %v2019_v20, %v2279_v21  ;;  %v1358_v21 = vsel %vm1034_vm7, %v284_v14, 0 }
 0x233   : > { %v1022_v3 = vpack.c.bf16 %v1010_v22, %v1010_v22 }
 0x235   : > { %1912 = vmatmul.mubr.msk.bf16.vlgmr.msra.gmra.mrb[28].mxu1 %vm886_vm6, %v1022_v3  ;;  %v982_v23 = vpop.xlane.xlu1 %981 }
 0x236   : > { %2022 = vrcp.f32 %v982_v23  ;;  %1922 = vmatpush3.bf16.msra.mxu1 %v1266_v17  ;;  %1923 = vmatprep.mubr.msk.bf16.mxu1 %vm2049_vm0, %v2048_v0 }
 0x237   : > { %1933 = vmatprep.subr.bf16.mxu1 %v2048_v0 }
 0x238   : > { %v2021_v26 = vpop.eup %2020 }
 0x239   : > { %v1012_v27 = vmul.f32 %v2021_v26, %v2284_v24 }
 0x23b   : > { %v1024_v28 = vpack.c.bf16 %v1012_v27, %v1012_v27 }
 0x23d   : > { %1924 = vmatmul.mubr.msk.bf16.vlgmr.msra.gmra.mrb[32].mxu1 %vm886_vm6, %v1024_v28  ;;  %v988_v29 = vpop.xlane.xlu0 %987 }
 0x23e   : > { %2024 = vrcp.f32 %v988_v29  ;;  %1934 = vmatpush3.bf16.msra.mxu1 %v1358_v21  ;;  %1935 = vmatprep.mubr.msk.bf16.mxu1 %vm2049_vm0, %v2048_v0 }
 0x23f   : > { %1945 = vmatprep.subr.bf16.mxu1 %v2048_v0 }
 0x240   : > { %v2023_v30 = vpop.eup %2022 }
 0x241   : > { %v1014_v32 = vmul.f32 %v2023_v30, %v2290_v31  ;;  %v961_v33 = vpop.xlane.xlu0 %960 }
 0x242   : > { %2026 = vrcp.f32 %v961_v33 }
 0x243   : > { %v1026_v24 = vpack.c.bf16 %v1014_v32, %v1014_v32 }
 0x245   : > { %1936 = vmatmul.mubr.msk.bf16.vlgmr.msra.gmra.mrb[36].mxu1 %vm886_vm6, %v1026_v24  ;;  %v994_v36 = vpop.xlane.xlu1 %993 }
 0x246   : > { %2028 = vrcp.f32 %v994_v36  ;;  %1946 = vmatpush3.bf16.msra.mxu1 %v1450_v34  ;;  %1947 = vmatprep.mubr.msk.bf16.mxu1 %vm2049_vm0, %v2048_v0  ;;  %v973_v39 = vpop.xlane.xlu0 %972 }
 0x247   : > { %1957 = vmatprep.subr.bf16.mxu1 %v2048_v0 }
 0x248   : > { %v2025_v37 = vpop.eup %2024 }
 0x249   : > { %v1016_v31 = vmul.f32 %v2025_v37, %v2306_v43  ;;  %v967_v38 = vpop.xlane.xlu1 %966  ;;  %v1128_v43 = vsel %vm1034_vm7, %v279_v44, 0 }
 0x24a   : > { %2030 = vrcp.f32 %v967_v38 }
 0x24b   : > { %v1028_v40 = vpack.c.bf16 %v1016_v31, %v1016_v31  ;;  %2032 = vrcp.f32 %v973_v39 }
 0x24c   : > { %v2027_v42 = vpop.eup %2026 }
 0x24d   : > { %v1007_v45 = vmul.f32 %v2027_v42, %v2311_v48  ;;  %1948 = vmatmul.mubr.msk.bf16.vlgmr.msra.gmra.mrb[40].mxu1 %vm886_vm6, %v1028_v40  ;;  %v979_v48 = vpop.xlane.xlu1 %978 }
 0x24e   : > { %1958 = vmatpush3.bf16.msra.mxu1 %v1542_v41  ;;  %1959 = vmatprep.mubr.msk.bf16.mxu1 %vm2049_vm0, %v2048_v0  ;;  %2034 = vrcp.f32 %v979_v48 }
 0x24f   : > { %v1019_v46 = vpack.c.bf16 %v1007_v45, %v1007_v45 }
 0x250   : > { %v2029_v47 = vpop.eup %2028 }
 0x251   : > { %v1018_v50 = vmul.f32 %v2029_v47, %v2316_v54  ;;  %1894 = vmatmul.mubr.msk.bf16.vlgmr.msra.gmra.mrb[24].mxu0 %vm886_vm6, %v1019_v46  ;;  %v1220_v54 = vsel %vm1034_vm7, %v281_v53, 0  ;;  %v985_v61 = vpop.xlane.xlu0 %984 }
 0x252   : > { %1904 = vmatpush3.bf16.msra.mxu0 %v1128_v43  ;;  %1905 = vmatprep.mubr.msk.bf16.mxu0 %vm2049_vm0, %v2048_v0  ;;  %2036 = vrcp.f32 %v985_v61 }
 0x253   : > { %v1030_v51 = vpack.c.bf16 %v1018_v50, %v1018_v50  ;;  %1915 = vmatprep.subr.bf16.mxu0 %v2048_v0 }
 0x254   : > { %v2031_v52 = vpop.eup %2030 }
 0x255   : > { %v1009_v56 = vmul.f32 %v2031_v52, %v2325_v62  ;;  %1960 = vmatmul.mubr.msk.bf16.vlgmr.msra.gmra.mrb[44].mxu1 %vm886_vm6, %v1030_v51  ;;  %v2033_v59 = vpop.eup %2032  ;;  %v283_v62 = vld [vmem:[%s2300_s29 + $0x18] sm:$0xf]  ;;  %v991_v8 = vpop.xlane.xlu1 %990 }
 0x256   : > { %v1011_v60 = vmul.f32 %v2033_v59, %v2318_v57  ;;  %v1312_v1 = vsel %vm1034_vm7, %v283_v62, 0  ;;  %v285_v57 = vld [vmem:[%s2300_s29 + $0x20] sm:$0xf]  ;;  %2038 = vrcp.f32 %v991_v8 }
 0x257   : > { %v1021_v58 = vpack.c.bf16 %v1009_v56, %v1009_v56  ;;  %v1404_v10 = vsel %vm1034_vm7, %v285_v57, 0 }
 0x258   : > { %v1023_v63 = vpack.c.bf16 %v1011_v60, %v1011_v60  ;;  %v2035_v4 = vpop.eup %2034 }
 0x259   : > { %1906 = vmatmul.mubr.msk.bf16.vlgmr.msra.gmra.mrb[28].mxu0 %vm886_vm6, %v1021_v58  ;;  %v1013_v6 = vmul.f32 %v2035_v4, %v2329_v2  ;;  %v287_v2 = vld [vmem:[%s2300_s29 + $0x28] sm:$0xf] }
 0x25a   : > { %1916 = vmatpush3.bf16.msra.mxu0 %v1220_v54  ;;  %1917 = vmatprep.mubr.msk.bf16.mxu0 %vm2049_vm0, %v2048_v0  ;;  %v1496_v15 = vsel %vm1034_vm7, %v287_v2, 0 }
 0x25b   : > { %1927 = vmatprep.subr.bf16.mxu0 %v2048_v0  ;;  %v1025_v9 = vpack.c.bf16 %v1013_v6, %v1013_v6 }
 0x25c   : > { %v2037_v11 = vpop.eup %2036 }
 0x25d   : > { %v1015_v12 = vmul.f32 %v2037_v11, %v2333_v5 }
 0x25f   : > { %v1027_v13 = vpack.c.bf16 %v1015_v12, %v1015_v12 }
 0x260   : > { %v2039_v16 = vpop.eup %2038 }
 0x261   : > { %1918 = vmatmul.mubr.msk.bf16.vlgmr.msra.gmra.mrb[32].mxu0 %vm886_vm6, %v1023_v63  ;;  %v1017_v49 = vmul.f32 %v2039_v16, %v2337_v7 }
 0x262   : > { %1928 = vmatpush3.bf16.msra.mxu0 %v1312_v1  ;;  %1929 = vmatprep.mubr.msk.bf16.mxu0 %vm2049_vm0, %v2048_v0 }
 0x263   : > { %1939 = vmatprep.subr.bf16.mxu0 %v2048_v0  ;;  %v1029_v18 = vpack.c.bf16 %v1017_v49, %v1017_v49 }
 0x269   : > { %1930 = vmatmul.mubr.msk.bf16.vlgmr.msra.gmra.mrb[36].mxu0 %vm886_vm6, %v1025_v9 }
 0x26a   : > { %1940 = vmatpush3.bf16.msra.mxu0 %v1404_v10  ;;  %1941 = vmatprep.mubr.msk.bf16.mxu0 %vm2049_vm0, %v2048_v0 }
 0x26b   : > { %1951 = vmatprep.subr.bf16.mxu0 %v2048_v0 }
 0x271   : > { %1942 = vmatmul.mubr.msk.bf16.vlgmr.msra.gmra.mrb[40].mxu0 %vm886_vm6, %v1027_v13 }
 0x272   : > { %1952 = vmatpush3.bf16.msra.mxu0 %v1496_v15  ;;  %1953 = vmatprep.mubr.msk.bf16.mxu0 %vm2049_vm0, %v2048_v0 }
 0x279   : > { %1954 = vmatmul.mubr.msk.bf16.vlgmr.msra.gmra.mrb[44].mxu0 %vm886_vm6, %v1029_v18 }
 0x300   : > { %v1118_v19 = vpop.f32.mrb[24].mxu1 }
 0x301   : > { %v1901_v5 = vpop.f32.mrb[25].mxu1 }
 0x302   : > { %v1121_v20 = vpop.f32.mrb[26].mxu1 }
 0x303   : > { %v1902_v55 = vpop.f32.mrb[27].mxu1 }
 0x308   : > { %v1210_v22 = vpop.f32.mrb[28].mxu1 }
 0x309   : > { %v1977_v3 = vpack.i.bf16 %v1210_v22, %v1118_v19  ;;  %v1913_v17 = vpop.f32.mrb[29].mxu1 }
 0x30a   : > { %v1213_v23 = vpop.f32.mrb[30].mxu1 }
 0x30b   : > { %v1914_v26 = vpop.f32.mrb[31].mxu1  ;;  %1978 = vrot.lane.b32.xlu0 %v1977_v3, %s2051_s30 }
 0x310   : > { %v1302_v14 = vpop.f32.mrb[32].mxu1 }
 0x311   : > { %v1925_v27 = vpop.f32.mrb[33].mxu1 }
 0x312   : > { %v1305_v28 = vpop.f32.mrb[34].mxu1 }
 0x313   : > { %v1926_v0 = vpop.f32.mrb[35].mxu1 }
 0x318   : > { %v1394_v21 = vpop.f32.mrb[36].mxu1 }
 0x319   : > { %v1982_v7 = vpack.i.bf16 %v1394_v21, %v1302_v14  ;;  %v1937_v29 = vpop.f32.mrb[37].mxu1 }
 0x31a   : > { %v1397_v30 = vpop.f32.mrb[38].mxu1 }
 0x31b   : > { %1983 = vrot.lane.b32.xlu1 %v1982_v7, %s2051_s30  ;;  %v1938_v25 = vpop.f32.mrb[39].mxu1 }
 0x320   : > { %v1486_v32 = vpop.f32.mrb[40].mxu1 }
 0x321   : > { %v1949_v33 = vpop.f32.mrb[41].mxu1 }
 0x322   : > { %v1489_v24 = vpop.f32.mrb[42].mxu1 }
 0x323   : > { %v1950_v34 = vpop.f32.mrb[43].mxu1 }
 0x324   : > { %v1072_v36 = vpop.f32.mrb[24].mxu0 }
 0x325   : > { %v1895_v37 = vpop.f32.mrb[25].mxu0 }
 0x326   : > { %v1075_v35 = vpop.f32.mrb[26].mxu0 }
 0x327   : > { %v1896_v31 = vpop.f32.mrb[27].mxu0 }
 0x328   : > { %v1578_v38 = vpop.f32.mrb[44].mxu1 }
 0x329   : > { %v1987_v39 = vpack.i.bf16 %v1578_v38, %v1486_v32  ;;  %v1961_v40 = vpop.f32.mrb[45].mxu1 }
 0x32a   : > { %v1581_v41 = vpop.f32.mrb[46].mxu1 }
 0x32b   : > { %1988 = vrot.lane.b32.xlu1 %v1987_v39, %s2051_s30  ;;  %v1962_v42 = vpop.f32.mrb[47].mxu1 }
 0x32c   : > { %v1164_v44 = vpop.f32.mrb[28].mxu0 }
 0x32d   : > { %v1907_v45 = vpop.f32.mrb[29].mxu0 }
 0x32e   : > { %v1167_v46 = vpop.f32.mrb[30].mxu0 }
 0x32f   : > { %v1908_v43 = vpop.f32.mrb[31].mxu0 }
 0x334   : > { %v1256_v47 = vpop.f32.mrb[32].mxu0 }
 0x335   : > { %v1919_v50 = vpop.f32.mrb[33].mxu0 }
 0x336   : > { %v1259_v48 = vpop.f32.mrb[34].mxu0 }
 0x337   : > { %v1920_v51 = vpop.f32.mrb[35].mxu0 }
 0x33c   : > { %v1348_v52 = vpop.f32.mrb[36].mxu0 }
 0x33d   : > { %v1931_v53 = vpop.f32.mrb[37].mxu0 }
 0x33e   : > { %v1351_v56 = vpop.f32.mrb[38].mxu0 }
 0x33f   : > { %v1932_v58 = vpop.f32.mrb[39].mxu0 }
 0x344   : > { %v1440_v54 = vpop.f32.mrb[40].mxu0 }
 0x345   : > { %v1943_v59 = vpop.f32.mrb[41].mxu0 }
 0x346   : > { %v1443_v60 = vpop.f32.mrb[42].mxu0 }
 0x347   : > { %v1944_v61 = vpop.f32.mrb[43].mxu0 }
 0x34c   : > { %v1532_v62 = vpop.f32.mrb[44].mxu0 }
 0x34d   : > { %v1955_v63 = vpop.f32.mrb[45].mxu0 }
 0x34e   : > { %v1535_v1 = vpop.f32.mrb[46].mxu0 }
 0x34f   : > { %v1956_v4 = vpop.f32.mrb[47].mxu0 }
 0x37d   : > { %v1979_v6 = vpop.permute.xlu0 %1978 }
 0x37e   : > { %v1981_v8 = vunpack.i.h.bf16 %v1979_v6  ;;  %v1980_v57 = vunpack.i.l.bf16 %v1979_v6 }
 0x380   : > { %v1608_v9 = vsel %vm289_vm1, %v1072_v36, %v1980_v57  ;;  %v1609_v10 = vsel %vm289_vm1, %v1164_v44, %v1981_v8 }
 0x381   : > { %v1768_v11 = vpack.c.bf16 %v1609_v10, %v1608_v9 }
 0x383   : > { %1638 = vst [vmem:[%s251_s8] sm:$0xff] %v1768_v11 }
 0x38d   : > { %v1984_v12 = vpop.permute.xlu1 %1983 }
 0x38e   : > { %v1986_v2 = vunpack.i.h.bf16 %v1984_v12  ;;  %v1985_v13 = vunpack.i.l.bf16 %v1984_v12 }
 0x390   : > { %v1610_v15 = vsel %vm289_vm1, %v1256_v47, %v1985_v13  ;;  %v1611_v16 = vsel %vm289_vm1, %v1348_v52, %v1986_v2 }
 0x391   : > { %v1769_v49 = vpack.c.bf16 %v1611_v16, %v1610_v15 }
 0x393   : > { %1639 = vst [vmem:[%s251_s8 + $0x8] sm:$0xff] %v1769_v49 }
 0x39d   : > { %v1989_v18 = vpop.permute.xlu1 %1988 }
 0x39e   : > { %v1991_v19 = vunpack.i.h.bf16 %v1989_v18  ;;  %v1990_v5 = vunpack.i.l.bf16 %v1989_v18 }
 0x3a0   : > { %v1612_v20 = vsel %vm289_vm1, %v1440_v54, %v1990_v5  ;;  %v1613_v55 = vsel %vm289_vm1, %v1532_v62, %v1991_v19 }
 0x3a1   : > { %v1770_v22 = vpack.c.bf16 %v1613_v55, %v1612_v20 }
 0x3a3   : > { %1640 = vst [vmem:[%s251_s8 + $0x10] sm:$0xff] %v1770_v22 }
 0x3a4 PF: > { %s14_s15 = sadd.s32 1, %s2046_s15  }
 0x3a5   : > { %p11_p4 = scmp.ge.s32.totalorder %s14_s15, 4  }
 0x3a7   :  { %13 = sbr.rel (!%p11_p4) target bundleno = 1 (0x1), region = 75 }

// kernel: longformer_forward.25
= control target key start
LH: loop header
LB: loop body
LE: loop exit
PB: predicated region body
PF: predicated region fallthrough
CT: control target
= control target key end

     0   :  { %s1214_s12 = smov 0   ;;  %s1216_s13 = smov 0   ;;  %s1501_s0 = inlined_call_operand.vmem [shape: bf16[16,768], index: 0, kind: input, shape index: {}]   ;;  %s1502_s1 = inlined_call_operand.vmem [shape: bf16[768,2304], index: 1, kind: input, shape index: {}]   ;;  %s1503_s2 = inlined_call_operand.vmem [shape: f32[1,2304], index: 2, kind: input, shape index: {}]   ;;  %s1504_s3 = inlined_call_operand.vmem [shape: bf16[16,2304], index: 3, kind: output, shape index: {}]  }
   0x1   :  { %s1218_s14 = smov 0   ;;  %s1220_s15 = smov 0  }
   0x2   :  { %s1222_s16 = smov 0   ;;  %s1224_s17 = smov 0  }
   0x3   :  { %s1226_s18 = smov 0   ;;  %s1228_s19 = smov 0  }
   0x4   :  { %s1230_s20 = smov 0   ;;  %s1232_s21 = smov 0  }
   0x5   :  { %s1234_s22 = smov 0  }
   0x6 LB: > { %s900_s23 = sadd.s32 4294967295, %s1191_s22   ;;  %s25_s24 = sadd.s32 1, %s1183_s20  ;;  %s1191_s22 = sphi %s1234_s22, %s13_s22   ;;  %s1187_s21 = sphi %s1232_s21, %s1525_s21   ;;  %s1183_s20 = sphi %s1230_s20, %s1524_s20   ;;  %s1179_s19 = sphi %s1228_s19, %s1523_s19   ;;  %s1175_s18 = sphi %s1226_s18, %s1522_s18   ;;  %s1171_s17 = sphi %s1224_s17, %s1521_s17   ;;  %s1167_s16 = sphi %s1222_s16, %s1520_s16   ;;  %s1163_s15 = sphi %s1220_s15, %s1519_s15   ;;  %s1159_s14 = sphi %s1218_s14, %s1518_s14   ;;  %s1155_s13 = sphi %s1216_s13, %s1517_s13   ;;  %s1151_s12 = sphi %s1214_s12, %s1516_s12  }
   0x7   : > { %p26_p0 = scmp.ge.s32.totalorder %s25_s24, 3  ;;  %s28_s25 = sadd.s32 1, %s1187_s21 }
   0x8   : > { %s41_s26 = sadd.s32 1, %s1171_s17  ;;  %p48_p1 = scmp.ne.s32.totalorder %s1171_s17, %s1167_s16 }
   0x9   : > { %s1527_s24 = smov (%p26_p0, %s25_s24), 0  ;;  %s1529_s25 = smov (!%p26_p0, %s28_s25), %s1187_s21 }
   0xa   : > { %1507 = sst [smem:[#allocation6_spill]] %s1527_s24  ;;  %s37_s27 = ssub.s32 %s1183_s20, %s1527_s24 }
   0xb   : > { %p49_p2 = scmp.eq.s32.totalorder %s1191_s22, 0  ;;  %p30_p3 = scmp.ge.s32.totalorder %s1529_s25, 9 }
   0xc   : > { %p39_p4 = scmp.eq.s32.totalorder %s37_s27, 0  ;;  %s69_s29 = sadd.s32 1, %s1163_s15 }
   0xd   : > { %p1281_p5 = por %p49_p2, %p48_p1  ;;  %s1531_s25 = smov (%p30_p3, %s1529_s25), 0 }
   0xe   : > { %1509 = sst [smem:[#allocation7_spill]] %s1531_s25  ;;  %s65_s4 = ssub.s32 %s1187_s21, %s1531_s25 }
   0xf   : > { %s1289_s30 = scalar_select %p39_p4, %s1171_s17, %s41_s26  }
  0x10   : > { %p76_p6 = scmp.ne.s32.totalorder %s1163_s15, %s1159_s14  ;;  %s66_s5 = sor.u32 %s65_s4, %s37_s27 }
  0x11   : > { %1510 = sst [smem:[#allocation8_spill]] %s1289_s30  ;;  %p121_p7 = scmp.eq.s32.totalorder %s65_s4, 0 }
  0x12   : > { %p67_p8 = scmp.eq.s32.totalorder %s66_s5, 0  ;;  %p1295_p9 = por %p76_p6, %p49_p2 }
  0x13   : > { %s123_s7 = sadd.s32 1, %s1155_s13  ;;  %p133_p10 = scmp.ne.s32.totalorder %s1155_s13, %s1151_s12 }
  0x14   : > { %s1303_s8 = scalar_select %p67_p8, %s1163_s15, %s69_s29  }
  0x15   : > { %s1306_s9 = scalar_select %p121_p7, %s1155_s13, %s123_s7  }
  0x16   : > { %p134_p11 = scmp.eq.s32.totalorder %s900_s23, 26  ;;  %p903_p13 = scmp.ge.s32.totalorder %s1191_s22, 27 }
  0x18   : > { %p1308_p12 = por %p134_p11, %p133_p10  ;;  %156 = sbr.rel (%p903_p13) target bundleno = 62 (0x3e), region = 16 }
  0x1f   : > { %159 = sbr.rel (!%p1281_p5) target bundleno = 38 (0x26), region = 20  ;;  %s161_s11 = sand.u32 (%p1281_p5), 1, %s1171_s17  }
  0x20   : > { %s960_s26 = sshll.u32 (%p1281_p5), %s1183_s20, 3  ;;  %s904_s27 = sshll.u32 (%p1281_p5), %s161_s11, 4 }
  0x21   : > { %s169_s5 = scalar_lea.vmem (%p1281_p5), %s1501_s0, %s960_s26  ;;  %s163_s23 = scalar_lea.vmem (%p1281_p5), [#allocation3], %s904_s27 }
  0x22   : > { %v199_v0 = vld [vmem:[%s169_s5] sm:$0xff] (%p1281_p5)  ;;  %v201_v1 = vld [vmem:[%s169_s5 + $0x18] sm:$0xff] (%p1281_p5) }
  0x23   : > { %200 = vst [vmem:[%s163_s23] sm:$0xff] (%p1281_p5), %v199_v0  ;;  %202 = vst [vmem:[%s163_s23 + $0x8] sm:$0xff] (%p1281_p5), %v201_v1 }
  0x26 PF: > { %208 = sbr.rel (!%p1295_p9) target bundleno = 62 (0x3e), region = 58  ;;  %s210_s28 = sand.u32 (%p1295_p9), 1, %s1163_s15  }
  0x27   : > { %s909_s7 = sshll.u32 (%p1295_p9), %s1187_s21, 1  ;;  %s907_s25 = sshll.u32 (%p1295_p9), %s210_s28, 8 }
  0x28   : > { %s964_s11 = smul.u32 (%p1295_p9), 576, %s1183_s20  ;;  %s1333_s6 = scalar_lea.vmem (%p1295_p9), [#allocation4], %s907_s25 }
  0x2a   : > { %s216_s24 = sadd.s32 (%p1295_p9), %s964_s11, %s909_s7 }
  0x2b   : > { %s911_s30 = sshll.u32 (%p1295_p9), %s216_s24, 2 }
  0x2c   : > { %s1328_s4 = scalar_lea.vmem (%p1295_p9), %s1502_s1, %s911_s30 }
  0x2d   : > { %v308_v2 = vld [vmem:[%s1328_s4] sm:$0xff]  ;;  %v310_v3 = vld [vmem:[%s1328_s4 + $0x48] sm:$0xff]  ;;  %v312_v4 = vld [vmem:[%s1328_s4 + $0x90] sm:$0xff] }
  0x2e   : > { %309 = vst [vmem:[%s1333_s6] sm:$0xff] %v308_v2  ;;  %311 = vst [vmem:[%s1333_s6 + $0x8] sm:$0xff] %v310_v3  ;;  %v314_v5 = vld [vmem:[%s1328_s4 + $0xd8] sm:$0xff]  ;;  %v316_v6 = vld [vmem:[%s1328_s4 + $0x120] sm:$0xff] }
  0x2f   : > { %313 = vst [vmem:[%s1333_s6 + $0x10] sm:$0xff] %v312_v4  ;;  %v318_v7 = vld [vmem:[%s1328_s4 + $0x168] sm:$0xff]  ;;  %315 = vst [vmem:[%s1333_s6 + $0x18] sm:$0xff] %v314_v5  ;;  %v320_v8 = vld [vmem:[%s1328_s4 + $0x1b0] sm:$0xff] }
  0x30   : > { %317 = vst [vmem:[%s1333_s6 + $0x20] sm:$0xff] %v316_v6  ;;  %319 = vst [vmem:[%s1333_s6 + $0x28] sm:$0xff] %v318_v7  ;;  %v322_v9 = vld [vmem:[%s1328_s4 + $0x1f8] sm:$0xff]  ;;  %v324_v10 = vld [vmem:[%s1328_s4 + $0x240] sm:$0xff] }
  0x31   : > { %321 = vst [vmem:[%s1333_s6 + $0x30] sm:$0xff] %v320_v8  ;;  %323 = vst [vmem:[%s1333_s6 + $0x38] sm:$0xff] %v322_v9  ;;  %v326_v11 = vld [vmem:[%s1328_s4 + $0x288] sm:$0xff]  ;;  %v328_v12 = vld [vmem:[%s1328_s4 + $0x2d0] sm:$0xff] }
  0x32   : > { %325 = vst [vmem:[%s1333_s6 + $0x40] sm:$0xff] %v324_v10  ;;  %v330_v13 = vld [vmem:[%s1328_s4 + $0x318] sm:$0xff]  ;;  %327 = vst [vmem:[%s1333_s6 + $0x48] sm:$0xff] %v326_v11  ;;  %v332_v14 = vld [vmem:[%s1328_s4 + $0x360] sm:$0xff] }
  0x33   : > { %329 = vst [vmem:[%s1333_s6 + $0x50] sm:$0xff] %v328_v12  ;;  %331 = vst [vmem:[%s1333_s6 + $0x58] sm:$0xff] %v330_v13  ;;  %v334_v15 = vld [vmem:[%s1328_s4 + $0x3a8] sm:$0xff]  ;;  %v336_v16 = vld [vmem:[%s1328_s4 + $0x3f0] sm:$0xff] }
  0x34   : > { %333 = vst [vmem:[%s1333_s6 + $0x60] sm:$0xff] %v332_v14  ;;  %335 = vst [vmem:[%s1333_s6 + $0x68] sm:$0xff] %v334_v15  ;;  %v338_v17 = vld [vmem:[%s1328_s4 + $0x438] sm:$0xff]  ;;  %v340_v18 = vld [vmem:[%s1328_s4 + $0x480] sm:$0xff] }
  0x35   : > { %337 = vst [vmem:[%s1333_s6 + $0x70] sm:$0xff] %v336_v16  ;;  %v342_v19 = vld [vmem:[%s1328_s4 + $0x4c8] sm:$0xff]  ;;  %339 = vst [vmem:[%s1333_s6 + $0x78] sm:$0xff] %v338_v17  ;;  %v344_v20 = vld [vmem:[%s1328_s4 + $0x510] sm:$0xff] }
  0x36   : > { %341 = vst [vmem:[%s1333_s6 + $0x80] sm:$0xff] %v340_v18  ;;  %343 = vst [vmem:[%s1333_s6 + $0x88] sm:$0xff] %v342_v19  ;;  %v346_v21 = vld [vmem:[%s1328_s4 + $0x558] sm:$0xff]  ;;  %v348_v22 = vld [vmem:[%s1328_s4 + $0x5a0] sm:$0xff] }
  0x37   : > { %345 = vst [vmem:[%s1333_s6 + $0x90] sm:$0xff] %v344_v20  ;;  %347 = vst [vmem:[%s1333_s6 + $0x98] sm:$0xff] %v346_v21  ;;  %v350_v23 = vld [vmem:[%s1328_s4 + $0x5e8] sm:$0xff]  ;;  %v352_v24 = vld [vmem:[%s1328_s4 + $0x630] sm:$0xff] }
  0x38   : > { %349 = vst [vmem:[%s1333_s6 + $0xa0] sm:$0xff] %v348_v22  ;;  %v354_v25 = vld [vmem:[%s1328_s4 + $0x678] sm:$0xff]  ;;  %351 = vst [vmem:[%s1333_s6 + $0xa8] sm:$0xff] %v350_v23  ;;  %v356_v26 = vld [vmem:[%s1328_s4 + $0x6c0] sm:$0xff] }
  0x39   : > { %353 = vst [vmem:[%s1333_s6 + $0xb0] sm:$0xff] %v352_v24  ;;  %355 = vst [vmem:[%s1333_s6 + $0xb8] sm:$0xff] %v354_v25  ;;  %v358_v27 = vld [vmem:[%s1328_s4 + $0x708] sm:$0xff]  ;;  %v360_v28 = vld [vmem:[%s1328_s4 + $0x750] sm:$0xff] }
  0x3a   : > { %357 = vst [vmem:[%s1333_s6 + $0xc0] sm:$0xff] %v356_v26  ;;  %359 = vst [vmem:[%s1333_s6 + $0xc8] sm:$0xff] %v358_v27  ;;  %v362_v29 = vld [vmem:[%s1328_s4 + $0x798] sm:$0xff]  ;;  %v364_v30 = vld [vmem:[%s1328_s4 + $0x7e0] sm:$0xff] }
  0x3b   : > { %361 = vst [vmem:[%s1333_s6 + $0xd0] sm:$0xff] %v360_v28  ;;  %v366_v31 = vld [vmem:[%s1328_s4 + $0x828] sm:$0xff]  ;;  %363 = vst [vmem:[%s1333_s6 + $0xd8] sm:$0xff] %v362_v29  ;;  %v368_v32 = vld [vmem:[%s1328_s4 + $0x870] sm:$0xff] }
  0x3c   : > { %365 = vst [vmem:[%s1333_s6 + $0xe0] sm:$0xff] %v364_v30  ;;  %367 = vst [vmem:[%s1333_s6 + $0xe8] sm:$0xff] %v366_v31  ;;  %v370_v33 = vld [vmem:[%s1328_s4 + $0x8b8] sm:$0xff] }
  0x3d   : > { %369 = vst [vmem:[%s1333_s6 + $0xf0] sm:$0xff] %v368_v32  ;;  %371 = vst [vmem:[%s1333_s6 + $0xf8] sm:$0xff] %v370_v33 }
  0x3e PF: > { %p912_p0 = scmp.ge.s32.totalorder %s1191_s22, 1  ;;  %p384_p1 = scmp.lt.s32.totalorder %s1191_s22, 28 }
  0x40   : > { %p385_p2 = pnand %p912_p0, %p384_p1 }
  0x41   : > { %s391_s24 = sand.u32 (!%p385_p2), 1, %s1167_s16   ;;  %s398_s25 = sand.u32 (!%p385_p2), 1, %s1159_s14  }
  0x42   : > { %388 = sbr.rel (%p385_p2) target bundleno = 383 (0x17f), region = 100  ;;  %s1400_s30 = sshll.u32 (!%p385_p2), %s391_s24, 4 }
  0x43   : > { %s914_s27 = sshll.u32 (!%p385_p2), %s398_s25, 8  ;;  %s425_s5 = sand.u32 (!%p385_p2), 1, %s1151_s12  }
  0x44   : > { %s916_s23 = sshll.u32 (!%p385_p2), %s1179_s19, 1  ;;  %s915_s28 = sshll.u32 (!%p385_p2), %s425_s5, 4 }
  0x45   : > { %p433_p3 = scmp.lt.s32.totalorder (!%p385_p2), %s916_s23, 17  ;;  %s393_s26 = scalar_lea.vmem (!%p385_p2), [#allocation3], %s1400_s30 }
  0x46   : > { %s1411_s4 = scalar_lea.vmem (!%p385_p2), [#allocation4], %s914_s27  ;;  %s1413_s16 = scalar_lea.vmem (!%p385_p2), [#allocation5], %s915_s28 }
  0x47   : > { %p917_p4 = scmp.ne.s32.totalorder (!%p385_p2), %s1175_s18, 0 }
  0x49   : > { %s1533_s23 = smov (!%p433_p3, %s916_s23), 17  ;;  %442 = sbr.rel (%p917_p4) target bundleno = 80 (0x50), region = 112 }
  0x4a   : > { %s435_s29 = scalar_lea.vmem %s1503_s2, %s1533_s23  ;;  %v1193_v34 = vmov (!%p917_p4), 0.0  }
  0x4b   : > { %443 = vst [vmem:[#allocation2] sm:$0xff] (!%p917_p4), %v1193_v34  ;;  %444 = vst [vmem:[#allocation2 + $0x8] sm:$0xff] (!%p917_p4), %v1193_v34 }
  0x4c   : > { %445 = vst [vmem:[#allocation2 + $0x10] sm:$0xff] (!%p917_p4), %v1193_v34  ;;  %446 = vst [vmem:[#allocation2 + $0x18] sm:$0xff] (!%p917_p4), %v1193_v34 }
  0x50 PF: > { %v1054_v35 = vld [vmem:[%s1411_s4 + $0x4] ss:$8 sps:$4 sm:$0xff]   ;;  %v1056_v36 = vld [vmem:[%s1411_s4] ss:$8 sps:$4 sm:$0xff]   ;;  %v1057_v37 = vld [vmem:[%s1411_s4 + $0x14] ss:$8 sps:$4 sm:$0xff]  }
  0x51   : > { %655 = vmatprep.subr.bf16.mxu0 %v1054_v35  ;;  %v1059_v38 = vld [vmem:[%s1411_s4 + $0x10] ss:$8 sps:$4 sm:$0xff]   ;;  %v1060_v39 = vld [vmem:[%s1411_s4 + $0x24] ss:$8 sps:$4 sm:$0xff]   ;;  %v1062_v40 = vld [vmem:[%s1411_s4 + $0x20] ss:$8 sps:$4 sm:$0xff]  }
  0x52   : > { %656 = vmatpush1.bf16.msra.mxu0 %v1056_v36  ;;  %v1063_v41 = vld [vmem:[%s1411_s4 + $0x34] ss:$8 sps:$4 sm:$0xff]   ;;  %v1065_v42 = vld [vmem:[%s1411_s4 + $0x30] ss:$8 sps:$4 sm:$0xff]   ;;  %v1066_v43 = vld [vmem:[%s1411_s4 + $0x44] ss:$8 sps:$4 sm:$0xff]  }
  0x53   : > { %657 = vmatprep.subr.bf16.mxu0 %v1057_v37  ;;  %v1068_v44 = vld [vmem:[%s1411_s4 + $0x40] ss:$8 sps:$4 sm:$0xff]   ;;  %v1069_v45 = vld [vmem:[%s1411_s4 + $0x54] ss:$8 sps:$4 sm:$0xff]   ;;  %v1071_v46 = vld [vmem:[%s1411_s4 + $0x50] ss:$8 sps:$4 sm:$0xff]  }
  0x54   : > { %v1072_v47 = vld [vmem:[%s1411_s4 + $0x64] ss:$8 sps:$4 sm:$0xff]   ;;  %v1074_v49 = vld [vmem:[%s1411_s4 + $0x60] ss:$8 sps:$4 sm:$0xff]   ;;  %v1075_v50 = vld [vmem:[%s1411_s4 + $0x74] ss:$8 sps:$4 sm:$0xff]  }
  0x55   : > { %v1104_v48 = vld [vmem:[%s393_s26 + $0x4] ss:$8 sps:$4 sm:$0xff]   ;;  %v1077_v51 = vld [vmem:[%s1411_s4 + $0x70] ss:$8 sps:$4 sm:$0xff]   ;;  %v1080_v53 = vld [vmem:[%s1411_s4 + $0x80] ss:$8 sps:$4 sm:$0xff]  }
  0x56   : > { %658 = vmatpush1.bf16.msra.mxu0 %v1059_v38  ;;  %687 = vmatprep.mubr.bf16.mxu0 %v1104_v48  ;;  %v1078_v52 = vld [vmem:[%s1411_s4 + $0x84] ss:$8 sps:$4 sm:$0xff]   ;;  %v1081_v54 = vld [vmem:[%s1411_s4 + $0x94] ss:$8 sps:$4 sm:$0xff]   ;;  %v1083_v55 = vld [vmem:[%s1411_s4 + $0x90] ss:$8 sps:$4 sm:$0xff]  }
  0x57   : > { %659 = vmatprep.subr.bf16.mxu0 %v1060_v39  ;;  %v1084_v56 = vld [vmem:[%s1411_s4 + $0xa4] ss:$8 sps:$4 sm:$0xff]   ;;  %v1086_v57 = vld [vmem:[%s1411_s4 + $0xa0] ss:$8 sps:$4 sm:$0xff]   ;;  %v1087_v58 = vld [vmem:[%s1411_s4 + $0xb4] ss:$8 sps:$4 sm:$0xff]  }
  0x58   : > { %v1089_v59 = vld [vmem:[%s1411_s4 + $0xb0] ss:$8 sps:$4 sm:$0xff]   ;;  %v1090_v60 = vld [vmem:[%s1411_s4 + $0xc4] ss:$8 sps:$4 sm:$0xff]   ;;  %v1092_v61 = vld [vmem:[%s1411_s4 + $0xc0] ss:$8 sps:$4 sm:$0xff]  }
  0x59   : > { %v1093_v62 = vld [vmem:[%s1411_s4 + $0xd4] ss:$8 sps:$4 sm:$0xff]   ;;  %v1095_v63 = vld [vmem:[%s1411_s4 + $0xd0] ss:$8 sps:$4 sm:$0xff]   ;;  %v1096_v0 = vld [vmem:[%s1411_s4 + $0xe4] ss:$8 sps:$4 sm:$0xff]  }
  0x5a   : > { %660 = vmatpush1.bf16.msra.mxu0 %v1062_v40  ;;  %v1098_v1 = vld [vmem:[%s1411_s4 + $0xe0] ss:$8 sps:$4 sm:$0xff]   ;;  %v1099_v2 = vld [vmem:[%s1411_s4 + $0xf4] ss:$8 sps:$4 sm:$0xff]   ;;  %v1101_v3 = vld [vmem:[%s1411_s4 + $0xf0] ss:$8 sps:$4 sm:$0xff]  }
  0x5b   : > { %661 = vmatprep.subr.bf16.mxu0 %v1063_v41  ;;  %v1102_v4 = vld [vmem:[%s393_s26] ss:$8 sps:$4 sm:$0xff]   ;;  %p952_p5 = scmp.ne.s32.totalorder %s1175_s18, 2 }
  0x5c   : > { %v447_v5 = vld [vmem:[#allocation2] sm:$0xff]  ;;  %v448_v6 = vld [vmem:[#allocation2 + $0x8] sm:$0xff]  ;;  %v449_v8 = vld [vmem:[#allocation2 + $0x10] sm:$0xff]  ;;  %v716_v17 = vlaneseq (!%p952_p5) }
  0x5d   : > { %v450_v11 = vld [vmem:[#allocation2 + $0x18] sm:$0xff]  ;;  %v714_v19 = vld [vmem:[%s435_s29] sm:$0x3] (!%p952_p5) }
  0x5e   : > { %662 = vmatpush1.bf16.msra.mxu0 %v1065_v42  ;;  %v717_v18 = vshrl.u32 (!%p952_p5), %v716_v17, 7 }
  0x5f   : > { %663 = vmatprep.subr.bf16.mxu0 %v1066_v43 }
  0x60   : > { %v718_v21 = vsub.s32 (!%p952_p5), 0, %v717_v18  ;;  %v722_v22 = vsub.s32 (!%p952_p5), 1, %v717_v18 }
  0x62   : > { %664 = vmatpush1.bf16.msra.mxu0 %v1068_v44  ;;  %v719_v26 = vrot.slane (!%p952_p5), %v714_v19, %v718_v21  ;;  %v723_v27 = vrot.slane (!%p952_p5), %v714_v19, %v722_v22 }
  0x63   : > { %665 = vmatprep.subr.bf16.mxu0 %v1069_v45 }
  0x66   : > { %666 = vmatpush1.bf16.msra.mxu0 %v1071_v46 }
  0x67   : > { %667 = vmatprep.subr.bf16.mxu0 %v1072_v47 }
  0x6a   : > { %668 = vmatpush1.bf16.msra.mxu0 %v1074_v49 }
  0x6b   : > { %669 = vmatprep.subr.bf16.mxu0 %v1075_v50 }
  0x6e   : > { %670 = vmatpush1.bf16.msra.mxu0 %v1077_v51 }
  0x6f   : > { %671 = vmatprep.subr.bf16.mxu0 %v1078_v52 }
  0x72   : > { %672 = vmatpush1.bf16.msra.mxu0 %v1080_v53 }
  0x73   : > { %673 = vmatprep.subr.bf16.mxu0 %v1081_v54 }
  0x76   : > { %674 = vmatpush1.bf16.msra.mxu0 %v1083_v55 }
  0x77   : > { %675 = vmatprep.subr.bf16.mxu0 %v1084_v56 }
  0x7a   : > { %676 = vmatpush1.bf16.msra.mxu0 %v1086_v57 }
  0x7b   : > { %677 = vmatprep.subr.bf16.mxu0 %v1087_v58 }
  0x7e   : > { %678 = vmatpush1.bf16.msra.mxu0 %v1089_v59 }
  0x7f   : > { %679 = vmatprep.subr.bf16.mxu0 %v1090_v60 }
  0x82   : > { %680 = vmatpush1.bf16.msra.mxu0 %v1092_v61 }
  0x83   : > { %681 = vmatprep.subr.bf16.mxu0 %v1093_v62 }
  0x86   : > { %682 = vmatpush1.bf16.msra.mxu0 %v1095_v63 }
  0x87   : > { %683 = vmatprep.subr.bf16.mxu0 %v1096_v0 }
  0x8a   : > { %684 = vmatpush1.bf16.msra.mxu0 %v1098_v1 }
  0x8b   : > { %685 = vmatprep.subr.bf16.mxu0 %v1099_v2 }
  0x8e   : > { %686 = vmatpush1.bf16.msra.mxu0 %v1101_v3 }
  0x91   : > { %688 = vmatmul.mubr.bf16.vlgmr.msra.gmra.mrb[0].mxu0 %v1102_v4 }
 0x164   : > { %v689_v7 = vpop.f32.mrb[0].mxu0  ;;  %709 = sbr.rel (%p952_p5) target bundleno = 375 (0x177), region = 116 }
 0x165   : > { %v698_v9 = vadd.f32 %v689_v7, %v447_v5  ;;  %v691_v10 = vpop.f32.mrb[1].mxu0 }
 0x166   : > { %v699_v12 = vadd.f32 %v691_v10, %v448_v6  ;;  %v693_v13 = vpop.f32.mrb[2].mxu0 }
 0x167   : > { %702 = vst [vmem:[#allocation2] sm:$0xff] %v698_v9  ;;  %v700_v14 = vadd.f32 %v693_v13, %v449_v8  ;;  %v695_v15 = vpop.f32.mrb[3].mxu0 }
 0x168   : > { %703 = vst [vmem:[#allocation2 + $0x8] sm:$0xff] %v699_v12  ;;  %v701_v16 = vadd.f32 %v695_v15, %v450_v11 }
 0x169   : > { %704 = vst [vmem:[#allocation2 + $0x10] sm:$0xff] %v700_v14 }
 0x16a   : > { %705 = vst [vmem:[#allocation2 + $0x18] sm:$0xff] %v701_v16 }
 0x16e   : > { %v710_v20 = vld [vmem:[#allocation2] sm:$0xff] }
 0x16f   : > { %v711_v23 = vld [vmem:[#allocation2 + $0x8] sm:$0xff]  ;;  %v726_v28 = vadd.f32 %v719_v26, %v710_v20 }
 0x170   : > { %v712_v24 = vld [vmem:[#allocation2 + $0x10] sm:$0xff]  ;;  %v727_v29 = vadd.f32 %v723_v27, %v711_v23 }
 0x171   : > { %v713_v25 = vld [vmem:[#allocation2 + $0x18] sm:$0xff]  ;;  %v728_v30 = vadd.f32 %v719_v26, %v712_v24 }
 0x172   : > { %v729_v31 = vadd.f32 %v723_v27, %v713_v25  ;;  %v961_v32 = vpack.c.bf16 %v727_v29, %v726_v28 }
 0x174   : > { %v962_v33 = vpack.c.bf16 %v729_v31, %v728_v30  ;;  %742 = vst [vmem:[%s1413_s16] sm:$0xff] %v961_v32 }
 0x176   : > { %743 = vst [vmem:[%s1413_s16 + $0x8] sm:$0xff] %v962_v33 }
 0x177 PF: > { %750 = sbr.rel (!%p1308_p12) target bundleno = 383 (0x17f), region = 120  ;;  %s963_s18 = sshll.u32 (%p1308_p12), %s1179_s19, 3 }
 0x178   : > { %s756_s25 = scalar_lea.vmem (%p1308_p12), %s1504_s3, %s963_s18 }
 0x17b   : > { %v786_v34 = vld [vmem:[%s1413_s16] sm:$0xff] (%p1308_p12) }
 0x17c   : > { %787 = vst [vmem:[%s756_s25] sm:$0xff] (%p1308_p12), %v786_v34 }
 0x17d   : > { %v788_v35 = vld [vmem:[%s1413_s16 + $0x8] sm:$0xff] (%p1308_p12) }
 0x17e   : > { %789 = vst [vmem:[%s756_s25 + $0x48] sm:$0xff] %v788_v35 }
 0x17f PF: > { %s13_s22 = sadd.s32 1, %s1191_s22   ;;  %s1513_s10 = sld [smem:[#allocation8_spill]] }
 0x180   : > { %p10_p6 = scmp.ge.s32.totalorder %s13_s22, 29   ;;  %s1514_s30 = sld [smem:[#allocation6_spill]] }
 0x181   : > { %s1515_s27 = sld [smem:[#allocation7_spill]]  ;;  %s1516_s12 = smov %s1155_s13 }
 0x182   : > { %s1517_s13 = smov %s1306_s9  ;;  %s1518_s14 = smov %s1163_s15 }
 0x183   : > { %s1519_s15 = smov %s1303_s8  ;;  %s1520_s16 = smov %s1171_s17 }
 0x184   : > { %s1522_s18 = smov %s1183_s20  ;;  %s1523_s19 = smov %s1187_s21 }
 0x185   : > { %s1521_s17 = smov %s1513_s10  ;;  %12 = sbr.rel (!%p10_p6) target bundleno = 6 (0x6), region = 200 }
 0x186   : > { %s1524_s20 = smov %s1514_s30 }
 0x187   : > { %s1525_s21 = smov %s1515_s27 }

// kernel: longformer_forward.23
= control target key start
LH: loop header
LB: loop body
LE: loop exit
PB: predicated region body
PF: predicated region fallthrough
CT: control target
= control target key end

     0   :  { %s1214_s12 = smov 0   ;;  %s1216_s13 = smov 0   ;;  %s1501_s0 = inlined_call_operand.vmem [shape: bf16[16,3072], index: 0, kind: input, shape index: {}]   ;;  %s1502_s1 = inlined_call_operand.vmem [shape: bf16[3072,768], index: 1, kind: input, shape index: {}]   ;;  %s1503_s2 = inlined_call_operand.vmem [shape: f32[1,768], index: 2, kind: input, shape index: {}]   ;;  %s1504_s3 = inlined_call_operand.vmem [shape: bf16[16,768], index: 3, kind: output, shape index: {}]  }
   0x1   :  { %s1218_s14 = smov 0   ;;  %s1220_s15 = smov 0  }
   0x2   :  { %s1222_s16 = smov 0   ;;  %s1224_s17 = smov 0  }
   0x3   :  { %s1226_s18 = smov 0   ;;  %s1228_s19 = smov 0  }
   0x4   :  { %s1230_s20 = smov 0   ;;  %s1232_s21 = smov 0  }
   0x5   :  { %s1234_s22 = smov 0  }
   0x6 LB: > { %s900_s23 = sadd.s32 4294967295, %s1191_s22   ;;  %s25_s24 = sadd.s32 1, %s1183_s20  ;;  %s1191_s22 = sphi %s1234_s22, %s13_s22   ;;  %s1187_s21 = sphi %s1232_s21, %s1525_s21   ;;  %s1183_s20 = sphi %s1230_s20, %s1524_s20   ;;  %s1179_s19 = sphi %s1228_s19, %s1523_s19   ;;  %s1175_s18 = sphi %s1226_s18, %s1522_s18   ;;  %s1171_s17 = sphi %s1224_s17, %s1521_s17   ;;  %s1167_s16 = sphi %s1222_s16, %s1520_s16   ;;  %s1163_s15 = sphi %s1220_s15, %s1519_s15   ;;  %s1159_s14 = sphi %s1218_s14, %s1518_s14   ;;  %s1155_s13 = sphi %s1216_s13, %s1517_s13   ;;  %s1151_s12 = sphi %s1214_s12, %s1516_s12  }
   0x7   : > { %p26_p0 = scmp.ge.s32.totalorder %s25_s24, 12  ;;  %s28_s25 = sadd.s32 1, %s1187_s21 }
   0x8   : > { %s41_s26 = sadd.s32 1, %s1171_s17  ;;  %p48_p1 = scmp.ne.s32.totalorder %s1171_s17, %s1167_s16 }
   0x9   : > { %s1527_s24 = smov (%p26_p0, %s25_s24), 0  ;;  %s1529_s25 = smov (!%p26_p0, %s28_s25), %s1187_s21 }
   0xa   : > { %1507 = sst [smem:[#allocation6_spill]] %s1527_s24  ;;  %s37_s27 = ssub.s32 %s1183_s20, %s1527_s24 }
   0xb   : > { %p49_p2 = scmp.eq.s32.totalorder %s1191_s22, 0  ;;  %p30_p3 = scmp.ge.s32.totalorder %s1529_s25, 3 }
   0xc   : > { %p39_p4 = scmp.eq.s32.totalorder %s37_s27, 0  ;;  %s69_s29 = sadd.s32 1, %s1163_s15 }
   0xd   : > { %p1281_p5 = por %p49_p2, %p48_p1  ;;  %s1531_s25 = smov (%p30_p3, %s1529_s25), 0 }
   0xe   : > { %1509 = sst [smem:[#allocation7_spill]] %s1531_s25  ;;  %s65_s4 = ssub.s32 %s1187_s21, %s1531_s25 }
   0xf   : > { %s1289_s30 = scalar_select %p39_p4, %s1171_s17, %s41_s26  }
  0x10   : > { %p76_p6 = scmp.ne.s32.totalorder %s1163_s15, %s1159_s14  ;;  %s66_s5 = sor.u32 %s65_s4, %s37_s27 }
  0x11   : > { %1510 = sst [smem:[#allocation8_spill]] %s1289_s30  ;;  %p121_p7 = scmp.eq.s32.totalorder %s65_s4, 0 }
  0x12   : > { %p67_p8 = scmp.eq.s32.totalorder %s66_s5, 0  ;;  %p1295_p9 = por %p76_p6, %p49_p2 }
  0x13   : > { %s123_s7 = sadd.s32 1, %s1155_s13  ;;  %p133_p10 = scmp.ne.s32.totalorder %s1155_s13, %s1151_s12 }
  0x14   : > { %s1303_s8 = scalar_select %p67_p8, %s1163_s15, %s69_s29  }
  0x15   : > { %s1306_s9 = scalar_select %p121_p7, %s1155_s13, %s123_s7  }
  0x16   : > { %p134_p11 = scmp.eq.s32.totalorder %s900_s23, 35  ;;  %p903_p13 = scmp.ge.s32.totalorder %s1191_s22, 36 }
  0x18   : > { %p1308_p12 = por %p134_p11, %p133_p10  ;;  %156 = sbr.rel (%p903_p13) target bundleno = 62 (0x3e), region = 16 }
  0x1f   : > { %159 = sbr.rel (!%p1281_p5) target bundleno = 38 (0x26), region = 20  ;;  %s161_s11 = sand.u32 (%p1281_p5), 1, %s1171_s17  }
  0x20   : > { %s960_s26 = sshll.u32 (%p1281_p5), %s1183_s20, 3  ;;  %s904_s27 = sshll.u32 (%p1281_p5), %s161_s11, 4 }
  0x21   : > { %s169_s5 = scalar_lea.vmem (%p1281_p5), %s1501_s0, %s960_s26  ;;  %s163_s23 = scalar_lea.vmem (%p1281_p5), [#allocation3], %s904_s27 }
  0x22   : > { %v199_v0 = vld [vmem:[%s169_s5] sm:$0xff] (%p1281_p5) }
  0x23   : > { %v201_v1 = vld [vmem:[%s169_s5 + $0x60] sm:$0xff] (%p1281_p5)  ;;  %200 = vst [vmem:[%s163_s23] sm:$0xff] (%p1281_p5), %v199_v0 }
  0x24   : > { %202 = vst [vmem:[%s163_s23 + $0x8] sm:$0xff] (%p1281_p5), %v201_v1 }
  0x26 PF: > { %208 = sbr.rel (!%p1295_p9) target bundleno = 62 (0x3e), region = 58  ;;  %s210_s28 = sand.u32 (%p1295_p9), 1, %s1163_s15  }
  0x27   : > { %s909_s7 = sshll.u32 (%p1295_p9), %s1187_s21, 1  ;;  %s907_s25 = sshll.u32 (%p1295_p9), %s210_s28, 8 }
  0x28   : > { %s964_s11 = smul.u32 (%p1295_p9), 192, %s1183_s20  ;;  %s1333_s6 = scalar_lea.vmem (%p1295_p9), [#allocation4], %s907_s25 }
  0x2a   : > { %s216_s24 = sadd.s32 (%p1295_p9), %s964_s11, %s909_s7 }
  0x2b   : > { %s911_s30 = sshll.u32 (%p1295_p9), %s216_s24, 2 }
  0x2c   : > { %s1328_s4 = scalar_lea.vmem (%p1295_p9), %s1502_s1, %s911_s30 }
  0x2d   : > { %v308_v2 = vld [vmem:[%s1328_s4] sm:$0xff]  ;;  %v310_v3 = vld [vmem:[%s1328_s4 + $0x18] sm:$0xff]  ;;  %v312_v4 = vld [vmem:[%s1328_s4 + $0x30] sm:$0xff] }
  0x2e   : > { %309 = vst [vmem:[%s1333_s6] sm:$0xff] %v308_v2  ;;  %311 = vst [vmem:[%s1333_s6 + $0x8] sm:$0xff] %v310_v3  ;;  %v314_v5 = vld [vmem:[%s1328_s4 + $0x48] sm:$0xff]  ;;  %v316_v6 = vld [vmem:[%s1328_s4 + $0x60] sm:$0xff] }
  0x2f   : > { %313 = vst [vmem:[%s1333_s6 + $0x10] sm:$0xff] %v312_v4  ;;  %v318_v7 = vld [vmem:[%s1328_s4 + $0x78] sm:$0xff]  ;;  %315 = vst [vmem:[%s1333_s6 + $0x18] sm:$0xff] %v314_v5  ;;  %v320_v8 = vld [vmem:[%s1328_s4 + $0x90] sm:$0xff] }
  0x30   : > { %317 = vst [vmem:[%s1333_s6 + $0x20] sm:$0xff] %v316_v6  ;;  %319 = vst [vmem:[%s1333_s6 + $0x28] sm:$0xff] %v318_v7  ;;  %v322_v9 = vld [vmem:[%s1328_s4 + $0xa8] sm:$0xff]  ;;  %v324_v10 = vld [vmem:[%s1328_s4 + $0xc0] sm:$0xff] }
  0x31   : > { %321 = vst [vmem:[%s1333_s6 + $0x30] sm:$0xff] %v320_v8  ;;  %323 = vst [vmem:[%s1333_s6 + $0x38] sm:$0xff] %v322_v9  ;;  %v326_v11 = vld [vmem:[%s1328_s4 + $0xd8] sm:$0xff]  ;;  %v328_v12 = vld [vmem:[%s1328_s4 + $0xf0] sm:$0xff] }
  0x32   : > { %325 = vst [vmem:[%s1333_s6 + $0x40] sm:$0xff] %v324_v10  ;;  %v330_v13 = vld [vmem:[%s1328_s4 + $0x108] sm:$0xff]  ;;  %327 = vst [vmem:[%s1333_s6 + $0x48] sm:$0xff] %v326_v11  ;;  %v332_v14 = vld [vmem:[%s1328_s4 + $0x120] sm:$0xff] }
  0x33   : > { %329 = vst [vmem:[%s1333_s6 + $0x50] sm:$0xff] %v328_v12  ;;  %331 = vst [vmem:[%s1333_s6 + $0x58] sm:$0xff] %v330_v13  ;;  %v334_v15 = vld [vmem:[%s1328_s4 + $0x138] sm:$0xff]  ;;  %v336_v16 = vld [vmem:[%s1328_s4 + $0x150] sm:$0xff] }
  0x34   : > { %333 = vst [vmem:[%s1333_s6 + $0x60] sm:$0xff] %v332_v14  ;;  %335 = vst [vmem:[%s1333_s6 + $0x68] sm:$0xff] %v334_v15  ;;  %v338_v17 = vld [vmem:[%s1328_s4 + $0x168] sm:$0xff]  ;;  %v340_v18 = vld [vmem:[%s1328_s4 + $0x180] sm:$0xff] }
  0x35   : > { %337 = vst [vmem:[%s1333_s6 + $0x70] sm:$0xff] %v336_v16  ;;  %v342_v19 = vld [vmem:[%s1328_s4 + $0x198] sm:$0xff]  ;;  %339 = vst [vmem:[%s1333_s6 + $0x78] sm:$0xff] %v338_v17  ;;  %v344_v20 = vld [vmem:[%s1328_s4 + $0x1b0] sm:$0xff] }
  0x36   : > { %341 = vst [vmem:[%s1333_s6 + $0x80] sm:$0xff] %v340_v18  ;;  %343 = vst [vmem:[%s1333_s6 + $0x88] sm:$0xff] %v342_v19  ;;  %v346_v21 = vld [vmem:[%s1328_s4 + $0x1c8] sm:$0xff]  ;;  %v348_v22 = vld [vmem:[%s1328_s4 + $0x1e0] sm:$0xff] }
  0x37   : > { %345 = vst [vmem:[%s1333_s6 + $0x90] sm:$0xff] %v344_v20  ;;  %347 = vst [vmem:[%s1333_s6 + $0x98] sm:$0xff] %v346_v21  ;;  %v350_v23 = vld [vmem:[%s1328_s4 + $0x1f8] sm:$0xff]  ;;  %v352_v24 = vld [vmem:[%s1328_s4 + $0x210] sm:$0xff] }
  0x38   : > { %349 = vst [vmem:[%s1333_s6 + $0xa0] sm:$0xff] %v348_v22  ;;  %v354_v25 = vld [vmem:[%s1328_s4 + $0x228] sm:$0xff]  ;;  %351 = vst [vmem:[%s1333_s6 + $0xa8] sm:$0xff] %v350_v23  ;;  %v356_v26 = vld [vmem:[%s1328_s4 + $0x240] sm:$0xff] }
  0x39   : > { %353 = vst [vmem:[%s1333_s6 + $0xb0] sm:$0xff] %v352_v24  ;;  %355 = vst [vmem:[%s1333_s6 + $0xb8] sm:$0xff] %v354_v25  ;;  %v358_v27 = vld [vmem:[%s1328_s4 + $0x258] sm:$0xff]  ;;  %v360_v28 = vld [vmem:[%s1328_s4 + $0x270] sm:$0xff] }
  0x3a   : > { %357 = vst [vmem:[%s1333_s6 + $0xc0] sm:$0xff] %v356_v26  ;;  %359 = vst [vmem:[%s1333_s6 + $0xc8] sm:$0xff] %v358_v27  ;;  %v362_v29 = vld [vmem:[%s1328_s4 + $0x288] sm:$0xff]  ;;  %v364_v30 = vld [vmem:[%s1328_s4 + $0x2a0] sm:$0xff] }
  0x3b   : > { %361 = vst [vmem:[%s1333_s6 + $0xd0] sm:$0xff] %v360_v28  ;;  %v366_v31 = vld [vmem:[%s1328_s4 + $0x2b8] sm:$0xff]  ;;  %363 = vst [vmem:[%s1333_s6 + $0xd8] sm:$0xff] %v362_v29  ;;  %v368_v32 = vld [vmem:[%s1328_s4 + $0x2d0] sm:$0xff] }
  0x3c   : > { %365 = vst [vmem:[%s1333_s6 + $0xe0] sm:$0xff] %v364_v30  ;;  %367 = vst [vmem:[%s1333_s6 + $0xe8] sm:$0xff] %v366_v31  ;;  %v370_v33 = vld [vmem:[%s1328_s4 + $0x2e8] sm:$0xff] }
  0x3d   : > { %369 = vst [vmem:[%s1333_s6 + $0xf0] sm:$0xff] %v368_v32  ;;  %371 = vst [vmem:[%s1333_s6 + $0xf8] sm:$0xff] %v370_v33 }
  0x3e PF: > { %p912_p0 = scmp.ge.s32.totalorder %s1191_s22, 1  ;;  %p384_p1 = scmp.lt.s32.totalorder %s1191_s22, 37 }
  0x40   : > { %p385_p2 = pnand %p912_p0, %p384_p1 }
  0x41   : > { %s391_s24 = sand.u32 (!%p385_p2), 1, %s1167_s16   ;;  %s398_s25 = sand.u32 (!%p385_p2), 1, %s1159_s14  }
  0x42   : > { %388 = sbr.rel (%p385_p2) target bundleno = 383 (0x17f), region = 100  ;;  %s1400_s30 = sshll.u32 (!%p385_p2), %s391_s24, 4 }
  0x43   : > { %s914_s27 = sshll.u32 (!%p385_p2), %s398_s25, 8  ;;  %s425_s5 = sand.u32 (!%p385_p2), 1, %s1151_s12  }
  0x44   : > { %s916_s23 = sshll.u32 (!%p385_p2), %s1179_s19, 1  ;;  %s915_s28 = sshll.u32 (!%p385_p2), %s425_s5, 4 }
  0x45   : > { %p433_p3 = scmp.lt.s32.totalorder (!%p385_p2), %s916_s23, 5  ;;  %s393_s26 = scalar_lea.vmem (!%p385_p2), [#allocation3], %s1400_s30 }
  0x46   : > { %s1411_s4 = scalar_lea.vmem (!%p385_p2), [#allocation4], %s914_s27  ;;  %s1413_s16 = scalar_lea.vmem (!%p385_p2), [#allocation5], %s915_s28 }
  0x47   : > { %p917_p4 = scmp.ne.s32.totalorder (!%p385_p2), %s1175_s18, 0 }
  0x49   : > { %s1533_s23 = smov (!%p433_p3, %s916_s23), 5  ;;  %442 = sbr.rel (%p917_p4) target bundleno = 80 (0x50), region = 112 }
  0x4a   : > { %s435_s29 = scalar_lea.vmem %s1503_s2, %s1533_s23  ;;  %v1193_v34 = vmov (!%p917_p4), 0.0  }
  0x4b   : > { %443 = vst [vmem:[#allocation2] sm:$0xff] (!%p917_p4), %v1193_v34  ;;  %444 = vst [vmem:[#allocation2 + $0x8] sm:$0xff] (!%p917_p4), %v1193_v34 }
  0x4c   : > { %445 = vst [vmem:[#allocation2 + $0x10] sm:$0xff] (!%p917_p4), %v1193_v34  ;;  %446 = vst [vmem:[#allocation2 + $0x18] sm:$0xff] (!%p917_p4), %v1193_v34 }
  0x50 PF: > { %v1054_v35 = vld [vmem:[%s1411_s4 + $0x4] ss:$8 sps:$4 sm:$0xff]   ;;  %v1056_v36 = vld [vmem:[%s1411_s4] ss:$8 sps:$4 sm:$0xff]   ;;  %v1057_v37 = vld [vmem:[%s1411_s4 + $0x14] ss:$8 sps:$4 sm:$0xff]  }
  0x51   : > { %655 = vmatprep.subr.bf16.mxu0 %v1054_v35  ;;  %v1059_v38 = vld [vmem:[%s1411_s4 + $0x10] ss:$8 sps:$4 sm:$0xff]   ;;  %v1060_v39 = vld [vmem:[%s1411_s4 + $0x24] ss:$8 sps:$4 sm:$0xff]   ;;  %v1062_v40 = vld [vmem:[%s1411_s4 + $0x20] ss:$8 sps:$4 sm:$0xff]  }
  0x52   : > { %656 = vmatpush1.bf16.msra.mxu0 %v1056_v36  ;;  %v1063_v41 = vld [vmem:[%s1411_s4 + $0x34] ss:$8 sps:$4 sm:$0xff]   ;;  %v1065_v42 = vld [vmem:[%s1411_s4 + $0x30] ss:$8 sps:$4 sm:$0xff]   ;;  %v1066_v43 = vld [vmem:[%s1411_s4 + $0x44] ss:$8 sps:$4 sm:$0xff]  }
  0x53   : > { %657 = vmatprep.subr.bf16.mxu0 %v1057_v37  ;;  %v1068_v44 = vld [vmem:[%s1411_s4 + $0x40] ss:$8 sps:$4 sm:$0xff]   ;;  %v1069_v45 = vld [vmem:[%s1411_s4 + $0x54] ss:$8 sps:$4 sm:$0xff]   ;;  %v1071_v46 = vld [vmem:[%s1411_s4 + $0x50] ss:$8 sps:$4 sm:$0xff]  }
  0x54   : > { %v1072_v47 = vld [vmem:[%s1411_s4 + $0x64] ss:$8 sps:$4 sm:$0xff]   ;;  %v1074_v49 = vld [vmem:[%s1411_s4 + $0x60] ss:$8 sps:$4 sm:$0xff]   ;;  %v1075_v50 = vld [vmem:[%s1411_s4 + $0x74] ss:$8 sps:$4 sm:$0xff]  }
  0x55   : > { %v1104_v48 = vld [vmem:[%s393_s26 + $0x4] ss:$8 sps:$4 sm:$0xff]   ;;  %v1077_v51 = vld [vmem:[%s1411_s4 + $0x70] ss:$8 sps:$4 sm:$0xff]   ;;  %v1080_v53 = vld [vmem:[%s1411_s4 + $0x80] ss:$8 sps:$4 sm:$0xff]  }
  0x56   : > { %658 = vmatpush1.bf16.msra.mxu0 %v1059_v38  ;;  %687 = vmatprep.mubr.bf16.mxu0 %v1104_v48  ;;  %v1078_v52 = vld [vmem:[%s1411_s4 + $0x84] ss:$8 sps:$4 sm:$0xff]   ;;  %v1081_v54 = vld [vmem:[%s1411_s4 + $0x94] ss:$8 sps:$4 sm:$0xff]   ;;  %v1083_v55 = vld [vmem:[%s1411_s4 + $0x90] ss:$8 sps:$4 sm:$0xff]  }
  0x57   : > { %659 = vmatprep.subr.bf16.mxu0 %v1060_v39  ;;  %v1084_v56 = vld [vmem:[%s1411_s4 + $0xa4] ss:$8 sps:$4 sm:$0xff]   ;;  %v1086_v57 = vld [vmem:[%s1411_s4 + $0xa0] ss:$8 sps:$4 sm:$0xff]   ;;  %v1087_v58 = vld [vmem:[%s1411_s4 + $0xb4] ss:$8 sps:$4 sm:$0xff]  }
  0x58   : > { %v1089_v59 = vld [vmem:[%s1411_s4 + $0xb0] ss:$8 sps:$4 sm:$0xff]   ;;  %v1090_v60 = vld [vmem:[%s1411_s4 + $0xc4] ss:$8 sps:$4 sm:$0xff]   ;;  %v1092_v61 = vld [vmem:[%s1411_s4 + $0xc0] ss:$8 sps:$4 sm:$0xff]  }
  0x59   : > { %v1093_v62 = vld [vmem:[%s1411_s4 + $0xd4] ss:$8 sps:$4 sm:$0xff]   ;;  %v1095_v63 = vld [vmem:[%s1411_s4 + $0xd0] ss:$8 sps:$4 sm:$0xff]   ;;  %v1096_v0 = vld [vmem:[%s1411_s4 + $0xe4] ss:$8 sps:$4 sm:$0xff]  }
  0x5a   : > { %660 = vmatpush1.bf16.msra.mxu0 %v1062_v40  ;;  %v1098_v1 = vld [vmem:[%s1411_s4 + $0xe0] ss:$8 sps:$4 sm:$0xff]   ;;  %v1099_v2 = vld [vmem:[%s1411_s4 + $0xf4] ss:$8 sps:$4 sm:$0xff]   ;;  %v1101_v3 = vld [vmem:[%s1411_s4 + $0xf0] ss:$8 sps:$4 sm:$0xff]  }
  0x5b   : > { %661 = vmatprep.subr.bf16.mxu0 %v1063_v41  ;;  %v1102_v4 = vld [vmem:[%s393_s26] ss:$8 sps:$4 sm:$0xff]   ;;  %p952_p5 = scmp.ne.s32.totalorder %s1175_s18, 11 }
  0x5c   : > { %v447_v5 = vld [vmem:[#allocation2] sm:$0xff]  ;;  %v448_v6 = vld [vmem:[#allocation2 + $0x8] sm:$0xff]  ;;  %v449_v8 = vld [vmem:[#allocation2 + $0x10] sm:$0xff]  ;;  %v716_v17 = vlaneseq (!%p952_p5) }
  0x5d   : > { %v450_v11 = vld [vmem:[#allocation2 + $0x18] sm:$0xff]  ;;  %v714_v19 = vld [vmem:[%s435_s29] sm:$0x3] (!%p952_p5) }
  0x5e   : > { %662 = vmatpush1.bf16.msra.mxu0 %v1065_v42  ;;  %v717_v18 = vshrl.u32 (!%p952_p5), %v716_v17, 7 }
  0x5f   : > { %663 = vmatprep.subr.bf16.mxu0 %v1066_v43 }
  0x60   : > { %v718_v21 = vsub.s32 (!%p952_p5), 0, %v717_v18  ;;  %v722_v22 = vsub.s32 (!%p952_p5), 1, %v717_v18 }
  0x62   : > { %664 = vmatpush1.bf16.msra.mxu0 %v1068_v44  ;;  %v719_v26 = vrot.slane (!%p952_p5), %v714_v19, %v718_v21  ;;  %v723_v27 = vrot.slane (!%p952_p5), %v714_v19, %v722_v22 }
  0x63   : > { %665 = vmatprep.subr.bf16.mxu0 %v1069_v45 }
  0x66   : > { %666 = vmatpush1.bf16.msra.mxu0 %v1071_v46 }
  0x67   : > { %667 = vmatprep.subr.bf16.mxu0 %v1072_v47 }
  0x6a   : > { %668 = vmatpush1.bf16.msra.mxu0 %v1074_v49 }
  0x6b   : > { %669 = vmatprep.subr.bf16.mxu0 %v1075_v50 }
  0x6e   : > { %670 = vmatpush1.bf16.msra.mxu0 %v1077_v51 }
  0x6f   : > { %671 = vmatprep.subr.bf16.mxu0 %v1078_v52 }
  0x72   : > { %672 = vmatpush1.bf16.msra.mxu0 %v1080_v53 }
  0x73   : > { %673 = vmatprep.subr.bf16.mxu0 %v1081_v54 }
  0x76   : > { %674 = vmatpush1.bf16.msra.mxu0 %v1083_v55 }
  0x77   : > { %675 = vmatprep.subr.bf16.mxu0 %v1084_v56 }
  0x7a   : > { %676 = vmatpush1.bf16.msra.mxu0 %v1086_v57 }
  0x7b   : > { %677 = vmatprep.subr.bf16.mxu0 %v1087_v58 }
  0x7e   : > { %678 = vmatpush1.bf16.msra.mxu0 %v1089_v59 }
  0x7f   : > { %679 = vmatprep.subr.bf16.mxu0 %v1090_v60 }
  0x82   : > { %680 = vmatpush1.bf16.msra.mxu0 %v1092_v61 }
  0x83   : > { %681 = vmatprep.subr.bf16.mxu0 %v1093_v62 }
  0x86   : > { %682 = vmatpush1.bf16.msra.mxu0 %v1095_v63 }
  0x87   : > { %683 = vmatprep.subr.bf16.mxu0 %v1096_v0 }
  0x8a   : > { %684 = vmatpush1.bf16.msra.mxu0 %v1098_v1 }
  0x8b   : > { %685 = vmatprep.subr.bf16.mxu0 %v1099_v2 }
  0x8e   : > { %686 = vmatpush1.bf16.msra.mxu0 %v1101_v3 }
  0x91   : > { %688 = vmatmul.mubr.bf16.vlgmr.msra.gmra.mrb[0].mxu0 %v1102_v4 }
 0x164   : > { %v689_v7 = vpop.f32.mrb[0].mxu0  ;;  %709 = sbr.rel (%p952_p5) target bundleno = 375 (0x177), region = 116 }
 0x165   : > { %v698_v9 = vadd.f32 %v689_v7, %v447_v5  ;;  %v691_v10 = vpop.f32.mrb[1].mxu0 }
 0x166   : > { %v699_v12 = vadd.f32 %v691_v10, %v448_v6  ;;  %v693_v13 = vpop.f32.mrb[2].mxu0 }
 0x167   : > { %702 = vst [vmem:[#allocation2] sm:$0xff] %v698_v9  ;;  %v700_v14 = vadd.f32 %v693_v13, %v449_v8  ;;  %v695_v15 = vpop.f32.mrb[3].mxu0 }
 0x168   : > { %703 = vst [vmem:[#allocation2 + $0x8] sm:$0xff] %v699_v12  ;;  %v701_v16 = vadd.f32 %v695_v15, %v450_v11 }
 0x169   : > { %704 = vst [vmem:[#allocation2 + $0x10] sm:$0xff] %v700_v14 }
 0x16a   : > { %705 = vst [vmem:[#allocation2 + $0x18] sm:$0xff] %v701_v16 }
 0x16e   : > { %v710_v20 = vld [vmem:[#allocation2] sm:$0xff] }
 0x16f   : > { %v711_v23 = vld [vmem:[#allocation2 + $0x8] sm:$0xff]  ;;  %v726_v28 = vadd.f32 %v719_v26, %v710_v20 }
 0x170   : > { %v712_v24 = vld [vmem:[#allocation2 + $0x10] sm:$0xff]  ;;  %v727_v29 = vadd.f32 %v723_v27, %v711_v23 }
 0x171   : > { %v713_v25 = vld [vmem:[#allocation2 + $0x18] sm:$0xff]  ;;  %v728_v30 = vadd.f32 %v719_v26, %v712_v24 }
 0x172   : > { %v729_v31 = vadd.f32 %v723_v27, %v713_v25  ;;  %v961_v32 = vpack.c.bf16 %v727_v29, %v726_v28 }
 0x174   : > { %v962_v33 = vpack.c.bf16 %v729_v31, %v728_v30  ;;  %742 = vst [vmem:[%s1413_s16] sm:$0xff] %v961_v32 }
 0x176   : > { %743 = vst [vmem:[%s1413_s16 + $0x8] sm:$0xff] %v962_v33 }
 0x177 PF: > { %750 = sbr.rel (!%p1308_p12) target bundleno = 383 (0x17f), region = 120  ;;  %s963_s18 = sshll.u32 (%p1308_p12), %s1179_s19, 3 }
 0x178   : > { %s756_s25 = scalar_lea.vmem (%p1308_p12), %s1504_s3, %s963_s18 }
 0x17b   : > { %v786_v34 = vld [vmem:[%s1413_s16] sm:$0xff] (%p1308_p12) }
 0x17c   : > { %787 = vst [vmem:[%s756_s25] sm:$0xff] (%p1308_p12), %v786_v34 }
 0x17d   : > { %v788_v35 = vld [vmem:[%s1413_s16 + $0x8] sm:$0xff] (%p1308_p12) }
 0x17e   : > { %789 = vst [vmem:[%s756_s25 + $0x18] sm:$0xff] %v788_v35 }
 0x17f PF: > { %s13_s22 = sadd.s32 1, %s1191_s22   ;;  %s1513_s10 = sld [smem:[#allocation8_spill]] }
 0x180   : > { %p10_p6 = scmp.ge.s32.totalorder %s13_s22, 38   ;;  %s1514_s30 = sld [smem:[#allocation6_spill]] }
 0x181   : > { %s1515_s27 = sld [smem:[#allocation7_spill]]  ;;  %s1516_s12 = smov %s1155_s13 }
 0x182   : > { %s1517_s13 = smov %s1306_s9  ;;  %s1518_s14 = smov %s1163_s15 }
 0x183   : > { %s1519_s15 = smov %s1303_s8  ;;  %s1520_s16 = smov %s1171_s17 }
 0x184   : > { %s1522_s18 = smov %s1183_s20  ;;  %s1523_s19 = smov %s1187_s21 }
 0x185   : > { %s1521_s17 = smov %s1513_s10  ;;  %12 = sbr.rel (!%p10_p6) target bundleno = 6 (0x6), region = 200 }
 0x186   : > { %s1524_s20 = smov %s1514_s30 }
 0x187   : > { %s1525_s21 = smov %s1515_s27 }

// kernel: longformer_forward.32
= control target key start
LH: loop header
LB: loop body
LE: loop exit
PB: predicated region body
PF: predicated region fallthrough
CT: control target
= control target key end

     0   :  { %s1109_s12 = smov 0   ;;  %s1111_s13 = smov 0   ;;  %s1341_s0 = inlined_call_operand.vmem [shape: bf16[2,768], index: 0, kind: input, shape index: {}]   ;;  %s1342_s1 = inlined_call_operand.vmem [shape: bf16[768,768], index: 1, kind: input, shape index: {}]   ;;  %s1343_s2 = inlined_call_operand.vmem [shape: f32[1,768], index: 2, kind: input, shape index: {}]   ;;  %s1344_s3 = inlined_call_operand.vmem [shape: bf16[2,768], index: 3, kind: output, shape index: {}]  }
   0x1   :  { %s1113_s14 = smov 0   ;;  %s1115_s15 = smov 0  }
   0x2   :  { %s1117_s16 = smov 0   ;;  %s1119_s17 = smov 0  }
   0x3   :  { %s1121_s18 = smov 0  }
   0x4 LB: > { %s25_s19 = sadd.s32 1, %s1076_s16  ;;  %s28_s20 = sadd.s32 1, %s1080_s17  ;;  %s1084_s18 = sphi %s1121_s18, %s13_s18   ;;  %s1080_s17 = sphi %s1119_s17, %s1350_s17   ;;  %s1076_s16 = sphi %s1117_s16, %s1349_s16   ;;  %s1072_s15 = sphi %s1115_s15, %s1348_s15   ;;  %s1068_s14 = sphi %s1113_s14, %s1347_s14   ;;  %s1064_s13 = sphi %s1111_s13, %s1346_s13   ;;  %s1060_s12 = sphi %s1109_s12, %s1345_s12  }
   0x5   : > { %p26_p0 = scmp.ge.s32.totalorder %s25_s19, 3  ;;  %p76_p1 = scmp.ne.s32.totalorder %s1064_s13, %s1060_s12 }
   0x6   : > { %p77_p2 = scmp.eq.s32.totalorder %s1084_s18, 0  ;;  %s69_s24 = sadd.s32 1, %s1064_s13 }
   0x7   : > { %s1352_s19 = smov (%p26_p0, %s25_s19), 0  ;;  %s1354_s20 = smov (!%p26_p0, %s28_s20), %s1080_s17 }
   0x8   : > { %p78_p3 = por %p77_p2, %p76_p1  ;;  %p30_p4 = scmp.ge.s32.totalorder %s1354_s20, 3 }
   0x9   : > { %s64_s21 = ssub.s32 %s1076_s16, %s1352_s19  ;;  %p870_p6 = scmp.ge.s32.totalorder %s1084_s18, 9 }
   0xa   : > { %s1356_s20 = smov (%p30_p4, %s1354_s20), 0 }
   0xb   : > { %s65_s22 = ssub.s32 %s1080_s17, %s1356_s20  ;;  %156 = sbr.rel (%p870_p6) target bundleno = 42 (0x2a), region = 16 }
   0xc   : > { %s66_s23 = sor.u32 %s65_s22, %s64_s21 }
   0xd   : > { %p67_p5 = scmp.eq.s32.totalorder %s66_s23, 0 }
   0xf   : > { %s1160_s25 = scalar_select %p67_p5, %s1064_s13, %s69_s24  }
  0x12   : > { %171 = sbr.rel (!%p78_p3) target bundleno = 42 (0x2a), region = 24  ;;  %s173_s26 = sand.u32 (%p78_p3), 1, %s1064_s13  }
  0x13   : > { %s873_s27 = sshll.u32 (%p78_p3), %s1080_s17, 1  ;;  %s871_s28 = sshll.u32 (%p78_p3), %s173_s26, 8 }
  0x14   : > { %s920_s29 = smul.u32 (%p78_p3), 192, %s1076_s16  ;;  %s1174_s8 = scalar_lea.vmem (%p78_p3), [#allocation3], %s871_s28 }
  0x16   : > { %s179_s30 = sadd.s32 (%p78_p3), %s920_s29, %s873_s27 }
  0x17   : > { %s875_s4 = sshll.u32 (%p78_p3), %s179_s30, 2 }
  0x18   : > { %s1169_s7 = scalar_lea.vmem (%p78_p3), %s1342_s1, %s875_s4 }
  0x19   : > { %v271_v0 = vld [vmem:[%s1169_s7] sm:$0xff]  ;;  %v273_v1 = vld [vmem:[%s1169_s7 + $0x18] sm:$0xff]  ;;  %v275_v2 = vld [vmem:[%s1169_s7 + $0x30] sm:$0xff] }
  0x1a   : > { %272 = vst [vmem:[%s1174_s8] sm:$0xff] %v271_v0  ;;  %274 = vst [vmem:[%s1174_s8 + $0x8] sm:$0xff] %v273_v1  ;;  %v277_v3 = vld [vmem:[%s1169_s7 + $0x48] sm:$0xff]  ;;  %v279_v4 = vld [vmem:[%s1169_s7 + $0x60] sm:$0xff] }
  0x1b   : > { %276 = vst [vmem:[%s1174_s8 + $0x10] sm:$0xff] %v275_v2  ;;  %v281_v5 = vld [vmem:[%s1169_s7 + $0x78] sm:$0xff]  ;;  %278 = vst [vmem:[%s1174_s8 + $0x18] sm:$0xff] %v277_v3  ;;  %v283_v6 = vld [vmem:[%s1169_s7 + $0x90] sm:$0xff] }
  0x1c   : > { %280 = vst [vmem:[%s1174_s8 + $0x20] sm:$0xff] %v279_v4  ;;  %282 = vst [vmem:[%s1174_s8 + $0x28] sm:$0xff] %v281_v5  ;;  %v285_v7 = vld [vmem:[%s1169_s7 + $0xa8] sm:$0xff]  ;;  %v287_v8 = vld [vmem:[%s1169_s7 + $0xc0] sm:$0xff] }
  0x1d   : > { %284 = vst [vmem:[%s1174_s8 + $0x30] sm:$0xff] %v283_v6  ;;  %286 = vst [vmem:[%s1174_s8 + $0x38] sm:$0xff] %v285_v7  ;;  %v289_v9 = vld [vmem:[%s1169_s7 + $0xd8] sm:$0xff]  ;;  %v291_v10 = vld [vmem:[%s1169_s7 + $0xf0] sm:$0xff] }
  0x1e   : > { %288 = vst [vmem:[%s1174_s8 + $0x40] sm:$0xff] %v287_v8  ;;  %v293_v11 = vld [vmem:[%s1169_s7 + $0x108] sm:$0xff]  ;;  %290 = vst [vmem:[%s1174_s8 + $0x48] sm:$0xff] %v289_v9  ;;  %v295_v12 = vld [vmem:[%s1169_s7 + $0x120] sm:$0xff] }
  0x1f   : > { %292 = vst [vmem:[%s1174_s8 + $0x50] sm:$0xff] %v291_v10  ;;  %294 = vst [vmem:[%s1174_s8 + $0x58] sm:$0xff] %v293_v11  ;;  %v297_v13 = vld [vmem:[%s1169_s7 + $0x138] sm:$0xff]  ;;  %v299_v14 = vld [vmem:[%s1169_s7 + $0x150] sm:$0xff] }
  0x20   : > { %296 = vst [vmem:[%s1174_s8 + $0x60] sm:$0xff] %v295_v12  ;;  %298 = vst [vmem:[%s1174_s8 + $0x68] sm:$0xff] %v297_v13  ;;  %v301_v15 = vld [vmem:[%s1169_s7 + $0x168] sm:$0xff]  ;;  %v303_v16 = vld [vmem:[%s1169_s7 + $0x180] sm:$0xff] }
  0x21   : > { %300 = vst [vmem:[%s1174_s8 + $0x70] sm:$0xff] %v299_v14  ;;  %v305_v17 = vld [vmem:[%s1169_s7 + $0x198] sm:$0xff]  ;;  %302 = vst [vmem:[%s1174_s8 + $0x78] sm:$0xff] %v301_v15  ;;  %v307_v18 = vld [vmem:[%s1169_s7 + $0x1b0] sm:$0xff] }
  0x22   : > { %304 = vst [vmem:[%s1174_s8 + $0x80] sm:$0xff] %v303_v16  ;;  %306 = vst [vmem:[%s1174_s8 + $0x88] sm:$0xff] %v305_v17  ;;  %v309_v19 = vld [vmem:[%s1169_s7 + $0x1c8] sm:$0xff]  ;;  %v311_v20 = vld [vmem:[%s1169_s7 + $0x1e0] sm:$0xff] }
  0x23   : > { %308 = vst [vmem:[%s1174_s8 + $0x90] sm:$0xff] %v307_v18  ;;  %310 = vst [vmem:[%s1174_s8 + $0x98] sm:$0xff] %v309_v19  ;;  %v313_v21 = vld [vmem:[%s1169_s7 + $0x1f8] sm:$0xff]  ;;  %v315_v22 = vld [vmem:[%s1169_s7 + $0x210] sm:$0xff] }
  0x24   : > { %312 = vst [vmem:[%s1174_s8 + $0xa0] sm:$0xff] %v311_v20  ;;  %v317_v23 = vld [vmem:[%s1169_s7 + $0x228] sm:$0xff]  ;;  %314 = vst [vmem:[%s1174_s8 + $0xa8] sm:$0xff] %v313_v21  ;;  %v319_v24 = vld [vmem:[%s1169_s7 + $0x240] sm:$0xff] }
  0x25   : > { %316 = vst [vmem:[%s1174_s8 + $0xb0] sm:$0xff] %v315_v22  ;;  %318 = vst [vmem:[%s1174_s8 + $0xb8] sm:$0xff] %v317_v23  ;;  %v321_v25 = vld [vmem:[%s1169_s7 + $0x258] sm:$0xff]  ;;  %v323_v26 = vld [vmem:[%s1169_s7 + $0x270] sm:$0xff] }
  0x26   : > { %320 = vst [vmem:[%s1174_s8 + $0xc0] sm:$0xff] %v319_v24  ;;  %322 = vst [vmem:[%s1174_s8 + $0xc8] sm:$0xff] %v321_v25  ;;  %v325_v27 = vld [vmem:[%s1169_s7 + $0x288] sm:$0xff]  ;;  %v327_v28 = vld [vmem:[%s1169_s7 + $0x2a0] sm:$0xff] }
  0x27   : > { %324 = vst [vmem:[%s1174_s8 + $0xd0] sm:$0xff] %v323_v26  ;;  %v329_v29 = vld [vmem:[%s1169_s7 + $0x2b8] sm:$0xff]  ;;  %326 = vst [vmem:[%s1174_s8 + $0xd8] sm:$0xff] %v325_v27  ;;  %v331_v30 = vld [vmem:[%s1169_s7 + $0x2d0] sm:$0xff] }
  0x28   : > { %328 = vst [vmem:[%s1174_s8 + $0xe0] sm:$0xff] %v327_v28  ;;  %330 = vst [vmem:[%s1174_s8 + $0xe8] sm:$0xff] %v329_v29  ;;  %v333_v31 = vld [vmem:[%s1169_s7 + $0x2e8] sm:$0xff] }
  0x29   : > { %332 = vst [vmem:[%s1174_s8 + $0xf0] sm:$0xff] %v331_v30  ;;  %334 = vst [vmem:[%s1174_s8 + $0xf8] sm:$0xff] %v333_v31 }
  0x2a PF: > { %p876_p7 = scmp.ge.s32.totalorder %s1084_s18, 1  ;;  %p347_p8 = scmp.lt.s32.totalorder %s1084_s18, 10 }
  0x2c   : > { %p348_p9 = pnand %p876_p7, %p347_p8 }
  0x2d   : > { %s354_s9 = sand.u32 (!%p348_p9), 1, %s1060_s12   ;;  %s878_s10 = sshll.u32 (!%p348_p9), %s1068_s14, 1 }
  0x2e   : > { %351 = sbr.rel (%p348_p9) target bundleno = 376 (0x178), region = 66  ;;  %s877_s11 = sshll.u32 (!%p348_p9), %s354_s9, 8 }
  0x2f   : > { %p395_p10 = scmp.lt.s32.totalorder (!%p348_p9), %s878_s10, 5  ;;  %s879_s21 = sshll.u32 (!%p348_p9), %s1072_s15, 1 }
  0x30   : > { %p404_p11 = scmp.lt.s32.totalorder (!%p348_p9), %s879_s21, 5  ;;  %s1258_s30 = scalar_lea.vmem (!%p348_p9), [#allocation3], %s877_s11 }
  0x31   : > { %p881_p12 = scmp.ne.s32.totalorder (!%p348_p9), %s1068_s14, 0 }
  0x35   : > { %s1358_s10 = smov (!%p395_p10, %s878_s10), 5  ;;  %s1360_s21 = smov (!%p404_p11, %s879_s21), 5 }
  0x36   : > { %s399_s24 = scalar_lea.vmem %s1341_s0, %s1358_s10  ;;  %s406_s12 = scalar_lea.vmem %s1343_s2, %s1360_s21  ;;  %v1086_v32 = vmov (!%p881_p12), 0.0  }
  0x37   : > { %s415_s15 = scalar_lea.vmem %s1344_s3, %s1360_s21  ;;  %420 = sbr.rel (%p881_p12) target bundleno = 62 (0x3e), region = 74  ;;  %421 = vst [vmem:[#allocation2] sm:$0xf] (!%p881_p12), %v1086_v32 }
  0x3e PF: > { %v980_v33 = vld [vmem:[%s1258_s30 + $0x4] ss:$8 sps:$4 sm:$0xff]   ;;  %v982_v34 = vld [vmem:[%s1258_s30] ss:$8 sps:$4 sm:$0xff]   ;;  %v983_v35 = vld [vmem:[%s1258_s30 + $0x14] ss:$8 sps:$4 sm:$0xff]   ;;  %v468_v44 = vlaneseq }
  0x3f   : > { %641 = vmatprep.subr.bf16.mxu0 %v980_v33  ;;  %v985_v36 = vld [vmem:[%s1258_s30 + $0x10] ss:$8 sps:$4 sm:$0xff]   ;;  %v986_v37 = vld [vmem:[%s1258_s30 + $0x24] ss:$8 sps:$4 sm:$0xff]   ;;  %v988_v38 = vld [vmem:[%s1258_s30 + $0x20] ss:$8 sps:$4 sm:$0xff]  }
  0x40   : > { %642 = vmatpush1.bf16.msra.mxu0 %v982_v34  ;;  %v989_v39 = vld [vmem:[%s1258_s30 + $0x34] ss:$8 sps:$4 sm:$0xff]   ;;  %v991_v40 = vld [vmem:[%s1258_s30 + $0x30] ss:$8 sps:$4 sm:$0xff]   ;;  %v992_v41 = vld [vmem:[%s1258_s30 + $0x44] ss:$8 sps:$4 sm:$0xff]  }
  0x41   : > { %643 = vmatprep.subr.bf16.mxu0 %v983_v35  ;;  %v1087_v42 = vmov 1966171168   ;;  %v994_v45 = vld [vmem:[%s1258_s30 + $0x40] ss:$8 sps:$4 sm:$0xff]   ;;  %v995_v46 = vld [vmem:[%s1258_s30 + $0x54] ss:$8 sps:$4 sm:$0xff]  }
  0x42   : > { %v466_v43 = vunpack.c.l.s4 %v1087_v42  ;;  %v1272_v48 = vshrl.u32 %v468_v44, 7  ;;  %v997_v49 = vld [vmem:[%s1258_s30 + $0x50] ss:$8 sps:$4 sm:$0xff]   ;;  %v998_v50 = vld [vmem:[%s1258_s30 + $0x64] ss:$8 sps:$4 sm:$0xff]   ;;  %p915_p13 = scmp.ne.s32.totalorder %s1068_s14, 2 }
  0x43   : > { %v882_v52 = vld.sshfl [vmem:[%s399_s24] sm:$0x11 pattern:$0x75316420]  ;;  %v1000_v54 = vld [vmem:[%s1258_s30 + $0x60] ss:$8 sps:$4 sm:$0xff]  }
  0x44   : > { %644 = vmatpush1.bf16.msra.mxu0 %v985_v36  ;;  %v467_v47 = vunpack.c.0.s8 %v466_v43  ;;  %v464_v53 = vcombine.high %v882_v52, %v882_v52  ;;  %v1001_v55 = vld [vmem:[%s1258_s30 + $0x74] ss:$8 sps:$4 sm:$0xff]   ;;  %v1003_v57 = vld [vmem:[%s1258_s30 + $0x70] ss:$8 sps:$4 sm:$0xff]   ;;  %v1004_v58 = vld [vmem:[%s1258_s30 + $0x84] ss:$8 sps:$4 sm:$0xff]  }
  0x45   : > { %645 = vmatprep.subr.bf16.mxu0 %v986_v37  ;;  %v1006_v59 = vld [vmem:[%s1258_s30 + $0x80] ss:$8 sps:$4 sm:$0xff]   ;;  %v1007_v60 = vld [vmem:[%s1258_s30 + $0x94] ss:$8 sps:$4 sm:$0xff]   ;;  %v1009_v61 = vld [vmem:[%s1258_s30 + $0x90] ss:$8 sps:$4 sm:$0xff]  }
  0x46   : > { %v1277_v51 = vsub.s32 %v467_v47, %v1272_v48  ;;  %v1010_v62 = vld [vmem:[%s1258_s30 + $0xa4] ss:$8 sps:$4 sm:$0xff]   ;;  %v1012_v63 = vld [vmem:[%s1258_s30 + $0xa0] ss:$8 sps:$4 sm:$0xff]   ;;  %v1013_v0 = vld [vmem:[%s1258_s30 + $0xb4] ss:$8 sps:$4 sm:$0xff]  }
  0x47   : > { %v1015_v1 = vld [vmem:[%s1258_s30 + $0xb0] ss:$8 sps:$4 sm:$0xff]   ;;  %v1016_v2 = vld [vmem:[%s1258_s30 + $0xc4] ss:$8 sps:$4 sm:$0xff]   ;;  %v1018_v3 = vld [vmem:[%s1258_s30 + $0xc0] ss:$8 sps:$4 sm:$0xff]  }
  0x48   : > { %646 = vmatpush1.bf16.msra.mxu0 %v988_v38  ;;  %v478_v56 = vrot.slane %v464_v53, %v1277_v51  ;;  %v1019_v4 = vld [vmem:[%s1258_s30 + $0xd4] ss:$8 sps:$4 sm:$0xff]   ;;  %v1021_v5 = vld [vmem:[%s1258_s30 + $0xd0] ss:$8 sps:$4 sm:$0xff]   ;;  %v1022_v6 = vld [vmem:[%s1258_s30 + $0xe4] ss:$8 sps:$4 sm:$0xff]   ;;  %v471_v10 = vrot.slane %v882_v52, %v1277_v51 }
  0x49   : > { %647 = vmatprep.subr.bf16.mxu0 %v989_v39  ;;  %v1024_v7 = vld [vmem:[%s1258_s30 + $0xe0] ss:$8 sps:$4 sm:$0xff]   ;;  %v1025_v8 = vld [vmem:[%s1258_s30 + $0xf4] ss:$8 sps:$4 sm:$0xff]   ;;  %v1027_v9 = vld [vmem:[%s1258_s30 + $0xf0] ss:$8 sps:$4 sm:$0xff]  }
  0x4a   : > { %673 = vmatprep.mubr.bf16.mxu0 %v478_v56  ;;  %v1088_v11 = vmov 1983009808   ;;  %v422_v19 = vld [vmem:[#allocation2] sm:$0xf]  ;;  %v704_v24 = vsub.s32 (!%p915_p13), 0, %v1272_v48  ;;  %v708_v25 = vsub.s32 (!%p915_p13), 1, %v1272_v48 }
  0x4b   : > { %v686_v12 = vunpack.c.l.s4 %v1088_v11  ;;  %v700_v23 = vld [vmem:[%s406_s12] sm:$0x3] (!%p915_p13) }
  0x4c   : > { %648 = vmatpush1.bf16.msra.mxu0 %v991_v40  ;;  %v705_v26 = vrot.slane (!%p915_p13), %v700_v23, %v704_v24  ;;  %v709_v27 = vrot.slane (!%p915_p13), %v700_v23, %v708_v25 }
  0x4d   : > { %649 = vmatprep.subr.bf16.mxu0 %v992_v41  ;;  %v687_v13 = vunpack.c.0.s8 %v686_v12 }
  0x4e   : > { %v710_v28 = vcombine.low (!%p915_p13), %v705_v26, %v709_v27 }
  0x4f   : > { %v690_v15 = vsub.s32 %v687_v13, %v1272_v48 }
  0x50   : > { %650 = vmatpush1.bf16.msra.mxu0 %v994_v45 }
  0x51   : > { %651 = vmatprep.subr.bf16.mxu0 %v995_v46  ;;  %v717_v30 = vrot.slane (!%p915_p13), %v710_v28, %v690_v15 }
  0x54   : > { %652 = vmatpush1.bf16.msra.mxu0 %v997_v49 }
  0x55   : > { %653 = vmatprep.subr.bf16.mxu0 %v998_v50 }
  0x58   : > { %654 = vmatpush1.bf16.msra.mxu0 %v1000_v54 }
  0x59   : > { %655 = vmatprep.subr.bf16.mxu0 %v1001_v55 }
  0x5c   : > { %656 = vmatpush1.bf16.msra.mxu0 %v1003_v57 }
  0x5d   : > { %657 = vmatprep.subr.bf16.mxu0 %v1004_v58 }
  0x60   : > { %658 = vmatpush1.bf16.msra.mxu0 %v1006_v59 }
  0x61   : > { %659 = vmatprep.subr.bf16.mxu0 %v1007_v60 }
  0x64   : > { %660 = vmatpush1.bf16.msra.mxu0 %v1009_v61 }
  0x65   : > { %661 = vmatprep.subr.bf16.mxu0 %v1010_v62 }
  0x68   : > { %662 = vmatpush1.bf16.msra.mxu0 %v1012_v63 }
  0x69   : > { %663 = vmatprep.subr.bf16.mxu0 %v1013_v0 }
  0x6c   : > { %664 = vmatpush1.bf16.msra.mxu0 %v1015_v1 }
  0x6d   : > { %665 = vmatprep.subr.bf16.mxu0 %v1016_v2 }
  0x70   : > { %666 = vmatpush1.bf16.msra.mxu0 %v1018_v3 }
  0x71   : > { %667 = vmatprep.subr.bf16.mxu0 %v1019_v4 }
  0x74   : > { %668 = vmatpush1.bf16.msra.mxu0 %v1021_v5 }
  0x75   : > { %669 = vmatprep.subr.bf16.mxu0 %v1022_v6 }
  0x78   : > { %670 = vmatpush1.bf16.msra.mxu0 %v1024_v7 }
  0x79   : > { %671 = vmatprep.subr.bf16.mxu0 %v1025_v8 }
  0x7c   : > { %672 = vmatpush1.bf16.msra.mxu0 %v1027_v9 }
  0x7f   : > { %674 = vmatmul.mubr.bf16.vlgmr.msra.gmra.mrb[0].mxu0 %v471_v10 }
 0x152   : > { %v675_v14 = vpop.f32.mrb[0].mxu0 }
 0x153   : > { %v677_v16 = vpop.f32.mrb[1].mxu0 }
 0x154   : > { %v684_v17 = vcombine.low %v675_v14, %v677_v16  ;;  %v679_v18 = vpop.f32.mrb[2].mxu0  ;;  %698 = sbr.rel (%p915_p13) target bundleno = 376 (0x178), region = 78 }
 0x155   : > { %v680_v20 = vpop.f32.mrb[3].mxu0 }
 0x156   : > { %v691_v21 = vrot.slane %v684_v17, %v690_v15 }
 0x158   : > { %v693_v22 = vadd.f32 %v691_v21, %v422_v19 }
 0x15a   : > { %694 = vst [vmem:[#allocation2] sm:$0xf] %v693_v22 }
 0x161   : > { %v699_v29 = vld [vmem:[#allocation2] sm:$0xf] }
 0x162   : > { %v719_v31 = vadd.f32 %v717_v30, %v699_v29 }
 0x164   : > { %1028 = vtanh.f32 %v719_v31 }
 0x16e   : > { %v1029_v32 = vpop.eup %1028 }
 0x16f   : > { %v728_v33 = vrot.slane %v1029_v32, %v690_v15 }
 0x171   : > { %v729_v34 = vcombine.high %v728_v33, %v728_v33 }
 0x173   : > { %v916_v35 = vpack.c.bf16 %v729_v34, %v728_v33 }
 0x175   : > { %v743_v36 = vrot.slane %v916_v35, %v1277_v51 }
 0x177   : > { %917 = vst.sshfl [vmem:[%s415_s15] sm:$0x5 pattern:$0x73625140] %v743_v36 }
 0x178 PF: > { %s13_s18 = sadd.s32 1, %s1084_s18   ;;  %s1345_s12 = smov %s1064_s13 }
 0x179   : > { %p10_p0 = scmp.ge.s32.totalorder %s13_s18, 11   ;;  %s1346_s13 = smov %s1160_s25 }
 0x17a   : > { %s1347_s14 = smov %s1076_s16  ;;  %s1348_s15 = smov %s1080_s17 }
 0x17b   : > { %s1349_s16 = smov %s1352_s19  ;;  %s1350_s17 = smov %s1356_s20 }
 0x17c   :  { %12 = sbr.rel (!%p10_p0) target bundleno = 4 (0x4), region = 119 }

// kernel: longformer_forward.33
= control target key start
LH: loop header
LB: loop body
LE: loop exit
PB: predicated region body
PF: predicated region fallthrough
CT: control target
= control target key end

     0   :  { %8 = vsyncpa [#allocation4], 0  ;;  %s736_s12 = smov 0   ;;  %s738_s13 = smov 0   ;;  %s828_s0 = inlined_call_operand.vmem [shape: bf16[2,768], index: 0, kind: input, shape index: {}]   ;;  %s829_s1 = inlined_call_operand.vmem [shape: bf16[768,6], index: 1, kind: input, shape index: {}]   ;;  %s830_s2 = inlined_call_operand.vmem [shape: f32[1,6], index: 2, kind: input, shape index: {}]   ;;  %s831_s3 = inlined_call_operand.hbm [shape: f32[2,6], index: 3, kind: output, shape index: {}]  }
   0x1   :  { %s740_s14 = smov 0  }
   0x2 LB: > { %s556_s15 = sadd.s32 4294967295, %s711_s14   ;;  %s26_s16 = sadd.s32 1, %s707_s13  ;;  %s711_s14 = sphi %s740_s14, %s14_s14   ;;  %s707_s13 = sphi %s738_s13, %s834_s13   ;;  %s703_s12 = sphi %s736_s12, %s833_s12  }
   0x3   : > { %p27_p0 = scmp.ge.s32.totalorder %s26_s16, 3  ;;  %p560_p1 = scmp.ge.s32.totalorder %s711_s14, 1 }
   0x4   : > { %p189_p2 = scmp.lt.s32.totalorder %s711_s14, 4 }
   0x5   : > { %s836_s16 = smov (%p27_p0, %s26_s16), 0 }
   0x6   : > { %p190_p3 = pnand %p560_p1, %p189_p2 }
   0x7   : > { %s561_s17 = sshll.u32 (!%p190_p3), %s703_s12, 1  ;;  %s562_s18 = sshll.u32 (!%p190_p3), %s703_s12, 5 }
   0x8   : > { %193 = sbr.rel (%p190_p3) target bundleno = 310 (0x136), region = 32  ;;  %p225_p4 = scmp.lt.s32.totalorder (!%p190_p3), %s561_s17, 5 }
   0x9   : > { %p232_p5 = scmp.lt.s32.totalorder (!%p190_p3), %s562_s18, 95  ;;  %p564_p6 = scmp.ne.s32.totalorder (!%p190_p3), %s703_s12, 0 }
   0xf   : > { %s838_s17 = smov (!%p225_p4, %s561_s17), 5  ;;  %s840_s18 = smov (!%p232_p5, %s562_s18), 95 }
  0x10   : > { %s229_s21 = scalar_lea.vmem %s828_s0, %s838_s17  ;;  %s563_s22 = sshll.u32 %s840_s18, 2  ;;  %vm248_vm0 = vcmask (!%p564_p6), 41984   ;;  %v713_v0 = vmov (!%p564_p6), 0.0  }
  0x11   : > { %s768_s25 = scalar_lea.vmem %s829_s1, %s563_s22  ;;  %247 = sbr.rel (%p564_p6) target bundleno = 24 (0x18), region = 36  ;;  %249 = vst.msk [vmem:[#allocation2] sm:$0x3] (!%p564_p6), %vm248_vm0, %v713_v0 }
  0x18 PF: > { %v643_v1 = vld [vmem:[%s768_s25 + $0x40] sm:$0xff]   ;;  %v645_v3 = vld [vmem:[%s768_s25 + $0x48] sm:$0xff]   ;;  %v647_v5 = vld [vmem:[%s768_s25 + $0x50] sm:$0xff]   ;;  %v296_v10 = vlaneseq  ;;  %v714_v14 = vmov 1966171168   ;;  %vm446_vm1 = vcmask 41984  }
  0x19   : > { %v644_v2 = vld [vmem:[%s768_s25] sm:$0xff]   ;;  %588 = vmatprep.subr.bf16.mxu0 %v643_v1  ;;  %v646_v4 = vld [vmem:[%s768_s25 + $0x8] sm:$0xff]   ;;  %v648_v6 = vld [vmem:[%s768_s25 + $0x10] sm:$0xff]   ;;  %v294_v15 = vunpack.c.l.s4 %v714_v14  ;;  %p582_p7 = scmp.ne.s32.totalorder %s703_s12, 2 }
  0x1a   : > { %589 = vmatpush3.bf16.msra.mxu0 %v644_v2  ;;  %v649_v7 = vld [vmem:[%s768_s25 + $0x58] sm:$0xff]   ;;  %v651_v9 = vld [vmem:[%s768_s25 + $0x60] sm:$0xff]   ;;  %v653_v12 = vld [vmem:[%s768_s25 + $0x68] sm:$0xff]   ;;  %v297_v16 = vshrl.u32 %v296_v10, 7 }
  0x1b   : > { %590 = vmatprep.subr.bf16.mxu0 %v645_v3  ;;  %v650_v8 = vld [vmem:[%s768_s25 + $0x18] sm:$0xff]   ;;  %v652_v11 = vld [vmem:[%s768_s25 + $0x20] sm:$0xff]   ;;  %v654_v17 = vld [vmem:[%s768_s25 + $0x28] sm:$0xff]   ;;  %v295_v19 = vunpack.c.0.s8 %v294_v15 }
  0x1c   : > { %v565_v13 = vld.sshfl [vmem:[%s229_s21] sm:$0x11 pattern:$0x75316420]  ;;  %v655_v20 = vld [vmem:[%s768_s25 + $0x70] sm:$0xff]   ;;  %v657_v24 = vld [vmem:[%s768_s25 + $0x78] sm:$0xff]  }
  0x1d   : > { %v292_v18 = vcombine.high %v565_v13, %v565_v13  ;;  %v298_v21 = vsub.s32 %v295_v19, %v297_v16  ;;  %v656_v22 = vld [vmem:[%s768_s25 + $0x30] sm:$0xff]   ;;  %v658_v25 = vld [vmem:[%s768_s25 + $0x38] sm:$0xff]   ;;  %v250_v28 = vld [vmem:[#allocation2] sm:$0x3] }
  0x1e   : > { %591 = vmatpush3.bf16.msra.mxu0 %v646_v4  ;;  %v583_v35 = vld [vmem:[%s830_s2] ss:$0 sm:$0xff] (!%p582_p7) }
  0x1f   : > { %592 = vmatprep.subr.bf16.mxu0 %v647_v5  ;;  %v306_v23 = vrot.slane %v292_v18, %v298_v21  ;;  %v299_v26 = vrot.slane %v565_v13, %v298_v21 }
  0x21   : > { %437 = vmatprep.mubr.bf16.mxu0 %v306_v23 }
  0x22   : > { %593 = vmatpush3.bf16.msra.mxu0 %v648_v6 }
  0x23   : > { %594 = vmatprep.subr.bf16.mxu0 %v649_v7 }
  0x26   : > { %595 = vmatpush3.bf16.msra.mxu0 %v650_v8 }
  0x27   : > { %596 = vmatprep.subr.bf16.mxu0 %v651_v9 }
  0x2a   : > { %597 = vmatpush3.bf16.msra.mxu0 %v652_v11 }
  0x2b   : > { %598 = vmatprep.subr.bf16.mxu0 %v653_v12 }
  0x2e   : > { %599 = vmatpush3.bf16.msra.mxu0 %v654_v17 }
  0x2f   : > { %600 = vmatprep.subr.bf16.mxu0 %v655_v20 }
  0x32   : > { %601 = vmatpush3.bf16.msra.mxu0 %v656_v22 }
  0x33   : > { %602 = vmatprep.subr.bf16.mxu0 %v657_v24 }
  0x36   : > { %603 = vmatpush3.bf16.msra.mxu0 %v658_v25 }
  0x39   : > { %438 = vmatmul.mubr.bf16.vlgmr.msra.gmra.mrb[0].mxu0 %v299_v26 }
 0x10c   : > { %v604_v27 = vpop.f32.mrb[0].mxu0  ;;  %451 = sbr.rel (%p582_p7) target bundleno = 285 (0x11d), region = 40 }
 0x10d   : > { %v605_v29 = vpop.f32.mrb[1].mxu0 }
 0x10e   : > { %v606_v30 = vadd.f32 %v605_v29, %v604_v27  ;;  %v607_v31 = vpop.f32.mrb[2].mxu0 }
 0x10f   : > { %v608_v32 = vpop.f32.mrb[3].mxu0 }
 0x110   : > { %v445_v33 = vadd.f32 %v606_v30, %v250_v28 }
 0x112   : > { %447 = vst.msk [vmem:[#allocation2] sm:$0x3] %vm446_vm1, %v445_v33 }
 0x119   : > { %v452_v34 = vld [vmem:[#allocation2] sm:$0x3] }
 0x11a   : > { %v460_v36 = vadd.f32 %v583_v35, %v452_v34 }
 0x11c   : > { %461 = vst.msk [vmem:[#allocation3] sm:$0x3] %vm446_vm1, %v460_v36 }
 0x11d PF: > { %p793_p8 = scmp.eq.s32.totalorder %s556_s15, 2  ;;  %s715_s29 = smov [#allocation3]  }
 0x11e   : > { %s472_s30 = sshll.u32 %s715_s29, 4  ;;  %s473_s30 = int_to_ptr.vmem [resolvable:$true] %s472_s30 }
 0x11f   : > { %s659_s4 = scalar_lea.vmem %s473_s30, 32  ;;  %p666_p12 = scmp.lt.s32.totalorder %s473_s30, %s473_s30 }
 0x120   : > { %p660_p9 = scmp.ne.s32.totalorder %s473_s30, %s659_s4  ;;  %p667_p13 = scmp.lt.s32.totalorder %s659_s4, %s659_s4 }
 0x122   : > { %p661_p10 = pnand %p660_p9, %p793_p8  ;;  %p668_p0 = por %p667_p13, %p666_p12 }
 0x124   : > { %p662_p11 = pneg %p661_p10 }
 0x126   : > { %p669_p1 = pnand %p668_p0, %p662_p11 }
 0x128   : > { %672 = shalt.err (!%p669_p1)
}
 0x129   : > { %s673_s7 = scalar_lea.hbm %s831_s3, 32 }
 0x12a   : > { %p674_p2 = scmp.ne.s32.totalorder %s831_s3, %s673_s7  ;;  %p679_p5 = scmp.lt.u32.totalorder %s673_s7, %s831_s3 }
 0x12c   : > { %p675_p3 = pnand %p674_p2, %p793_p8 }
 0x12e   : > { %p676_p4 = pneg %p675_p3 }
 0x130   : > { %p681_p6 = pnand %p679_p5, %p676_p4 }
 0x132   : > { %684 = shalt.err (!%p681_p6)
}
 0x133   : > { %611 = dma.vmem_to_hbm [thread:$0]  (%p793_p8), %s473_s30, 32, %s831_s3, [#allocation4]  }
 0x134   : > { %698 = dma.done.wait (%p793_p8), [#allocation4], 32  }
 0x135   : > { %700 = vsyncadd (%p793_p8), [#allocation4], 4294967264 }
 0x136 PF: > { %s14_s14 = sadd.s32 1, %s711_s14   ;;  %s833_s12 = smov %s707_s13 }
 0x137   : > { %p11_p7 = scmp.ge.s32.totalorder %s14_s14, 5   ;;  %s834_s13 = smov %s836_s16 }
 0x139   :  { %13 = sbr.rel (!%p11_p7) target bundleno = 2 (0x2), region = 74 }
 0x140   :  { %485 = vsyncpa [#allocation4], 1 }
 0x141   :  { %487 = vsyncpa [#allocation4 + $0x1], 1 }

</bundles_post_ra>
